<compile_context>
chip_gen: v5e
topology: v5e:2x2
jax: 0.10.0
libtpu: 0.0.40
codegen_flags: <defaults>
</compile_context>

<pallas_src>
import jax
import jax.numpy as jnp
from jax import lax
from jax.experimental import pallas as pl
from jax.experimental.pallas import tpu as pltpu

HIDDEN = 512
EPS = 1e-5
LANE = 128           # lane width for padding in/out feature dims
TILE_B_MAX = 1024    # max rows per grid step (multiple of 128)


def _round_up(x, m):
    return ((x + m - 1) // m) * m


def _pick_tile_b(batch):
    """Adaptive batch tile: multiple of 128, capped at TILE_B_MAX.

    For large B, target ~B/2 per tile so there are always >= 2 grid steps
    (lets v7x's two TensorCores both work); for small B, shrink to a single
    128-row tile so we don't burn MXU/VPU cycles on zero padding.
    """
    half = _round_up(max(1, (batch + 1) // 2), LANE)
    return int(min(TILE_B_MAX, max(LANE, half)))


def _mlp_kernel(
    x_ref,                    # (tile_b, K_pad)   bf16
    w1_ref, b1_ref,           # (K_pad, 512) bf16, (1, 512) bf16
    w2_ref, b2_ref,           # BN1 pre-folded: (512, 512) bf16, (1, 512) bf16
    w3_ref, b3_ref,           # BN2 pre-folded: (512, 512) bf16, (1, 512) f32
    w4_ref, b4_ref,           # LN affine pre-folded: (512, OUT_pad) bf16, (1, OUT_pad) f32
    o_ref,                    # (tile_b, OUT_pad) f32
):
    # --- block 1: Linear -> ReLU   (bias/ReLU in bf16: 2 elems/lane on VALU) ---
    h = jnp.dot(x_ref[...], w1_ref[...], preferred_element_type=jnp.float32)
    h = jnp.maximum(h.astype(jnp.bfloat16) + b1_ref[...], 0.0)

    # --- block 2: Linear (BN1 folded) -> ReLU ---
    h = jnp.dot(h, w2_ref[...], preferred_element_type=jnp.float32)
    h = jnp.maximum(h.astype(jnp.bfloat16) + b2_ref[...], 0.0)

    # --- block 3: Linear (BN2 folded) -> ReLU -> LayerNorm (f32 norm math) ---
    h = jnp.dot(h, w3_ref[...], preferred_element_type=jnp.float32)
    h = jnp.maximum(h + b3_ref[...], 0.0)

    mu = jnp.mean(h, axis=-1, keepdims=True)
    ex2 = jnp.mean(h * h, axis=-1, keepdims=True)        # one-pass variance
    var = jnp.maximum(ex2 - mu * mu, 0.0)                # clamp f32 cancellation
    h = (h - mu) * lax.rsqrt(var + EPS)                  # gamma/beta folded into head

    # --- head: Linear(512, OUT_pad) — lane-dense full-width unmasked store ---
    o_ref[...] = (
        jnp.dot(h.astype(jnp.bfloat16), w4_ref[...],
                preferred_element_type=jnp.float32)
        + b4_ref[...]
    )


@jax.jit
def neural_network_forward(x, params):
    """x: [B, input_dim] float32 -> [B, output_dim] float32."""
    B, in_dim = x.shape
    out_dim = params["w4"].shape[1]
    tile_b = _pick_tile_b(B)

    # ---- fold eval-mode BatchNorms into the following linears (f32) ----
    s1 = params["g1"] * lax.rsqrt(params["rv1"] + EPS)          # (1, 512)
    t1 = params["be1"] - params["rm1"] * s1                     # (1, 512)
    s2 = params["g2"] * lax.rsqrt(params["rv2"] + EPS)
    t2 = params["be2"] - params["rm2"] * s2

    w2_f = params["w2"] * s1.reshape(HIDDEN, 1)                 # diag(s1) @ W2
    b2_f = params["b2"] + t1 @ params["w2"]
    w3_f = params["w3"] * s2.reshape(HIDDEN, 1)                 # diag(s2) @ W3
    b3_f = params["b3"] + t2 @ params["w3"]

    # ---- fold LayerNorm affine into the head linear (exact) ----
    w4_f = params["w4"] * params["lng"].reshape(HIDDEN, 1)      # diag(gamma) @ W4
    b4_f = params["b4"] + params["lnb"] @ params["w4"]

    # ---- pad feature dims to lane width, batch to the tile ----
    k_pad = _round_up(in_dim, LANE)
    out_pad = _round_up(out_dim, LANE)
    b_tiles = pl.cdiv(B, tile_b)
    b_pad = b_tiles * tile_b

    x_p = jnp.pad(x, ((0, b_pad - B), (0, k_pad - in_dim))).astype(jnp.bfloat16)
    w1_p = jnp.pad(params["w1"], ((0, k_pad - in_dim), (0, 0))).astype(jnp.bfloat16)
    w4_p = jnp.pad(w4_f, ((0, 0), (0, out_pad - out_dim))).astype(jnp.bfloat16)
    b4_p = jnp.pad(b4_f, ((0, 0), (0, out_pad - out_dim)))      # f32

    b1_b = params["b1"].astype(jnp.bfloat16)                    # bf16 bias/ReLU chain
    b2_b = b2_f.astype(jnp.bfloat16)
    w2_b = w2_f.astype(jnp.bfloat16)
    w3_b = w3_f.astype(jnp.bfloat16)
    # b3_f stays f32: it feeds the f32 LayerNorm math.

    def const2d(shape):  # weight/bias block: constant index_map -> VMEM-resident
        return pl.BlockSpec(shape, lambda i: (0, 0))

    in_specs = [
        pl.BlockSpec((tile_b, k_pad), lambda i: (i, 0)),    # x tile
        const2d((k_pad, HIDDEN)), const2d((1, HIDDEN)),     # W1, b1
        const2d((HIDDEN, HIDDEN)), const2d((1, HIDDEN)),    # W2', b2'
        const2d((HIDDEN, HIDDEN)), const2d((1, HIDDEN)),    # W3', b3'
        const2d((HIDDEN, out_pad)), const2d((1, out_pad)),  # W4', b4'
    ]
    out_specs = pl.BlockSpec((tile_b, out_pad), lambda i: (i, 0))

    out = pl.pallas_call(
        _mlp_kernel,
        out_shape=jax.ShapeDtypeStruct((b_pad, out_pad), jnp.float32),
        grid=(b_tiles,),
        in_specs=in_specs,
        out_specs=out_specs,
        compiler_params=pltpu.CompilerParams(
            dimension_semantics=("parallel",),
        ),
    )(
        x_p,
        w1_p, b1_b,
        w2_b, b2_b,
        w3_b, b3_f,
        w4_p, b4_p,
    )
    return out[:B, :out_dim]


def init_params(key, input_dim, output_dim):
    """Synthetic parameters mirroring the PyTorch module's shapes.

    Linear weights stored as [in, out] (transpose of torch's [out, in]);
    per-feature vectors stored as [1, F].
    """
    ks = jax.random.split(key, 8)

    def lin(kw, kb, fan_in, fan_out):
        bound = 1.0 / jnp.sqrt(fan_in)
        w = jax.random.uniform(kw, (fan_in, fan_out), jnp.float32, -bound, bound)
        b = jax.random.uniform(kb, (1, fan_out), jnp.float32, -bound, bound)
        return w, b

    w1, b1 = lin(ks[0], ks[1], input_dim, HIDDEN)
    w2, b2 = lin(ks[2], ks[3], HIDDEN, HIDDEN)
    w3, b3 = lin(ks[4], ks[5], HIDDEN, HIDDEN)
    w4, b4 = lin(ks[6], ks[7], HIDDEN, output_dim)

    ones = jnp.ones((1, HIDDEN), jnp.float32)
    zeros = jnp.zeros((1, HIDDEN), jnp.float32)

    return dict(
        w1=w1, b1=b1, g1=ones, be1=zeros, rm1=zeros, rv1=ones,   # BatchNorm1d #1
        w2=w2, b2=b2, g2=ones, be2=zeros, rm2=zeros, rv2=ones,   # BatchNorm1d #2
        w3=w3, b3=b3, lng=ones, lnb=zeros,                       # LayerNorm
        w4=w4, b4=b4,
    )


def _reference(x, p):
    """Pure-JAX f32 reference with the original (un-folded) eval semantics."""
    h = jnp.maximum(x @ p["w1"] + p["b1"], 0.0)
    h = (h - p["rm1"]) / jnp.sqrt(p["rv1"] + EPS) * p["g1"] + p["be1"]
    h = jnp.maximum(h @ p["w2"] + p["b2"], 0.0)
    h = (h - p["rm2"]) / jnp.sqrt(p["rv2"] + EPS) * p["g2"] + p["be2"]
    h = jnp.maximum(h @ p["w3"] + p["b3"], 0.0)
    mu = jnp.mean(h, axis=-1, keepdims=True)
    var = jnp.mean(jnp.square(h - mu), axis=-1, keepdims=True)
    h = (h - mu) / jnp.sqrt(var + EPS) * p["lng"] + p["lnb"]
    return h @ p["w4"] + p["b4"]


if __name__ == "__main__":
    INPUT_DIM = 32
    OUTPUT_DIM = 8
    BATCH = 8

    key = jax.random.PRNGKey(0)
    k_x, k_p = jax.random.split(key)

    x = jax.random.normal(k_x, (BATCH, INPUT_DIM), jnp.float32)
    params = init_params(k_p, INPUT_DIM, OUTPUT_DIM)

    out = neural_network_forward(x, params)
    out = jax.block_until_ready(out)

    ref = _reference(x, params)
    assert out.shape == (BATCH, OUTPUT_DIM)
    assert jnp.all(jnp.isfinite(out)), "non-finite values in kernel output"
    # bf16 matmuls + BN/LN folding + bf16 bias/ReLU: loosened tolerance vs f32 ref.
    assert jnp.allclose(out, ref, atol=5e-2, rtol=5e-2), "mismatch vs reference"

    print("KERNEL_OK")
</pallas_src>

<mosaic_0001>
module attributes {stable_mosaic.version = 11 : i64} {
  func.func @_mlp_kernel(%arg0: i32, %arg1: memref<128x128xbf16, #tpu.memory_space<vmem>>, %arg2: memref<128x512xbf16, #tpu.memory_space<vmem>>, %arg3: memref<1x512xbf16, #tpu.memory_space<vmem>>, %arg4: memref<512x512xbf16, #tpu.memory_space<vmem>>, %arg5: memref<1x512xbf16, #tpu.memory_space<vmem>>, %arg6: memref<512x512xbf16, #tpu.memory_space<vmem>>, %arg7: memref<1x512xf32, #tpu.memory_space<vmem>>, %arg8: memref<512x128xbf16, #tpu.memory_space<vmem>>, %arg9: memref<1x128xf32, #tpu.memory_space<vmem>>, %arg10: memref<128x128xf32, #tpu.memory_space<vmem>>) attributes {dimension_semantics = [#tpu.dimension_semantics<parallel>], iteration_bounds = array<i64: 1>, scalar_prefetch = 0 : i64, scratch_operands = 0 : i64, tpu.core_type = #tpu.core_type<tc>, window_params = [{transform_indices = @transform_0, window_bounds = array<i64: 128, 128>}, {pipeline_mode = #tpu.pipeline_mode<synchronous>, transform_indices = @transform_1, window_bounds = array<i64: 128, 512>}, {pipeline_mode = #tpu.pipeline_mode<synchronous>, transform_indices = @transform_2, window_bounds = array<i64: 1, 512>}, {pipeline_mode = #tpu.pipeline_mode<synchronous>, transform_indices = @transform_3, window_bounds = array<i64: 512, 512>}, {pipeline_mode = #tpu.pipeline_mode<synchronous>, transform_indices = @transform_4, window_bounds = array<i64: 1, 512>}, {pipeline_mode = #tpu.pipeline_mode<synchronous>, transform_indices = @transform_5, window_bounds = array<i64: 512, 512>}, {pipeline_mode = #tpu.pipeline_mode<synchronous>, transform_indices = @transform_6, window_bounds = array<i64: 1, 512>}, {pipeline_mode = #tpu.pipeline_mode<synchronous>, transform_indices = @transform_7, window_bounds = array<i64: 512, 128>}, {pipeline_mode = #tpu.pipeline_mode<synchronous>, transform_indices = @transform_8, window_bounds = array<i64: 1, 128>}, {transform_indices = @transform_9, window_bounds = array<i64: 128, 128>}]} {
    %c0 = arith.constant 0 : index
    %c0_0 = arith.constant 0 : index
    %0 = vector.load %arg1[%c0, %c0_0] : memref<128x128xbf16, #tpu.memory_space<vmem>>, vector<128x128xbf16>
    %c0_1 = arith.constant 0 : index
    %c0_2 = arith.constant 0 : index
    %1 = vector.load %arg2[%c0_1, %c0_2] : memref<128x512xbf16, #tpu.memory_space<vmem>>, vector<128x512xbf16>
    %cst = arith.constant dense<0.000000e+00> : vector<128x512xf32>
    %2 = tpu.matmul %0, %1, %cst {dimension_numbers = #tpu.dot_dimension_numbers<[1], [0], [0], [1], [0, 0, 1, 1], [], []>} : vector<128x128xbf16>, vector<128x512xbf16>, vector<128x512xf32> -> vector<128x512xf32>
    %3 = arith.truncf %2 : vector<128x512xf32> to vector<128x512xbf16>
    %c0_3 = arith.constant 0 : index
    %c0_4 = arith.constant 0 : index
    %4 = vector.load %arg3[%c0_3, %c0_4] : memref<1x512xbf16, #tpu.memory_space<vmem>>, vector<1x512xbf16>
    %5 = vector.broadcast %4 : vector<1x512xbf16> to vector<128x512xbf16>
    %6 = arith.addf %3, %5 : vector<128x512xbf16>
    %cst_5 = arith.constant 0.000000e+00 : bf16
    %7 = vector.broadcast %cst_5 : bf16 to vector<128x512xbf16>
    %8 = arith.maximumf %6, %7 : vector<128x512xbf16>
    %c0_6 = arith.constant 0 : index
    %c0_7 = arith.constant 0 : index
    %9 = vector.load %arg4[%c0_6, %c0_7] : memref<512x512xbf16, #tpu.memory_space<vmem>>, vector<512x512xbf16>
    %cst_8 = arith.constant dense<0.000000e+00> : vector<128x512xf32>
    %10 = tpu.matmul %8, %9, %cst_8 {dimension_numbers = #tpu.dot_dimension_numbers<[1], [0], [0], [1], [0, 0, 1, 1], [], []>} : vector<128x512xbf16>, vector<512x512xbf16>, vector<128x512xf32> -> vector<128x512xf32>
    %11 = arith.truncf %10 : vector<128x512xf32> to vector<128x512xbf16>
    %c0_9 = arith.constant 0 : index
    %c0_10 = arith.constant 0 : index
    %12 = vector.load %arg5[%c0_9, %c0_10] : memref<1x512xbf16, #tpu.memory_space<vmem>>, vector<1x512xbf16>
    %13 = vector.broadcast %12 : vector<1x512xbf16> to vector<128x512xbf16>
    %14 = arith.addf %11, %13 : vector<128x512xbf16>
    %cst_11 = arith.constant 0.000000e+00 : bf16
    %15 = vector.broadcast %cst_11 : bf16 to vector<128x512xbf16>
    %16 = arith.maximumf %14, %15 : vector<128x512xbf16>
    %c0_12 = arith.constant 0 : index
    %c0_13 = arith.constant 0 : index
    %17 = vector.load %arg6[%c0_12, %c0_13] : memref<512x512xbf16, #tpu.memory_space<vmem>>, vector<512x512xbf16>
    %cst_14 = arith.constant dense<0.000000e+00> : vector<128x512xf32>
    %18 = tpu.matmul %16, %17, %cst_14 {dimension_numbers = #tpu.dot_dimension_numbers<[1], [0], [0], [1], [0, 0, 1, 1], [], []>} : vector<128x512xbf16>, vector<512x512xbf16>, vector<128x512xf32> -> vector<128x512xf32>
    %c0_15 = arith.constant 0 : index
    %c0_16 = arith.constant 0 : index
    %19 = vector.load %arg7[%c0_15, %c0_16] : memref<1x512xf32, #tpu.memory_space<vmem>>, vector<1x512xf32>
    %20 = vector.broadcast %19 : vector<1x512xf32> to vector<128x512xf32>
    %21 = arith.addf %18, %20 : vector<128x512xf32>
    %cst_17 = arith.constant 0.000000e+00 : f32
    %22 = vector.broadcast %cst_17 : f32 to vector<128x512xf32>
    %23 = arith.maximumf %21, %22 : vector<128x512xf32>
    %cst_18 = arith.constant dense<0.000000e+00> : vector<128xf32>
    %24 = vector.multi_reduction <add>, %23, %cst_18 [1] : vector<128x512xf32> to vector<128xf32>
    %25 = vector.shape_cast %24 : vector<128xf32> to vector<128x1xf32>
    %cst_19 = arith.constant 5.120000e+02 : f32
    %26 = vector.broadcast %cst_19 : f32 to vector<128x1xf32>
    %27 = arith.divf %25, %26 : vector<128x1xf32>
    %28 = arith.mulf %23, %23 : vector<128x512xf32>
    %cst_20 = arith.constant dense<0.000000e+00> : vector<128xf32>
    %29 = vector.multi_reduction <add>, %28, %cst_20 [1] : vector<128x512xf32> to vector<128xf32>
    %30 = vector.shape_cast %29 : vector<128xf32> to vector<128x1xf32>
    %cst_21 = arith.constant 5.120000e+02 : f32
    %31 = vector.broadcast %cst_21 : f32 to vector<128x1xf32>
    %32 = arith.divf %30, %31 : vector<128x1xf32>
    %33 = arith.mulf %27, %27 : vector<128x1xf32>
    %34 = arith.subf %32, %33 : vector<128x1xf32>
    %cst_22 = arith.constant 0.000000e+00 : f32
    %35 = vector.broadcast %cst_22 : f32 to vector<128x1xf32>
    %36 = arith.maximumf %34, %35 : vector<128x1xf32>
    %37 = vector.broadcast %27 : vector<128x1xf32> to vector<128x512xf32>
    %38 = arith.subf %23, %37 : vector<128x512xf32>
    %cst_23 = arith.constant 9.99999974E-6 : f32
    %39 = vector.broadcast %cst_23 : f32 to vector<128x1xf32>
    %40 = arith.addf %36, %39 : vector<128x1xf32>
    %41 = math.rsqrt %40 : vector<128x1xf32>
    %42 = vector.broadcast %41 : vector<128x1xf32> to vector<128x512xf32>
    %43 = arith.mulf %38, %42 : vector<128x512xf32>
    %44 = arith.truncf %43 : vector<128x512xf32> to vector<128x512xbf16>
    %c0_24 = arith.constant 0 : index
    %c0_25 = arith.constant 0 : index
    %45 = vector.load %arg8[%c0_24, %c0_25] : memref<512x128xbf16, #tpu.memory_space<vmem>>, vector<512x128xbf16>
    %cst_26 = arith.constant dense<0.000000e+00> : vector<128x128xf32>
    %46 = tpu.matmul %44, %45, %cst_26 {dimension_numbers = #tpu.dot_dimension_numbers<[1], [0], [0], [1], [0, 0, 1, 1], [], []>} : vector<128x512xbf16>, vector<512x128xbf16>, vector<128x128xf32> -> vector<128x128xf32>
    %c0_27 = arith.constant 0 : index
    %c0_28 = arith.constant 0 : index
    %47 = vector.load %arg9[%c0_27, %c0_28] : memref<1x128xf32, #tpu.memory_space<vmem>>, vector<1x128xf32>
    %48 = vector.broadcast %47 : vector<1x128xf32> to vector<128x128xf32>
    %49 = arith.addf %46, %48 : vector<128x128xf32>
    %c0_29 = arith.constant 0 : index
    %c0_30 = arith.constant 0 : index
    %50 = vector.load %arg10[%c0_29, %c0_30] : memref<128x128xf32, #tpu.memory_space<vmem>>, vector<128x128xf32>
    tpu.vector_store %arg10[%c0_29, %c0_30], %49 {strides = array<i32>} : memref<128x128xf32, #tpu.memory_space<vmem>>, vector<128x128xf32>,
    return
  }
  func.func @transform_0(%arg0: i32) -> (i32, i32) {
    %c0_i32 = arith.constant 0 : i32
    %c0_i32_0 = arith.constant 0 : i32
    return %arg0, %c0_i32 : i32, i32
  }
  func.func @transform_1(%arg0: i32) -> (i32, i32) {
    %c0_i32 = arith.constant 0 : i32
    %c0_i32_0 = arith.constant 0 : i32
    %c0_i32_1 = arith.constant 0 : i32
    return %c0_i32, %c0_i32_0 : i32, i32
  }
  func.func @transform_2(%arg0: i32) -> (i32, i32) {
    %c0_i32 = arith.constant 0 : i32
    %c0_i32_0 = arith.constant 0 : i32
    %c0_i32_1 = arith.constant 0 : i32
    return %c0_i32, %c0_i32_0 : i32, i32
  }
  func.func @transform_3(%arg0: i32) -> (i32, i32) {
    %c0_i32 = arith.constant 0 : i32
    %c0_i32_0 = arith.constant 0 : i32
    %c0_i32_1 = arith.constant 0 : i32
    return %c0_i32, %c0_i32_0 : i32, i32
  }
  func.func @transform_4(%arg0: i32) -> (i32, i32) {
    %c0_i32 = arith.constant 0 : i32
    %c0_i32_0 = arith.constant 0 : i32
    %c0_i32_1 = arith.constant 0 : i32
    return %c0_i32, %c0_i32_0 : i32, i32
  }
  func.func @transform_5(%arg0: i32) -> (i32, i32) {
    %c0_i32 = arith.constant 0 : i32
    %c0_i32_0 = arith.constant 0 : i32
    %c0_i32_1 = arith.constant 0 : i32
    return %c0_i32, %c0_i32_0 : i32, i32
  }
  func.func @transform_6(%arg0: i32) -> (i32, i32) {
    %c0_i32 = arith.constant 0 : i32
    %c0_i32_0 = arith.constant 0 : i32
    %c0_i32_1 = arith.constant 0 : i32
    return %c0_i32, %c0_i32_0 : i32, i32
  }
  func.func @transform_7(%arg0: i32) -> (i32, i32) {
    %c0_i32 = arith.constant 0 : i32
    %c0_i32_0 = arith.constant 0 : i32
    %c0_i32_1 = arith.constant 0 : i32
    return %c0_i32, %c0_i32_0 : i32, i32
  }
  func.func @transform_8(%arg0: i32) -> (i32, i32) {
    %c0_i32 = arith.constant 0 : i32
    %c0_i32_0 = arith.constant 0 : i32
    %c0_i32_1 = arith.constant 0 : i32
    return %c0_i32, %c0_i32_0 : i32, i32
  }
  func.func @transform_9(%arg0: i32) -> (i32, i32) {
    %c0_i32 = arith.constant 0 : i32
    %c0_i32_0 = arith.constant 0 : i32
    return %arg0, %c0_i32 : i32, i32
  }
}

</mosaic_0001>

<bundles_post_ra>
// kernel: neural_network_forward.1
= control target key start
LH: loop header
LB: loop body
LE: loop exit
PB: predicated region body
PF: predicated region fallthrough
CT: control target
= control target key end

     0   :  { %s10877_s1 = inlined_call_operand.vmem [shape: bf16[128,512], index: 1, kind: input, shape index: {}]   ;;  %s10878_s3 = inlined_call_operand.vmem [shape: bf16[512,512], index: 3, kind: input, shape index: {}]   ;;  %s10879_s0 = inlined_call_operand.vmem [shape: bf16[128,128], index: 0, kind: input, shape index: {}]   ;;  %s10880_s2 = inlined_call_operand.vmem [shape: bf16[1,512], index: 2, kind: input, shape index: {}]   ;;  %s10881_s4 = inlined_call_operand.vmem [shape: bf16[1,512], index: 4, kind: input, shape index: {}]   ;;  %s10882_s5 = inlined_call_operand.vmem [shape: bf16[512,512], index: 5, kind: input, shape index: {}]   ;;  %s10883_s6 = inlined_call_operand.vmem [shape: f32[1,512], index: 6, kind: input, shape index: {}]   ;;  %s10884_s7 = inlined_call_operand.vmem [shape: bf16[512,128], index: 7, kind: input, shape index: {}]   ;;  %s10885_s8 = inlined_call_operand.vmem [shape: f32[1,128], index: 8, kind: input, shape index: {}]   ;;  %s10886_s9 = inlined_call_operand.vmem [shape: f32[128,128], index: 9, kind: output, shape index: {}]  }
   0x1   :  { %v5681_v0 = vld [vmem:[%s10877_s1 + $0xe0] sm:$0xf]  ;;  %v6885_v1 = vld [vmem:[%s10877_s1 + $0xec] sm:$0xf0]  ;;  %v6883_v2 = vld [vmem:[%s10877_s1 + $0xe4] sm:$0xf] }
   0x2   :  { %v5682_v3 = vor.u32 %v6885_v1, %v5681_v0  ;;  %v5683_v4 = vld [vmem:[%s10877_s1 + $0xf0] sm:$0xf0]  ;;  %v5689_v5 = vld [vmem:[%s10877_s1 + $0xe8] sm:$0xf]  ;;  %v6886_v6 = vld [vmem:[%s10877_s1 + $0xf4] sm:$0xf0] }
   0x3   :  { %v5686_v7 = vor.u32 %v6883_v2, %v5683_v4  ;;  %v5690_v8 = vor.u32 %v6886_v6, %v5689_v5  ;;  %v6884_v9 = vld [vmem:[%s10877_s1 + $0xec] sm:$0xf]  ;;  %v5691_v10 = vld [vmem:[%s10877_s1 + $0xf8] sm:$0xf0]  ;;  %v5665_v11 = vld [vmem:[%s10877_s1 + $0xc0] sm:$0xf] }
   0x4   :  { %288 = vmatpush.bf16.msra.mxu0 %v5682_v3  ;;  %v5694_v12 = vor.u32 %v6884_v9, %v5691_v10  ;;  %v6881_v13 = vld [vmem:[%s10877_s1 + $0xcc] sm:$0xf0]  ;;  %v6879_v14 = vld [vmem:[%s10877_s1 + $0xc4] sm:$0xf]  ;;  %v5667_v15 = vld [vmem:[%s10877_s1 + $0xd0] sm:$0xf0] }
   0x5   :  { %337 = vmatpush.bf16.msra.mxu1 %v5686_v7  ;;  %386 = vmatpush.bf16.msra.mxu2 %v5690_v8  ;;  %v5666_v16 = vor.u32 %v6881_v13, %v5665_v11  ;;  %v5670_v17 = vor.u32 %v6879_v14, %v5667_v15  ;;  %v5673_v18 = vld [vmem:[%s10877_s1 + $0xc8] sm:$0xf]  ;;  %v6882_v19 = vld [vmem:[%s10877_s1 + $0xd4] sm:$0xf0]  ;;  %v6880_v20 = vld [vmem:[%s10877_s1 + $0xcc] sm:$0xf] }
   0x6   :  { %435 = vmatpush.bf16.msra.mxu3 %v5694_v12  ;;  %v5674_v21 = vor.u32 %v6882_v19, %v5673_v18  ;;  %v5675_v22 = vld [vmem:[%s10877_s1 + $0xd8] sm:$0xf0]  ;;  %v5649_v23 = vld [vmem:[%s10877_s1 + $0xa0] sm:$0xf]  ;;  %v6877_v24 = vld [vmem:[%s10877_s1 + $0xac] sm:$0xf0] }
   0x7   :  { %v5678_v25 = vor.u32 %v6880_v20, %v5675_v22  ;;  %v6875_v26 = vld [vmem:[%s10877_s1 + $0xa4] sm:$0xf]  ;;  %v5651_v27 = vld [vmem:[%s10877_s1 + $0xb0] sm:$0xf0]  ;;  %v5657_v28 = vld [vmem:[%s10877_s1 + $0xa8] sm:$0xf]  ;;  %v5650_v29 = vor.u32 %v6877_v24, %v5649_v23 }
   0x8   :  { %289 = vmatpush.bf16.msra.mxu0 %v5666_v16  ;;  %v6878_v30 = vld [vmem:[%s10877_s1 + $0xb4] sm:$0xf0]  ;;  %v6876_v31 = vld [vmem:[%s10877_s1 + $0xac] sm:$0xf]  ;;  %v5659_v32 = vld [vmem:[%s10877_s1 + $0xb8] sm:$0xf0]  ;;  %v5654_v33 = vor.u32 %v6875_v26, %v5651_v27 }
   0x9   :  { %338 = vmatpush.bf16.msra.mxu1 %v5670_v17  ;;  %387 = vmatpush.bf16.msra.mxu2 %v5674_v21  ;;  %v5658_v34 = vor.u32 %v6878_v30, %v5657_v28  ;;  %v5633_v35 = vld [vmem:[%s10877_s1 + $0x80] sm:$0xf]  ;;  %v6873_v36 = vld [vmem:[%s10877_s1 + $0x8c] sm:$0xf0]  ;;  %v6871_v37 = vld [vmem:[%s10877_s1 + $0x84] sm:$0xf]  ;;  %v5662_v38 = vor.u32 %v6876_v31, %v5659_v32 }
   0xa   :  { %436 = vmatpush.bf16.msra.mxu3 %v5678_v25  ;;  %v5635_v39 = vld [vmem:[%s10877_s1 + $0x90] sm:$0xf0]  ;;  %v5641_v40 = vld [vmem:[%s10877_s1 + $0x88] sm:$0xf]  ;;  %v6874_v41 = vld [vmem:[%s10877_s1 + $0x94] sm:$0xf0]  ;;  %v5634_v44 = vor.u32 %v6873_v36, %v5633_v35 }
   0xb   :  { %v6872_v42 = vld [vmem:[%s10877_s1 + $0x8c] sm:$0xf]  ;;  %v5643_v43 = vld [vmem:[%s10877_s1 + $0x98] sm:$0xf0]  ;;  %v5638_v45 = vor.u32 %v6871_v37, %v5635_v39  ;;  %v5642_v46 = vor.u32 %v6874_v41, %v5641_v40  ;;  %v5617_v47 = vld [vmem:[%s10877_s1 + $0x60] sm:$0xf] }
   0xc   :  { %290 = vmatpush.bf16.msra.mxu0 %v5650_v29  ;;  %v6869_v48 = vld [vmem:[%s10877_s1 + $0x6c] sm:$0xf0]  ;;  %v6867_v49 = vld [vmem:[%s10877_s1 + $0x64] sm:$0xf]  ;;  %v5646_v50 = vor.u32 %v6872_v42, %v5643_v43  ;;  %v5619_v51 = vld [vmem:[%s10877_s1 + $0x70] sm:$0xf0] }
   0xd   :  { %339 = vmatpush.bf16.msra.mxu1 %v5654_v33  ;;  %388 = vmatpush.bf16.msra.mxu2 %v5658_v34  ;;  %v5625_v52 = vld [vmem:[%s10877_s1 + $0x68] sm:$0xf]  ;;  %v6870_v53 = vld [vmem:[%s10877_s1 + $0x74] sm:$0xf0]  ;;  %v6868_v54 = vld [vmem:[%s10877_s1 + $0x6c] sm:$0xf]  ;;  %v5618_v56 = vor.u32 %v6869_v48, %v5617_v47  ;;  %v5622_v57 = vor.u32 %v6867_v49, %v5619_v51 }
   0xe   :  { %437 = vmatpush.bf16.msra.mxu3 %v5662_v38  ;;  %v5627_v55 = vld [vmem:[%s10877_s1 + $0x78] sm:$0xf0]  ;;  %v5626_v58 = vor.u32 %v6870_v53, %v5625_v52  ;;  %v5601_v59 = vld [vmem:[%s10877_s1 + $0x40] sm:$0xf]  ;;  %v6865_v60 = vld [vmem:[%s10877_s1 + $0x4c] sm:$0xf0] }
   0xf   :  { %v6863_v61 = vld [vmem:[%s10877_s1 + $0x44] sm:$0xf]  ;;  %v5630_v62 = vor.u32 %v6868_v54, %v5627_v55  ;;  %v5603_v63 = vld [vmem:[%s10877_s1 + $0x50] sm:$0xf0]  ;;  %v5609_v0 = vld [vmem:[%s10877_s1 + $0x48] sm:$0xf]  ;;  %v5602_v4 = vor.u32 %v6865_v60, %v5601_v59 }
  0x10   :  { %291 = vmatpush.bf16.msra.mxu0 %v5634_v44  ;;  %v6866_v1 = vld [vmem:[%s10877_s1 + $0x54] sm:$0xf0]  ;;  %v6864_v2 = vld [vmem:[%s10877_s1 + $0x4c] sm:$0xf]  ;;  %v5611_v3 = vld [vmem:[%s10877_s1 + $0x58] sm:$0xf0]  ;;  %v5606_v5 = vor.u32 %v6863_v61, %v5603_v63 }
  0x11   :  { %340 = vmatpush.bf16.msra.mxu1 %v5638_v45  ;;  %389 = vmatpush.bf16.msra.mxu2 %v5642_v46  ;;  %v5610_v6 = vor.u32 %v6866_v1, %v5609_v0  ;;  %v5585_v7 = vld [vmem:[%s10877_s1 + $0x20] sm:$0xf]  ;;  %v6861_v8 = vld [vmem:[%s10877_s1 + $0x2c] sm:$0xf0]  ;;  %v6859_v9 = vld [vmem:[%s10877_s1 + $0x24] sm:$0xf]  ;;  %v5614_v10 = vor.u32 %v6864_v2, %v5611_v3 }
  0x12   :  { %438 = vmatpush.bf16.msra.mxu3 %v5646_v50  ;;  %v5587_v11 = vld [vmem:[%s10877_s1 + $0x30] sm:$0xf0]  ;;  %v5593_v12 = vld [vmem:[%s10877_s1 + $0x28] sm:$0xf]  ;;  %v6862_v13 = vld [vmem:[%s10877_s1 + $0x34] sm:$0xf0]  ;;  %v5586_v16 = vor.u32 %v6861_v8, %v5585_v7 }
  0x13   :  { %v6860_v14 = vld [vmem:[%s10877_s1 + $0x2c] sm:$0xf]  ;;  %v5595_v15 = vld [vmem:[%s10877_s1 + $0x38] sm:$0xf0]  ;;  %v5569_v17 = vld [vmem:[%s10877_s1] sm:$0xf]  ;;  %v5590_v18 = vor.u32 %v6859_v9, %v5587_v11  ;;  %v5594_v19 = vor.u32 %v6862_v13, %v5593_v12 }
  0x14   :  { %292 = vmatpush.bf16.msra.mxu0 %v5618_v56  ;;  %v6857_v20 = vld [vmem:[%s10877_s1 + $0xc] sm:$0xf0]  ;;  %v6855_v21 = vld [vmem:[%s10877_s1 + $0x4] sm:$0xf]  ;;  %v5571_v22 = vld [vmem:[%s10877_s1 + $0x10] sm:$0xf0]  ;;  %v5598_v23 = vor.u32 %v6860_v14, %v5595_v15 }
  0x15   :  { %341 = vmatpush.bf16.msra.mxu1 %v5622_v57  ;;  %390 = vmatpush.bf16.msra.mxu2 %v5626_v58  ;;  %v5577_v24 = vld [vmem:[%s10877_s1 + $0x8] sm:$0xf]  ;;  %v6858_v25 = vld [vmem:[%s10877_s1 + $0x14] sm:$0xf0]  ;;  %v6856_v26 = vld [vmem:[%s10877_s1 + $0xc] sm:$0xf]  ;;  %v5570_v30 = vor.u32 %v6857_v20, %v5569_v17  ;;  %v5574_v33 = vor.u32 %v6855_v21, %v5571_v22 }
  0x16   :  { %439 = vmatpush.bf16.msra.mxu3 %v5630_v62  ;;  %v5579_v27 = vld [vmem:[%s10877_s1 + $0x18] sm:$0xf0]  ;;  %v6065_v28 = vld [vmem:[%s10878_s3 + $0x2e0] sm:$0xf]  ;;  %v6981_v29 = vld [vmem:[%s10878_s3 + $0x2ec] sm:$0xf0]  ;;  %v5578_v34 = vor.u32 %v6858_v25, %v5577_v24 }
  0x17   :  { %v6193_v31 = vld [vmem:[%s10878_s3 + $0x3e0] sm:$0xf]  ;;  %v7013_v32 = vld [vmem:[%s10878_s3 + $0x3ec] sm:$0xf0]  ;;  %v5582_v35 = vor.u32 %v6856_v26, %v5579_v27  ;;  %v6066_v36 = vor.u32 %v6981_v29, %v6065_v28  ;;  %v6848_v57 = vld [vmem:[%s10879_s0 + $0x8] sm:$0xff] }
  0x18   :  { %293 = vmatpush.bf16.msra.mxu0 %v5602_v4  ;;  %v5809_v37 = vld [vmem:[%s10878_s3 + $0xe0] sm:$0xf]  ;;  %v6917_v38 = vld [vmem:[%s10878_s3 + $0xec] sm:$0xf0]  ;;  %v6194_v40 = vor.u32 %v7013_v32, %v6193_v31 }
  0x19   :  { %342 = vmatpush.bf16.msra.mxu1 %v5606_v5  ;;  %391 = vmatpush.bf16.msra.mxu2 %v5610_v6  ;;  %v6847_v39 = vld [vmem:[%s10879_s0] sm:$0xff]  ;;  %v6949_v42 = vld [vmem:[%s10878_s3 + $0x1ec] sm:$0xf0]  ;;  %v5810_v43 = vor.u32 %v6917_v38, %v5809_v37 }
  0x1a   :  { %440 = vmatpush.bf16.msra.mxu3 %v5614_v10  ;;  %v5937_v41 = vld [vmem:[%s10878_s3 + $0x1e0] sm:$0xf]  ;;  %v6977_v46 = vld [vmem:[%s10878_s3 + $0x2cc] sm:$0xf0] }
  0x1b   :  { %v5938_v44 = vor.u32 %v6949_v42, %v5937_v41  ;;  %v6049_v45 = vld [vmem:[%s10878_s3 + $0x2c0] sm:$0xf]  ;;  %v7009_v49 = vld [vmem:[%s10878_s3 + $0x3cc] sm:$0xf0] }
  0x1c   :  { %294 = vmatpush.bf16.msra.mxu0 %v5586_v16  ;;  %v6177_v47 = vld [vmem:[%s10878_s3 + $0x3c0] sm:$0xf]  ;;  %v6050_v48 = vor.u32 %v6977_v46, %v6049_v45  ;;  %v6913_v51 = vld [vmem:[%s10878_s3 + $0xcc] sm:$0xf0]  ;;  %v6852_v45 = vld [vmem:[%s10879_s0 + $0x28] sm:$0xff] }
  0x1d   :  { %343 = vmatpush.bf16.msra.mxu1 %v5590_v18  ;;  %392 = vmatpush.bf16.msra.mxu2 %v5594_v19  ;;  %v5793_v50 = vld [vmem:[%s10878_s3 + $0xc0] sm:$0xf]  ;;  %v6178_v52 = vor.u32 %v7009_v49, %v6177_v47  ;;  %v6945_v55 = vld [vmem:[%s10878_s3 + $0x1cc] sm:$0xf0]  ;;  %v6850_v19 = vld [vmem:[%s10879_s0 + $0x18] sm:$0xff] }
  0x1e   :  { %441 = vmatpush.bf16.msra.mxu3 %v5598_v23  ;;  %v5794_v53 = vor.u32 %v6913_v51, %v5793_v50  ;;  %v5921_v54 = vld [vmem:[%s10878_s3 + $0x1c0] sm:$0xf]  ;;  %v6973_v59 = vld [vmem:[%s10878_s3 + $0x2ac] sm:$0xf0] }
  0x1f   :  { %v5922_v56 = vor.u32 %v6945_v55, %v5921_v54  ;;  %v6033_v58 = vld [vmem:[%s10878_s3 + $0x2a0] sm:$0xf]  ;;  %v7005_v62 = vld [vmem:[%s10878_s3 + $0x3ac] sm:$0xf0] }
  0x20   :  { %295 = vmatpush.bf16.msra.mxu0 %v5570_v30  ;;  %v6161_v60 = vld [vmem:[%s10878_s3 + $0x3a0] sm:$0xf]  ;;  %v6034_v61 = vor.u32 %v6973_v59, %v6033_v58  ;;  %v6909_v0 = vld [vmem:[%s10878_s3 + $0xac] sm:$0xf0] }
  0x21   :  { %344 = vmatpush.bf16.msra.mxu1 %v5574_v33  ;;  %393 = vmatpush.bf16.msra.mxu2 %v5578_v34  ;;  %v5777_v63 = vld [vmem:[%s10878_s3 + $0xa0] sm:$0xf]  ;;  %v6162_v1 = vor.u32 %v7005_v62, %v6161_v60  ;;  %v6941_v4 = vld [vmem:[%s10878_s3 + $0x1ac] sm:$0xf0]  ;;  %v6854_v60 = vld [vmem:[%s10879_s0 + $0x38] sm:$0xff] }
  0x22   :  { %442 = vmatpush.bf16.msra.mxu3 %v5582_v35  ;;  %v5778_v2 = vor.u32 %v6909_v0, %v5777_v63  ;;  %v5905_v3 = vld [vmem:[%s10878_s3 + $0x1a0] sm:$0xf]  ;;  %v6849_v6 = vld [vmem:[%s10879_s0 + $0x10] sm:$0xff] }
  0x23   :  { %296 = vmatmul.bf16.vlgmr.msra.gmra.mxu0 %v6847_v39  ;;  %v5906_v5 = vor.u32 %v6941_v4, %v5905_v3  ;;  %v6017_v7 = vld [vmem:[%s10878_s3 + $0x280] sm:$0xf]  ;;  %v6969_v8 = vld [vmem:[%s10878_s3 + $0x28c] sm:$0xf0] }
  0x24   :  { %345 = vmatmul.bf16.vlgmr.msra.gmra.mxu1 %v6847_v39  ;;  %394 = vmatmul.bf16.vlgmr.msra.gmra.mxu2 %v6847_v39  ;;  %v6145_v9 = vld [vmem:[%s10878_s3 + $0x380] sm:$0xf]  ;;  %v6018_v10 = vor.u32 %v6969_v8, %v6017_v7  ;;  %v7001_v11 = vld [vmem:[%s10878_s3 + $0x38c] sm:$0xf0] }
  0x25   :  { %1725 = vmatpush.bf16.msrb.mxu2 %v6066_v36  ;;  %443 = vmatmul.bf16.vlgmr.msra.gmra.mxu3 %v6847_v39  ;;  %v5761_v12 = vld [vmem:[%s10878_s3 + $0x80] sm:$0xf]  ;;  %v6905_v13 = vld [vmem:[%s10878_s3 + $0x8c] sm:$0xf0]  ;;  %v6146_v14 = vor.u32 %v7001_v11, %v6145_v9 }
  0x26   :  { %1774 = vmatpush.bf16.msrb.mxu3 %v6194_v40  ;;  %1627 = vmatpush.bf16.msrb.mxu0 %v5810_v43  ;;  %v5762_v15 = vor.u32 %v6905_v13, %v5761_v12  ;;  %v5889_v16 = vld [vmem:[%s10878_s3 + $0x180] sm:$0xf]  ;;  %v6937_v17 = vld [vmem:[%s10878_s3 + $0x18c] sm:$0xf0] }
  0x27   :  { %1676 = vmatpush.bf16.msrb.mxu1 %v5938_v44  ;;  %v5890_v18 = vor.u32 %v6937_v17, %v5889_v16  ;;  %v6001_v20 = vld [vmem:[%s10878_s3 + $0x260] sm:$0xf]  ;;  %v6965_v21 = vld [vmem:[%s10878_s3 + $0x26c] sm:$0xf0] }
  0x28   :  { %v6129_v22 = vld [vmem:[%s10878_s3 + $0x360] sm:$0xf]  ;;  %v6002_v23 = vor.u32 %v6965_v21, %v6001_v20  ;;  %v6997_v24 = vld [vmem:[%s10878_s3 + $0x36c] sm:$0xf0]  ;;  %v7011_v20 = vld [vmem:[%s10878_s3 + $0x3e4] sm:$0xf] }
  0x29   :  { %1726 = vmatpush.bf16.msrb.mxu2 %v6050_v48  ;;  %v5745_v25 = vld [vmem:[%s10878_s3 + $0x60] sm:$0xf]  ;;  %v6901_v26 = vld [vmem:[%s10878_s3 + $0x6c] sm:$0xf0]  ;;  %v6130_v27 = vor.u32 %v6997_v24, %v6129_v22  ;;  %v6915_v24 = vld [vmem:[%s10878_s3 + $0xe4] sm:$0xf] }
  0x2a   :  { %1775 = vmatpush.bf16.msrb.mxu3 %v6178_v52  ;;  %1628 = vmatpush.bf16.msrb.mxu0 %v5794_v53  ;;  %v5746_v28 = vor.u32 %v6901_v26, %v5745_v25  ;;  %v5873_v29 = vld [vmem:[%s10878_s3 + $0x160] sm:$0xf]  ;;  %v6933_v30 = vld [vmem:[%s10878_s3 + $0x16c] sm:$0xf0]  ;;  %v5811_v25 = vld [vmem:[%s10878_s3 + $0xf0] sm:$0xf0] }
  0x2b   :  { %1677 = vmatpush.bf16.msrb.mxu1 %v5922_v56  ;;  %v5874_v31 = vor.u32 %v6933_v30, %v5873_v29  ;;  %v6851_v32 = vld [vmem:[%s10879_s0 + $0x20] sm:$0xff]  ;;  %v6961_v34 = vld [vmem:[%s10878_s3 + $0x24c] sm:$0xf0]  ;;  %v5814_v29 = vor.u32 %v6915_v24, %v5811_v25 }
  0x2c   :  { %v5985_v33 = vld [vmem:[%s10878_s3 + $0x240] sm:$0xf]  ;;  %v6993_v37 = vld [vmem:[%s10878_s3 + $0x34c] sm:$0xf0]  ;;  %v6947_v30 = vld [vmem:[%s10878_s3 + $0x1e4] sm:$0xf] }
  0x2d   :  { %1727 = vmatpush.bf16.msrb.mxu2 %v6034_v61  ;;  %v6113_v35 = vld [vmem:[%s10878_s3 + $0x340] sm:$0xf]  ;;  %v5986_v36 = vor.u32 %v6961_v34, %v5985_v33  ;;  %v6897_v39 = vld [vmem:[%s10878_s3 + $0x4c] sm:$0xf0] }
  0x2e   :  { %1776 = vmatpush.bf16.msrb.mxu3 %v6162_v1  ;;  %1629 = vmatpush.bf16.msrb.mxu0 %v5778_v2  ;;  %v5729_v38 = vld [vmem:[%s10878_s3 + $0x40] sm:$0xf]  ;;  %v6114_v40 = vor.u32 %v6993_v37, %v6113_v35  ;;  %v6929_v43 = vld [vmem:[%s10878_s3 + $0x14c] sm:$0xf0] }
  0x2f   :  { %1678 = vmatpush.bf16.msrb.mxu1 %v5906_v5  ;;  %v5730_v41 = vor.u32 %v6897_v39, %v5729_v38  ;;  %v5857_v42 = vld [vmem:[%s10878_s3 + $0x140] sm:$0xf]  ;;  %v6957_v47 = vld [vmem:[%s10878_s3 + $0x22c] sm:$0xf0] }
  0x30   :  { %v5858_v44 = vor.u32 %v6929_v43, %v5857_v42  ;;  %v5969_v46 = vld [vmem:[%s10878_s3 + $0x220] sm:$0xf]  ;;  %v6989_v50 = vld [vmem:[%s10878_s3 + $0x32c] sm:$0xf0] }
  0x31   :  { %1728 = vmatpush.bf16.msrb.mxu2 %v6018_v10  ;;  %v6097_v48 = vld [vmem:[%s10878_s3 + $0x320] sm:$0xf]  ;;  %v5970_v49 = vor.u32 %v6957_v47, %v5969_v46  ;;  %v6893_v52 = vld [vmem:[%s10878_s3 + $0x2c] sm:$0xf0] }
  0x32   :  { %1777 = vmatpush.bf16.msrb.mxu3 %v6146_v14  ;;  %1630 = vmatpush.bf16.msrb.mxu0 %v5762_v15  ;;  %v5713_v51 = vld [vmem:[%s10878_s3 + $0x20] sm:$0xf]  ;;  %v6098_v53 = vor.u32 %v6989_v50, %v6097_v48  ;;  %v6925_v56 = vld [vmem:[%s10878_s3 + $0x12c] sm:$0xf0] }
  0x33   :  { %301 = vmatmul.bf16.gmra.mxu0 %v6848_v57  ;;  %1679 = vmatpush.bf16.msrb.mxu1 %v5890_v18  ;;  %v5714_v54 = vor.u32 %v6893_v52, %v5713_v51  ;;  %v5841_v55 = vld [vmem:[%s10878_s3 + $0x120] sm:$0xf]  ;;  %v6853_v59 = vld [vmem:[%s10879_s0 + $0x30] sm:$0xff]  ;;  %v6979_v18 = vld [vmem:[%s10878_s3 + $0x2e4] sm:$0xf] }
  0x34   :  { %350 = vmatmul.bf16.gmra.mxu1 %v6848_v57  ;;  %399 = vmatmul.bf16.gmra.mxu2 %v6848_v57  ;;  %v516_v58 = vld [vmem:[%s10880_s2] sm:$0xf]  ;;  %v6889_v3 = vld [vmem:[%s10878_s3 + $0xc] sm:$0xf0] }
  0x35   :  { %448 = vmatmul.bf16.gmra.mxu3 %v6848_v57  ;;  %1729 = vmatpush.bf16.msrb.mxu2 %v6002_v23  ;;  %v5842_v57 = vor.u32 %v6925_v56, %v5841_v55  ;;  %518 = vst [vmem:[#allocation1] ss:$9 sm:$0xff] %v516_v58  ;;  %v2443_v1 = vld [vmem:[%s10881_s4] sm:$0xf]  ;;  %v6953_v5 = vld [vmem:[%s10878_s3 + $0x20c] sm:$0xf0] }
  0x36   :  { %1778 = vmatpush.bf16.msrb.mxu3 %v6130_v27  ;;  %1631 = vmatpush.bf16.msrb.mxu0 %v5746_v28  ;;  %v5697_v2 = vld [vmem:[%s10878_s3] sm:$0xf]  ;;  %v6985_v9 = vld [vmem:[%s10878_s3 + $0x30c] sm:$0xf0]  ;;  %v6195_v23 = vld [vmem:[%s10878_s3 + $0x3f0] sm:$0xf0] }
  0x37   :  { %1680 = vmatpush.bf16.msrb.mxu1 %v5874_v31  ;;  %v5953_v4 = vld [vmem:[%s10878_s3 + $0x200] sm:$0xf]  ;;  %v6921_v12 = vld [vmem:[%s10878_s3 + $0x10c] sm:$0xf0]  ;;  %v6198_v28 = vor.u32 %v7011_v20, %v6195_v23  ;;  %v5939_v31 = vld [vmem:[%s10878_s3 + $0x1f0] sm:$0xf0] }
  0x38   :  { %v5954_v7 = vor.u32 %v6953_v5, %v5953_v4  ;;  %v6081_v8 = vld [vmem:[%s10878_s3 + $0x300] sm:$0xf] }
  0x39   :  { %1730 = vmatpush.bf16.msrb.mxu2 %v5986_v36  ;;  %v5825_v10 = vld [vmem:[%s10878_s3 + $0x100] sm:$0xf]  ;;  %v6082_v11 = vor.u32 %v6985_v9, %v6081_v8  ;;  %v6179_v8 = vld [vmem:[%s10878_s3 + $0x3d0] sm:$0xf0]  ;;  %v6911_v9 = vld [vmem:[%s10878_s3 + $0xc4] sm:$0xf] }
  0x3a   :  { %1779 = vmatpush.bf16.msrb.mxu3 %v6114_v40  ;;  %1632 = vmatpush.bf16.msrb.mxu0 %v5730_v41  ;;  %v5826_v13 = vor.u32 %v6921_v12, %v5825_v10 }
  0x3b   :  { %1681 = vmatpush.bf16.msrb.mxu1 %v5858_v44 }
  0x3c   :  { %v519_v61 = vld [vmem:[#allocation1] sm:$0xff]  ;;  %v520_v62 = vld [vmem:[#allocation1 + $0x9] sm:$0xff]  ;;  %v521_v63 = vld [vmem:[#allocation1 + $0x12] sm:$0xff] }
  0x3d   :  { %1731 = vmatpush.bf16.msrb.mxu2 %v5970_v49  ;;  %v522_v0 = vld [vmem:[#allocation1 + $0x1b] sm:$0xff]  ;;  %v523_v14 = vpack.i.b16 %v519_v61, %v519_v61  ;;  %v526_v15 = vpack.i.b16 %v520_v62, %v520_v62  ;;  %v529_v33 = vpack.i.b16 %v521_v63, %v521_v63 }
  0x3e   :  { %1780 = vmatpush.bf16.msrb.mxu3 %v6098_v53  ;;  %1633 = vmatpush.bf16.msrb.mxu0 %v5714_v54  ;;  %2445 = vst [vmem:[#allocation1] ss:$9 sm:$0xff] %v2443_v1  ;;  %v532_v34 = vpack.i.b16 %v522_v0, %v522_v0  ;;  %v6975_v0 = vld [vmem:[%s10878_s3 + $0x2c4] sm:$0xf]  ;;  %v6051_v1 = vld [vmem:[%s10878_s3 + $0x2d0] sm:$0xf0] }
  0x3f   :  { %1682 = vmatpush.bf16.msrb.mxu1 %v5842_v57  ;;  %v525_v16 = vperm.slane %v523_v14, 0  ;;  %v528_v27 = vperm.slane %v526_v15, 0  ;;  %v531_v43 = vperm.slane %v529_v33, 0  ;;  %v5795_v14 = vld [vmem:[%s10878_s3 + $0xd0] sm:$0xf0] }
  0x40   :  { %v534_v44 = vperm.slane %v532_v34, 0  ;;  %v6943_v15 = vld [vmem:[%s10878_s3 + $0x1c4] sm:$0xf] }
  0x41   :  { %1732 = vmatpush.bf16.msrb.mxu2 %v5954_v7  ;;  %v7701_v37 = vunpack.c.l.bf16 %v525_v16  ;;  %v7703_v38 = vunpack.c.l.bf16 %v528_v27  ;;  %v7707_v53 = vunpack.c.l.bf16 %v531_v43  ;;  %v7007_v7 = vld [vmem:[%s10878_s3 + $0x3c4] sm:$0xf]  ;;  %v5923_v16 = vld [vmem:[%s10878_s3 + $0x1d0] sm:$0xf0] }
  0x42   :  { %1781 = vmatpush.bf16.msrb.mxu3 %v6082_v11  ;;  %v7709_v54 = vunpack.c.l.bf16 %v534_v44  ;;  %v5926_v20 = vor.u32 %v6943_v15, %v5923_v16 }
  0x43   :  { %306 = vmatmul.bf16.gmra.mxu0 %v6849_v6  ;;  %1683 = vmatpush.bf16.msrb.mxu1 %v5826_v13  ;;  %v6182_v13 = vor.u32 %v7007_v7, %v6179_v8  ;;  %v6939_v7 = vld [vmem:[%s10878_s3 + $0x1a4] sm:$0xf]  ;;  %v5907_v8 = vld [vmem:[%s10878_s3 + $0x1b0] sm:$0xf0] }
  0x44   :  { %355 = vmatmul.bf16.gmra.mxu1 %v6849_v6  ;;  %404 = vmatmul.bf16.gmra.mxu2 %v6849_v6 }
  0x45   :  { %453 = vmatmul.bf16.gmra.mxu3 %v6849_v6  ;;  %v5698_v6 = vor.u32 %v6889_v3, %v5697_v2 }
  0x46   :  { %1970 = vmatpush.bf16.msra.mxu3 %v6198_v28 }
  0x47   :  { %1634 = vmatpush.bf16.msrb.mxu0 %v5698_v6  ;;  %v6054_v6 = vor.u32 %v6975_v0, %v6051_v1  ;;  %v6163_v0 = vld [vmem:[%s10878_s3 + $0x3b0] sm:$0xf0]  ;;  %v6907_v1 = vld [vmem:[%s10878_s3 + $0xa4] sm:$0xf] }
  0x4a   :  { %1971 = vmatpush.bf16.msra.mxu3 %v6182_v13 }
  0x4b   :  { %1823 = vmatpush.bf16.msra.mxu0 %v5814_v29 }
  0x53   :  { %311 = vmatmul.bf16.gmra.mxu0 %v6850_v19 }
  0x54   :  { %360 = vmatmul.bf16.gmra.mxu1 %v6850_v19  ;;  %409 = vmatmul.bf16.gmra.mxu2 %v6850_v19 }
  0x55   :  { %458 = vmatmul.bf16.gmra.mxu3 %v6850_v19  ;;  %v6067_v19 = vld [vmem:[%s10878_s3 + $0x2f0] sm:$0xf0] }
  0x56   :  { %v6070_v22 = vor.u32 %v6979_v18, %v6067_v19  ;;  %v5798_v19 = vor.u32 %v6911_v9, %v5795_v14  ;;  %v5910_v14 = vor.u32 %v6939_v7, %v5907_v8 }
  0x58   :  { %1921 = vmatpush.bf16.msra.mxu2 %v6070_v22  ;;  %1824 = vmatpush.bf16.msra.mxu0 %v5798_v19 }
  0x5c   :  { %1922 = vmatpush.bf16.msra.mxu2 %v6054_v6  ;;  %v5779_v6 = vld [vmem:[%s10878_s3 + $0xb0] sm:$0xf0] }
  0x5d   :  { %v5782_v13 = vor.u32 %v6907_v1, %v5779_v6  ;;  %v5891_v6 = vld [vmem:[%s10878_s3 + $0x190] sm:$0xf0] }
  0x5f   :  { %1825 = vmatpush.bf16.msra.mxu0 %v5782_v13 }
  0x63   :  { %316 = vmatmul.bf16.gmra.mxu0 %v6851_v32 }
  0x64   :  { %365 = vmatmul.bf16.gmra.mxu1 %v6851_v32  ;;  %414 = vmatmul.bf16.gmra.mxu2 %v6851_v32 }
  0x65   :  { %463 = vmatmul.bf16.gmra.mxu3 %v6851_v32  ;;  %v5942_v32 = vor.u32 %v6947_v30, %v5939_v31 }
  0x67   :  { %1872 = vmatpush.bf16.msra.mxu1 %v5942_v32 }
  0x6b   :  { %1873 = vmatpush.bf16.msra.mxu1 %v5926_v20 }
  0x6f   :  { %1874 = vmatpush.bf16.msra.mxu1 %v5910_v14 }
  0x73   :  { %321 = vmatmul.bf16.gmra.mxu0 %v6852_v45 }
  0x74   :  { %370 = vmatmul.bf16.gmra.mxu1 %v6852_v45  ;;  %419 = vmatmul.bf16.gmra.mxu2 %v6852_v45 }
  0x75   :  { %468 = vmatmul.bf16.gmra.mxu3 %v6852_v45 }
  0x83   :  { %326 = vmatmul.bf16.gmra.mxu0 %v6853_v59 }
  0x84   :  { %375 = vmatmul.bf16.gmra.mxu1 %v6853_v59  ;;  %424 = vmatmul.bf16.gmra.mxu2 %v6853_v59 }
  0x85   :  { %473 = vmatmul.bf16.gmra.mxu3 %v6853_v59 }
  0x93   :  { %331 = vmatmul.bf16.gmra.mxu0 %v6854_v60 }
  0x94   :  { %380 = vmatmul.bf16.gmra.mxu1 %v6854_v60  ;;  %429 = vmatmul.bf16.gmra.mxu2 %v6854_v60 }
  0x95   :  { %478 = vmatmul.bf16.gmra.mxu3 %v6854_v60 }
  0xa0   :  { %v297_v17 = vpop.f32.mrf.mxu0 }
  0xa1   :  { %v346_v21 = vpop.f32.mrf.mxu1 }
  0xa2   :  { %v484_v26 = vpack.c.bf16 %v346_v21, %v297_v17 }
  0xa4   :  { %v535_v35 = vunpack.c.l.bf16 %v484_v26  ;;  %v536_v36 = vunpack.c.h.bf16 %v484_v26 }
  0xa6   :  { %v603_v46 = vadd.f32 %v7701_v37, %v535_v35  ;;  %v604_v47 = vadd.f32 %v7703_v38, %v536_v36 }
  0xa7   :  { %v395_v39 = vpop.f32.mrf.mxu2 }
  0xa8   :  { %v444_v40 = vpop.f32.mrf.mxu3  ;;  %v299_v41 = vpop.f32.mrf.mxu0  ;;  %v763_v55 = vmax.f32 %v603_v46, 0.0  ;;  %v764_v56 = vmax.f32 %v604_v47, 0.0 }
  0xa9   :  { %v485_v42 = vpack.c.bf16 %v444_v40, %v395_v39  ;;  %v348_v45 = vpop.f32.mrf.mxu1 }
  0xaa   :  { %v486_v48 = vpack.c.bf16 %v348_v45, %v299_v41 }
  0xab   :  { %v537_v51 = vunpack.c.l.bf16 %v485_v42  ;;  %v538_v52 = vunpack.c.h.bf16 %v485_v42 }
  0xac   :  { %v539_v49 = vunpack.c.l.bf16 %v486_v48  ;;  %v540_v50 = vunpack.c.h.bf16 %v486_v48 }
  0xad   :  { %v605_v2 = vadd.f32 %v7707_v53, %v537_v51  ;;  %v606_v3 = vadd.f32 %v7709_v54, %v538_v52 }
  0xae   :  { %v607_v57 = vadd.f32 %v7701_v37, %v539_v49  ;;  %v608_v58 = vadd.f32 %v7703_v38, %v540_v50 }
  0xaf   :  { %v397_v59 = vpop.f32.mrf.mxu2  ;;  %v765_v25 = vmax.f32 %v605_v2, 0.0  ;;  %v766_v26 = vmax.f32 %v606_v3, 0.0 }
  0xb0   :  { %v767_v60 = vmax.f32 %v607_v57, 0.0  ;;  %v768_v61 = vmax.f32 %v608_v58, 0.0  ;;  %v446_v62 = vpop.f32.mrf.mxu3  ;;  %v302_v63 = vpop.f32.mrf.mxu0  ;;  %v6035_v57 = vld [vmem:[%s10878_s3 + $0x2b0] sm:$0xf0] }
  0xb1   :  { %v487_v4 = vpack.c.bf16 %v446_v62, %v397_v59  ;;  %v351_v5 = vpop.f32.mrf.mxu1 }
  0xb2   :  { %v488_v10 = vpack.c.bf16 %v351_v5, %v302_v63  ;;  %v7730_v11 = vpack.c.bf16 %v767_v60, %v763_v55  ;;  %v7732_v12 = vpack.c.bf16 %v768_v61, %v764_v56  ;;  %v6971_v56 = vld [vmem:[%s10878_s3 + $0x2a4] sm:$0xf] }
  0xb3   :  { %v541_v17 = vunpack.c.l.bf16 %v487_v4  ;;  %v542_v18 = vunpack.c.h.bf16 %v487_v4  ;;  %v6038_v62 = vor.u32 %v6971_v56, %v6035_v57  ;;  %v7003_v63 = vld [vmem:[%s10878_s3 + $0x3a4] sm:$0xf] }
  0xb4   :  { %10928 = vst [vmem:[#allocation2_spill] sm:$0xff] %v7732_v12  ;;  %1635 = vmatmul.bf16.vlgmr.msrb.gmra.mxu0 %v7730_v11  ;;  %1684 = vmatmul.bf16.vlgmr.msrb.gmra.mxu1 %v7732_v12  ;;  %v543_v23 = vunpack.c.l.bf16 %v488_v10  ;;  %v544_v24 = vunpack.c.h.bf16 %v488_v10  ;;  %v6166_v5 = vor.u32 %v7003_v63, %v6163_v0 }
  0xb5   :  { %v609_v21 = vadd.f32 %v7707_v53, %v541_v17  ;;  %v610_v22 = vadd.f32 %v7709_v54, %v542_v18  ;;  %1923 = vmatpush.bf16.msra.mxu2 %v6038_v62 }
  0xb6   :  { %v611_v36 = vadd.f32 %v7701_v37, %v543_v23  ;;  %v612_v39 = vadd.f32 %v7703_v38, %v544_v24  ;;  %1972 = vmatpush.bf16.msra.mxu3 %v6166_v5  ;;  %v6935_v5 = vld [vmem:[%s10878_s3 + $0x184] sm:$0xf] }
  0xb7   :  { %v769_v27 = vmax.f32 %v609_v21, 0.0  ;;  %v770_v28 = vmax.f32 %v610_v22, 0.0  ;;  %v400_v29 = vpop.f32.mrf.mxu2 }
  0xb8   :  { %v449_v30 = vpop.f32.mrf.mxu3  ;;  %v304_v31 = vpop.f32.mrf.mxu0  ;;  %v771_v45 = vmax.f32 %v611_v36, 0.0  ;;  %v772_v46 = vmax.f32 %v612_v39, 0.0 }
  0xb9   :  { %v489_v32 = vpack.c.bf16 %v449_v30, %v400_v29  ;;  %v353_v33 = vpop.f32.mrf.mxu1  ;;  %v7747_v34 = vpack.c.bf16 %v769_v27, %v765_v25  ;;  %v7749_v35 = vpack.c.bf16 %v770_v28, %v766_v26 }
  0xba   :  { %v490_v40 = vpack.c.bf16 %v353_v33, %v304_v31 }
  0xbb   :  { %10929 = vst [vmem:[#allocation3_spill] sm:$0xff] %v7747_v34  ;;  %1733 = vmatmul.bf16.vlgmr.msrb.gmra.mxu2 %v7747_v34  ;;  %1782 = vmatmul.bf16.vlgmr.msrb.gmra.mxu3 %v7749_v35  ;;  %v545_v43 = vunpack.c.l.bf16 %v489_v32  ;;  %v546_v44 = vunpack.c.h.bf16 %v489_v32 }
  0xbc   :  { %10930 = vst [vmem:[#allocation4_spill] sm:$0xff] %v7749_v35  ;;  %v547_v41 = vunpack.c.l.bf16 %v490_v40  ;;  %v548_v42 = vunpack.c.h.bf16 %v490_v40 }
  0xbd   :  { %v613_v58 = vadd.f32 %v7707_v53, %v545_v43  ;;  %v614_v59 = vadd.f32 %v7709_v54, %v546_v44 }
  0xbe   :  { %v615_v47 = vadd.f32 %v7701_v37, %v547_v41  ;;  %v616_v48 = vadd.f32 %v7703_v38, %v548_v42 }
  0xbf   :  { %v402_v49 = vpop.f32.mrf.mxu2  ;;  %v773_v19 = vmax.f32 %v613_v58, 0.0  ;;  %v774_v20 = vmax.f32 %v614_v59, 0.0  ;;  %v6999_v59 = vld [vmem:[%s10878_s3 + $0x384] sm:$0xf] }
  0xc0   :  { %v775_v50 = vmax.f32 %v615_v47, 0.0  ;;  %v776_v51 = vmax.f32 %v616_v48, 0.0  ;;  %v451_v52 = vpop.f32.mrf.mxu3  ;;  %v307_v55 = vpop.f32.mrf.mxu0 }
  0xc1   :  { %v491_v60 = vpack.c.bf16 %v451_v52, %v402_v49  ;;  %v356_v61 = vpop.f32.mrf.mxu1 }
  0xc2   :  { %v492_v2 = vpack.c.bf16 %v356_v61, %v307_v55  ;;  %v7774_v3 = vpack.c.bf16 %v775_v50, %v771_v45  ;;  %v7776_v4 = vpack.c.bf16 %v776_v51, %v772_v46  ;;  %v6967_v50 = vld [vmem:[%s10878_s3 + $0x284] sm:$0xf]  ;;  %v6019_v51 = vld [vmem:[%s10878_s3 + $0x290] sm:$0xf0] }
  0xc3   :  { %v549_v9 = vunpack.c.l.bf16 %v491_v60  ;;  %v550_v10 = vunpack.c.h.bf16 %v491_v60  ;;  %v6022_v58 = vor.u32 %v6967_v50, %v6019_v51  ;;  %v6147_v60 = vld [vmem:[%s10878_s3 + $0x390] sm:$0xf0]  ;;  %v6903_v61 = vld [vmem:[%s10878_s3 + $0x84] sm:$0xf] }
  0xc4   :  { %1640 = vmatmul.bf16.gmra.mxu0 %v7774_v3  ;;  %1689 = vmatmul.bf16.gmra.mxu1 %v7776_v4  ;;  %v551_v17 = vunpack.c.l.bf16 %v492_v2  ;;  %v552_v18 = vunpack.c.h.bf16 %v492_v2  ;;  %v6150_v1 = vor.u32 %v6999_v59, %v6147_v60  ;;  %v5763_v2 = vld [vmem:[%s10878_s3 + $0x90] sm:$0xf0]  ;;  %v6963_v50 = vld [vmem:[%s10878_s3 + $0x264] sm:$0xf] }
  0xc5   :  { %v617_v15 = vadd.f32 %v7707_v53, %v549_v9  ;;  %v618_v16 = vadd.f32 %v7709_v54, %v550_v10  ;;  %1924 = vmatpush.bf16.msra.mxu2 %v6022_v58  ;;  %v5766_v9 = vor.u32 %v6903_v61, %v5763_v2  ;;  %v5894_v10 = vor.u32 %v6935_v5, %v5891_v6  ;;  %v6003_v51 = vld [vmem:[%s10878_s3 + $0x270] sm:$0xf0]  ;;  %v6995_v59 = vld [vmem:[%s10878_s3 + $0x364] sm:$0xf] }
  0xc6   :  { %v619_v30 = vadd.f32 %v7701_v37, %v551_v17  ;;  %v620_v31 = vadd.f32 %v7703_v38, %v552_v18  ;;  %1973 = vmatpush.bf16.msra.mxu3 %v6150_v1  ;;  %v6006_v58 = vor.u32 %v6963_v50, %v6003_v51  ;;  %v6131_v60 = vld [vmem:[%s10878_s3 + $0x370] sm:$0xf0]  ;;  %v6899_v61 = vld [vmem:[%s10878_s3 + $0x64] sm:$0xf] }
  0xc7   :  { %v777_v21 = vmax.f32 %v617_v15, 0.0  ;;  %v778_v22 = vmax.f32 %v618_v16, 0.0  ;;  %v405_v23 = vpop.f32.mrf.mxu2  ;;  %1826 = vmatpush.bf16.msra.mxu0 %v5766_v9  ;;  %1875 = vmatpush.bf16.msra.mxu1 %v5894_v10  ;;  %v6134_v5 = vor.u32 %v6995_v59, %v6131_v60  ;;  %v5747_v6 = vld [vmem:[%s10878_s3 + $0x70] sm:$0xf0] }
  0xc8   :  { %v454_v24 = vpop.f32.mrf.mxu3  ;;  %v309_v25 = vpop.f32.mrf.mxu0  ;;  %v779_v41 = vmax.f32 %v619_v30, 0.0  ;;  %v780_v42 = vmax.f32 %v620_v31, 0.0 }
  0xc9   :  { %v493_v26 = vpack.c.bf16 %v454_v24, %v405_v23  ;;  %v358_v27 = vpop.f32.mrf.mxu1  ;;  %v7791_v28 = vpack.c.bf16 %v777_v21, %v773_v19  ;;  %v7793_v29 = vpack.c.bf16 %v778_v22, %v774_v20  ;;  %1925 = vmatpush.bf16.msra.mxu2 %v6006_v58 }
  0xca   :  { %v494_v32 = vpack.c.bf16 %v358_v27, %v309_v25  ;;  %1974 = vmatpush.bf16.msra.mxu3 %v6134_v5  ;;  %v6991_v5 = vld [vmem:[%s10878_s3 + $0x344] sm:$0xf] }
  0xcb   :  { %10931 = vst [vmem:[#allocation5_spill] sm:$0xff] %v7791_v28  ;;  %1738 = vmatmul.bf16.gmra.mxu2 %v7791_v28  ;;  %1787 = vmatmul.bf16.gmra.mxu3 %v7793_v29  ;;  %v553_v39 = vunpack.c.l.bf16 %v493_v26  ;;  %v554_v40 = vunpack.c.h.bf16 %v493_v26 }
  0xcc   :  { %10932 = vst [vmem:[#allocation6_spill] sm:$0xff] %v7793_v29  ;;  %v555_v33 = vunpack.c.l.bf16 %v494_v32  ;;  %v556_v36 = vunpack.c.h.bf16 %v494_v32 }
  0xcd   :  { %v621_v52 = vadd.f32 %v7707_v53, %v553_v39  ;;  %v622_v55 = vadd.f32 %v7709_v54, %v554_v40 }
  0xce   :  { %v623_v43 = vadd.f32 %v7701_v37, %v555_v33  ;;  %v624_v44 = vadd.f32 %v7703_v38, %v556_v36 }
  0xcf   :  { %v407_v45 = vpop.f32.mrf.mxu2  ;;  %v781_v17 = vmax.f32 %v621_v52, 0.0  ;;  %v782_v18 = vmax.f32 %v622_v55, 0.0 }
  0xd0   :  { %v783_v46 = vmax.f32 %v623_v43, 0.0  ;;  %v784_v47 = vmax.f32 %v624_v44, 0.0  ;;  %v456_v48 = vpop.f32.mrf.mxu3  ;;  %v312_v49 = vpop.f32.mrf.mxu0 }
  0xd1   :  { %v495_v56 = vpack.c.bf16 %v456_v48, %v407_v45  ;;  %v361_v57 = vpop.f32.mrf.mxu1 }
  0xd2   :  { %v496_v62 = vpack.c.bf16 %v361_v57, %v312_v49  ;;  %v7818_v63 = vpack.c.bf16 %v783_v46, %v779_v41  ;;  %v7820_v0 = vpack.c.bf16 %v784_v47, %v780_v42 }
  0xd3   :  { %v557_v7 = vunpack.c.l.bf16 %v495_v56  ;;  %v558_v8 = vunpack.c.h.bf16 %v495_v56 }
  0xd4   :  { %1645 = vmatmul.bf16.gmra.mxu0 %v7818_v63  ;;  %1694 = vmatmul.bf16.gmra.mxu1 %v7820_v0  ;;  %v559_v15 = vunpack.c.l.bf16 %v496_v62  ;;  %v560_v16 = vunpack.c.h.bf16 %v496_v62 }
  0xd5   :  { %v625_v13 = vadd.f32 %v7707_v53, %v557_v7  ;;  %v626_v14 = vadd.f32 %v7709_v54, %v558_v8  ;;  %v6931_v7 = vld [vmem:[%s10878_s3 + $0x164] sm:$0xf]  ;;  %v5875_v8 = vld [vmem:[%s10878_s3 + $0x170] sm:$0xf0] }
  0xd6   :  { %v627_v30 = vadd.f32 %v7701_v37, %v559_v15  ;;  %v628_v31 = vadd.f32 %v7703_v38, %v560_v16 }
  0xd7   :  { %v785_v19 = vmax.f32 %v625_v13, 0.0  ;;  %v786_v20 = vmax.f32 %v626_v14, 0.0  ;;  %v410_v21 = vpop.f32.mrf.mxu2  ;;  %v5750_v13 = vor.u32 %v6899_v61, %v5747_v6  ;;  %v5878_v14 = vor.u32 %v6931_v7, %v5875_v8  ;;  %v6115_v6 = vld [vmem:[%s10878_s3 + $0x350] sm:$0xf0]  ;;  %v6895_v7 = vld [vmem:[%s10878_s3 + $0x44] sm:$0xf] }
  0xd8   :  { %v459_v22 = vpop.f32.mrf.mxu3  ;;  %v314_v23 = vpop.f32.mrf.mxu0  ;;  %v787_v41 = vmax.f32 %v627_v30, 0.0  ;;  %v788_v42 = vmax.f32 %v628_v31, 0.0 }
  0xd9   :  { %v497_v24 = vpack.c.bf16 %v459_v22, %v410_v21  ;;  %v363_v25 = vpop.f32.mrf.mxu1  ;;  %v7835_v26 = vpack.c.bf16 %v785_v19, %v781_v17  ;;  %v7837_v27 = vpack.c.bf16 %v786_v20, %v782_v18  ;;  %1827 = vmatpush.bf16.msra.mxu0 %v5750_v13  ;;  %1876 = vmatpush.bf16.msra.mxu1 %v5878_v14  ;;  %v5731_v14 = vld [vmem:[%s10878_s3 + $0x50] sm:$0xf0] }
  0xda   :  { %v498_v32 = vpack.c.bf16 %v363_v25, %v314_v23  ;;  %v6118_v13 = vor.u32 %v6991_v5, %v6115_v6  ;;  %v6955_v6 = vld [vmem:[%s10878_s3 + $0x224] sm:$0xf] }
  0xdb   :  { %1743 = vmatmul.bf16.gmra.mxu2 %v7835_v26  ;;  %1792 = vmatmul.bf16.gmra.mxu3 %v7837_v27  ;;  %v561_v39 = vunpack.c.l.bf16 %v497_v24  ;;  %v562_v40 = vunpack.c.h.bf16 %v497_v24 }
  0xdc   :  { %v563_v33 = vunpack.c.l.bf16 %v498_v32  ;;  %v564_v36 = vunpack.c.h.bf16 %v498_v32  ;;  %1975 = vmatpush.bf16.msra.mxu3 %v6118_v13 }
  0xdd   :  { %v629_v52 = vadd.f32 %v7707_v53, %v561_v39  ;;  %v630_v55 = vadd.f32 %v7709_v54, %v562_v40 }
  0xde   :  { %v631_v43 = vadd.f32 %v7701_v37, %v563_v33  ;;  %v632_v44 = vadd.f32 %v7703_v38, %v564_v36 }
  0xdf   :  { %v412_v45 = vpop.f32.mrf.mxu2  ;;  %v789_v19 = vmax.f32 %v629_v52, 0.0  ;;  %v790_v20 = vmax.f32 %v630_v55, 0.0 }
  0xe0   :  { %v791_v46 = vmax.f32 %v631_v43, 0.0  ;;  %v792_v47 = vmax.f32 %v632_v44, 0.0  ;;  %v461_v48 = vpop.f32.mrf.mxu3  ;;  %v317_v49 = vpop.f32.mrf.mxu0 }
  0xe1   :  { %v499_v56 = vpack.c.bf16 %v461_v48, %v412_v45  ;;  %v366_v57 = vpop.f32.mrf.mxu1 }
  0xe2   :  { %v500_v62 = vpack.c.bf16 %v366_v57, %v317_v49  ;;  %v7862_v1 = vpack.c.bf16 %v791_v46, %v787_v41  ;;  %v7864_v2 = vpack.c.bf16 %v792_v47, %v788_v42  ;;  %v5987_v57 = vld [vmem:[%s10878_s3 + $0x250] sm:$0xf0] }
  0xe3   :  { %v565_v9 = vunpack.c.l.bf16 %v499_v56  ;;  %v566_v10 = vunpack.c.h.bf16 %v499_v56  ;;  %v6959_v56 = vld [vmem:[%s10878_s3 + $0x244] sm:$0xf] }
  0xe4   :  { %1650 = vmatmul.bf16.gmra.mxu0 %v7862_v1  ;;  %1699 = vmatmul.bf16.gmra.mxu1 %v7864_v2  ;;  %v567_v17 = vunpack.c.l.bf16 %v500_v62  ;;  %v568_v18 = vunpack.c.h.bf16 %v500_v62  ;;  %v5990_v62 = vor.u32 %v6959_v56, %v5987_v57 }
  0xe5   :  { %v633_v15 = vadd.f32 %v7707_v53, %v565_v9  ;;  %v634_v16 = vadd.f32 %v7709_v54, %v566_v10 }
  0xe6   :  { %v635_v36 = vadd.f32 %v7701_v37, %v567_v17  ;;  %v636_v39 = vadd.f32 %v7703_v38, %v568_v18  ;;  %1926 = vmatpush.bf16.msra.mxu2 %v5990_v62 }
  0xe7   :  { %v793_v21 = vmax.f32 %v633_v15, 0.0  ;;  %v794_v22 = vmax.f32 %v634_v16, 0.0  ;;  %v415_v23 = vpop.f32.mrf.mxu2  ;;  %v6927_v15 = vld [vmem:[%s10878_s3 + $0x144] sm:$0xf]  ;;  %v5859_v16 = vld [vmem:[%s10878_s3 + $0x150] sm:$0xf0] }
  0xe8   :  { %v464_v24 = vpop.f32.mrf.mxu3  ;;  %v319_v25 = vpop.f32.mrf.mxu0  ;;  %v795_v45 = vmax.f32 %v635_v36, 0.0  ;;  %v796_v46 = vmax.f32 %v636_v39, 0.0 }
  0xe9   :  { %v501_v30 = vpack.c.bf16 %v464_v24, %v415_v23  ;;  %v368_v31 = vpop.f32.mrf.mxu1  ;;  %v7879_v32 = vpack.c.bf16 %v793_v21, %v789_v19  ;;  %v7881_v33 = vpack.c.bf16 %v794_v22, %v790_v20  ;;  %v5734_v19 = vor.u32 %v6895_v7, %v5731_v14  ;;  %v5971_v7 = vld [vmem:[%s10878_s3 + $0x230] sm:$0xf0] }
  0xea   :  { %v502_v40 = vpack.c.bf16 %v368_v31, %v319_v25  ;;  %v5862_v20 = vor.u32 %v6927_v15, %v5859_v16  ;;  %v5974_v16 = vor.u32 %v6955_v6, %v5971_v7  ;;  %v5955_v6 = vld [vmem:[%s10878_s3 + $0x210] sm:$0xf0]  ;;  %v6983_v7 = vld [vmem:[%s10878_s3 + $0x304] sm:$0xf] }
  0xeb   :  { %1748 = vmatmul.bf16.gmra.mxu2 %v7879_v32  ;;  %1797 = vmatmul.bf16.gmra.mxu3 %v7881_v33  ;;  %v569_v43 = vunpack.c.l.bf16 %v501_v30  ;;  %v570_v44 = vunpack.c.h.bf16 %v501_v30 }
  0xec   :  { %v571_v41 = vunpack.c.l.bf16 %v502_v40  ;;  %v572_v42 = vunpack.c.h.bf16 %v502_v40  ;;  %1828 = vmatpush.bf16.msra.mxu0 %v5734_v19  ;;  %1877 = vmatpush.bf16.msra.mxu1 %v5862_v20  ;;  %v6891_v19 = vld [vmem:[%s10878_s3 + $0x24] sm:$0xf] }
  0xed   :  { %v637_v58 = vadd.f32 %v7707_v53, %v569_v43  ;;  %v638_v59 = vadd.f32 %v7709_v54, %v570_v44  ;;  %1927 = vmatpush.bf16.msra.mxu2 %v5974_v16  ;;  %v6887_v16 = vld [vmem:[%s10878_s3 + $0x4] sm:$0xf] }
  0xee   :  { %v639_v47 = vadd.f32 %v7701_v37, %v571_v41  ;;  %v640_v48 = vadd.f32 %v7703_v38, %v572_v42 }
  0xef   :  { %v417_v49 = vpop.f32.mrf.mxu2  ;;  %v797_v25 = vmax.f32 %v637_v58, 0.0  ;;  %v798_v30 = vmax.f32 %v638_v59, 0.0 }
  0xf0   :  { %v799_v50 = vmax.f32 %v639_v47, 0.0  ;;  %v800_v51 = vmax.f32 %v640_v48, 0.0  ;;  %v466_v52 = vpop.f32.mrf.mxu3  ;;  %v322_v55 = vpop.f32.mrf.mxu0 }
  0xf1   :  { %v503_v60 = vpack.c.bf16 %v466_v52, %v417_v49  ;;  %v371_v61 = vpop.f32.mrf.mxu1 }
  0xf2   :  { %v504_v8 = vpack.c.bf16 %v371_v61, %v322_v55  ;;  %v7906_v9 = vpack.c.bf16 %v799_v50, %v795_v45  ;;  %v7908_v10 = vpack.c.bf16 %v800_v51, %v796_v46 }
  0xf3   :  { %v573_v17 = vunpack.c.l.bf16 %v503_v60  ;;  %v574_v18 = vunpack.c.h.bf16 %v503_v60 }
  0xf4   :  { %1655 = vmatmul.bf16.gmra.mxu0 %v7906_v9  ;;  %1704 = vmatmul.bf16.gmra.mxu1 %v7908_v10  ;;  %v575_v23 = vunpack.c.l.bf16 %v504_v8  ;;  %v576_v24 = vunpack.c.h.bf16 %v504_v8 }
  0xf5   :  { %v641_v21 = vadd.f32 %v7707_v53, %v573_v17  ;;  %v642_v22 = vadd.f32 %v7709_v54, %v574_v18  ;;  %v6987_v17 = vld [vmem:[%s10878_s3 + $0x324] sm:$0xf]  ;;  %v6099_v18 = vld [vmem:[%s10878_s3 + $0x330] sm:$0xf0] }
  0xf6   :  { %v643_v46 = vadd.f32 %v7701_v37, %v575_v23  ;;  %v644_v47 = vadd.f32 %v7703_v38, %v576_v24  ;;  %v6102_v23 = vor.u32 %v6987_v17, %v6099_v18  ;;  %v5715_v24 = vld [vmem:[%s10878_s3 + $0x30] sm:$0xf0] }
  0xf7   :  { %v801_v31 = vmax.f32 %v641_v21, 0.0  ;;  %v802_v36 = vmax.f32 %v642_v22, 0.0  ;;  %v420_v39 = vpop.f32.mrf.mxu2  ;;  %v5699_v17 = vld [vmem:[%s10878_s3 + $0x10] sm:$0xf0] }
  0xf8   :  { %v469_v40 = vpop.f32.mrf.mxu3  ;;  %v324_v41 = vpop.f32.mrf.mxu0  ;;  %v803_v55 = vmax.f32 %v643_v46, 0.0  ;;  %v804_v56 = vmax.f32 %v644_v47, 0.0  ;;  %1976 = vmatpush.bf16.msra.mxu3 %v6102_v23  ;;  %v6919_v23 = vld [vmem:[%s10878_s3 + $0x104] sm:$0xf] }
  0xf9   :  { %v505_v42 = vpack.c.bf16 %v469_v40, %v420_v39  ;;  %v373_v43 = vpop.f32.mrf.mxu1  ;;  %v7923_v44 = vpack.c.bf16 %v801_v31, %v797_v25  ;;  %v7925_v45 = vpack.c.bf16 %v802_v36, %v798_v30  ;;  %v6923_v25 = vld [vmem:[%s10878_s3 + $0x124] sm:$0xf]  ;;  %v5843_v30 = vld [vmem:[%s10878_s3 + $0x130] sm:$0xf0]  ;;  %v5718_v39 = vor.u32 %v6891_v19, %v5715_v24 }
  0xfa   :  { %v506_v48 = vpack.c.bf16 %v373_v43, %v324_v41  ;;  %v5846_v40 = vor.u32 %v6923_v25, %v5843_v30  ;;  %v5827_v24 = vld [vmem:[%s10878_s3 + $0x110] sm:$0xf0] }
  0xfb   :  { %1753 = vmatmul.bf16.gmra.mxu2 %v7923_v44  ;;  %1802 = vmatmul.bf16.gmra.mxu3 %v7925_v45  ;;  %v577_v51 = vunpack.c.l.bf16 %v505_v42  ;;  %v578_v52 = vunpack.c.h.bf16 %v505_v42 }
  0xfc   :  { %v579_v49 = vunpack.c.l.bf16 %v506_v48  ;;  %v580_v50 = vunpack.c.h.bf16 %v506_v48  ;;  %1829 = vmatpush.bf16.msra.mxu0 %v5718_v39  ;;  %1878 = vmatpush.bf16.msra.mxu1 %v5846_v40 }
  0xfd   :  { %v645_v8 = vadd.f32 %v7707_v53, %v577_v51  ;;  %v646_v13 = vadd.f32 %v7709_v54, %v578_v52 }
  0xfe   :  { %v647_v57 = vadd.f32 %v7701_v37, %v579_v49  ;;  %v648_v58 = vadd.f32 %v7703_v38, %v580_v50 }
  0xff   :  { %v422_v59 = vpop.f32.mrf.mxu2  ;;  %v805_v47 = vmax.f32 %v645_v8, 0.0  ;;  %v806_v48 = vmax.f32 %v646_v13, 0.0 }
 0x100   :  { %v807_v60 = vmax.f32 %v647_v57, 0.0  ;;  %v808_v61 = vmax.f32 %v648_v58, 0.0  ;;  %v471_v62 = vpop.f32.mrf.mxu3  ;;  %v327_v5 = vpop.f32.mrf.mxu0 }
 0x101   :  { %v507_v14 = vpack.c.bf16 %v471_v62, %v422_v59  ;;  %v376_v15 = vpop.f32.mrf.mxu1 }
 0x102   :  { %v508_v20 = vpack.c.bf16 %v376_v15, %v327_v5  ;;  %v7950_v21 = vpack.c.bf16 %v807_v60, %v803_v55  ;;  %v7952_v22 = vpack.c.bf16 %v808_v61, %v804_v56  ;;  %v6951_v5 = vld [vmem:[%s10878_s3 + $0x204] sm:$0xf]  ;;  %v6083_v15 = vld [vmem:[%s10878_s3 + $0x310] sm:$0xf0] }
 0x103   :  { %v581_v31 = vunpack.c.l.bf16 %v507_v14  ;;  %v582_v36 = vunpack.c.h.bf16 %v507_v14  ;;  %v5958_v14 = vor.u32 %v6951_v5, %v5955_v6  ;;  %v6086_v19 = vor.u32 %v6983_v7, %v6083_v15 }
 0x104   :  { %1660 = vmatmul.bf16.gmra.mxu0 %v7950_v21  ;;  %1709 = vmatmul.bf16.gmra.mxu1 %v7952_v22  ;;  %v583_v43 = vunpack.c.l.bf16 %v508_v20  ;;  %v584_v46 = vunpack.c.h.bf16 %v508_v20  ;;  %v5702_v20 = vor.u32 %v6887_v16, %v5699_v17 }
 0x105   :  { %v649_v41 = vadd.f32 %v7707_v53, %v581_v31  ;;  %v650_v42 = vadd.f32 %v7709_v54, %v582_v36  ;;  %1928 = vmatpush.bf16.msra.mxu2 %v5958_v14  ;;  %v5830_v36 = vor.u32 %v6919_v23, %v5827_v24  ;;  %1977 = vmatpush.bf16.msra.mxu3 %v6086_v19 }
 0x106   :  { %v651_v56 = vadd.f32 %v7701_v37, %v583_v43  ;;  %v652_v60 = vadd.f32 %v7703_v38, %v584_v46  ;;  %1830 = vmatpush.bf16.msra.mxu0 %v5702_v20 }
 0x107   :  { %v809_v49 = vmax.f32 %v649_v41, 0.0  ;;  %v810_v50 = vmax.f32 %v650_v42, 0.0  ;;  %v425_v51 = vpop.f32.mrf.mxu2  ;;  %1879 = vmatpush.bf16.msra.mxu1 %v5830_v36  ;;  %v6982_v36 = vld [vmem:[%s10878_s3 + $0x2f4] sm:$0xf0] }
 0x108   :  { %v474_v52 = vpop.f32.mrf.mxu3  ;;  %v329_v55 = vpop.f32.mrf.mxu0  ;;  %v811_v18 = vmax.f32 %v651_v56, 0.0  ;;  %v812_v25 = vmax.f32 %v652_v60, 0.0 }
 0x109   :  { %v378_v57 = vpop.f32.mrf.mxu1  ;;  %v7968_v58 = vpack.c.bf16 %v809_v49, %v805_v47  ;;  %v7970_v59 = vpack.c.bf16 %v810_v50, %v806_v48  ;;  %v509_v62 = vpack.c.bf16 %v474_v52, %v425_v51 }
 0x10a   :  { %v510_v61 = vpack.c.bf16 %v378_v57, %v329_v55 }
 0x10b   :  { %1758 = vmatmul.bf16.gmra.mxu2 %v7968_v58  ;;  %1807 = vmatmul.bf16.gmra.mxu3 %v7970_v59  ;;  %v585_v39 = vunpack.c.l.bf16 %v509_v62  ;;  %v586_v40 = vunpack.c.h.bf16 %v509_v62 }
 0x10c   :  { %v587_v8 = vunpack.c.l.bf16 %v510_v61  ;;  %v588_v13 = vunpack.c.h.bf16 %v510_v61 }
 0x10d   :  { %v653_v55 = vadd.f32 %v7707_v53, %v585_v39  ;;  %v654_v56 = vadd.f32 %v7709_v54, %v586_v40  ;;  %v6201_v39 = vld [vmem:[%s10878_s3 + $0x3e8] sm:$0xf] }
 0x10e   :  { %v655_v30 = vadd.f32 %v7701_v37, %v587_v8  ;;  %v656_v31 = vadd.f32 %v7703_v38, %v588_v13 }
 0x10f   :  { %v427_v41 = vpop.f32.mrf.mxu2  ;;  %v813_v7 = vmax.f32 %v653_v55, 0.0  ;;  %v814_v8 = vmax.f32 %v654_v56, 0.0 }
 0x110   :  { %v815_v42 = vmax.f32 %v655_v30, 0.0  ;;  %v816_v43 = vmax.f32 %v656_v31, 0.0  ;;  %v476_v46 = vpop.f32.mrf.mxu3  ;;  %v332_v47 = vpop.f32.mrf.mxu0  ;;  %v6073_v31 = vld [vmem:[%s10878_s3 + $0x2e8] sm:$0xf] }
 0x111   :  { %v511_v48 = vpack.c.bf16 %v476_v46, %v427_v41  ;;  %v381_v49 = vpop.f32.mrf.mxu1 }
 0x112   :  { %v512_v50 = vpack.c.bf16 %v381_v49, %v332_v47  ;;  %v8001_v51 = vpack.c.bf16 %v815_v42, %v811_v18  ;;  %v8003_v52 = vpack.c.bf16 %v816_v43, %v812_v25  ;;  %v6074_v42 = vor.u32 %v6982_v36, %v6073_v31  ;;  %v7014_v43 = vld [vmem:[%s10878_s3 + $0x3f4] sm:$0xf0] }
 0x113   :  { %v589_v57 = vunpack.c.l.bf16 %v511_v48  ;;  %v590_v60 = vunpack.c.h.bf16 %v511_v48  ;;  %v6202_v47 = vor.u32 %v7014_v43, %v6201_v39 }
 0x114   :  { %1665 = vmatmul.bf16.gmra.mxu0 %v8001_v51  ;;  %1714 = vmatmul.bf16.gmra.mxu1 %v8003_v52  ;;  %v591_v5 = vunpack.c.l.bf16 %v512_v50  ;;  %v592_v6 = vunpack.c.h.bf16 %v512_v50 }
 0x115   :  { %v657_v61 = vadd.f32 %v7707_v53, %v589_v57  ;;  %v658_v62 = vadd.f32 %v7709_v54, %v590_v60  ;;  %2117 = vmatpush.bf16.msrb.mxu2 %v6074_v42  ;;  %2166 = vmatpush.bf16.msrb.mxu3 %v6202_v47  ;;  %v6185_v42 = vld [vmem:[%s10878_s3 + $0x3c8] sm:$0xf] }
 0x116   :  { %v659_v18 = vadd.f32 %v7701_v37, %v591_v5  ;;  %v660_v24 = vadd.f32 %v7703_v38, %v592_v6  ;;  %v5817_v6 = vld [vmem:[%s10878_s3 + $0xe8] sm:$0xf] }
 0x117   :  { %v817_v13 = vmax.f32 %v657_v61, 0.0  ;;  %v818_v14 = vmax.f32 %v658_v62, 0.0  ;;  %v430_v15 = vpop.f32.mrf.mxu2 }
 0x118   :  { %v479_v16 = vpop.f32.mrf.mxu3  ;;  %v334_v17 = vpop.f32.mrf.mxu0  ;;  %v819_v46 = vmax.f32 %v659_v18, 0.0  ;;  %v820_v48 = vmax.f32 %v660_v24, 0.0 }
 0x119   :  { %v383_v19 = vpop.f32.mrf.mxu1  ;;  %v8012_v20 = vpack.c.bf16 %v817_v13, %v813_v7  ;;  %v8014_v23 = vpack.c.bf16 %v818_v14, %v814_v8  ;;  %v513_v25 = vpack.c.bf16 %v479_v16, %v430_v15  ;;  %v6918_v7 = vld [vmem:[%s10878_s3 + $0xf4] sm:$0xf0] }
 0x11a   :  { %v514_v30 = vpack.c.bf16 %v383_v19, %v334_v17  ;;  %v5818_v14 = vor.u32 %v6918_v7, %v5817_v6  ;;  %v6950_v15 = vld [vmem:[%s10878_s3 + $0x1f4] sm:$0xf0] }
 0x11b   :  { %1763 = vmatmul.bf16.gmra.mxu2 %v8012_v20  ;;  %1812 = vmatmul.bf16.gmra.mxu3 %v8014_v23  ;;  %v593_v49 = vunpack.c.l.bf16 %v513_v25  ;;  %v594_v56 = vunpack.c.h.bf16 %v513_v25 }
 0x11c   :  { %v595_v40 = vunpack.c.l.bf16 %v514_v30  ;;  %v596_v41 = vunpack.c.h.bf16 %v514_v30  ;;  %2019 = vmatpush.bf16.msrb.mxu0 %v5818_v14  ;;  %v6169_v14 = vld [vmem:[%s10878_s3 + $0x3a8] sm:$0xf] }
 0x11d   :  { %v662_v16 = vadd.f32 %v7709_v54, %v594_v56  ;;  %v5929_v56 = vld [vmem:[%s10878_s3 + $0x1c8] sm:$0xf] }
 0x11e   :  { %v663_v50 = vadd.f32 %v7701_v37, %v595_v40  ;;  %v664_v55 = vadd.f32 %v7703_v38, %v596_v41  ;;  %v5945_v37 = vld [vmem:[%s10878_s3 + $0x1e8] sm:$0xf]  ;;  %v661_v38 = vadd.f32 %v7707_v53, %v593_v49 }
 0x11f   :  { %v432_v57 = vpop.f32.mrf.mxu2  ;;  %v5946_v19 = vor.u32 %v6950_v15, %v5945_v37  ;;  %v822_v31 = vmax.f32 %v662_v16, 0.0  ;;  %v6041_v37 = vld [vmem:[%s10878_s3 + $0x2a8] sm:$0xf]  ;;  %v7006_v16 = vld [vmem:[%s10878_s3 + $0x3b4] sm:$0xf0] }
 0x120   :  { %v823_v60 = vmax.f32 %v663_v50, 0.0  ;;  %v824_v61 = vmax.f32 %v664_v55, 0.0  ;;  %v481_v62 = vpop.f32.mrf.mxu3  ;;  %v821_v30 = vmax.f32 %v661_v38, 0.0  ;;  %v5801_v50 = vld [vmem:[%s10878_s3 + $0xc8] sm:$0xf] }
 0x121   :  { %v515_v5 = vpack.c.bf16 %v481_v62, %v432_v57  ;;  %2068 = vmatpush.bf16.msrb.mxu1 %v5946_v19  ;;  %v6914_v55 = vld [vmem:[%s10878_s3 + $0xd4] sm:$0xf0] }
 0x122   :  { %v8043_v8 = vpack.c.bf16 %v823_v60, %v819_v46  ;;  %v8045_v13 = vpack.c.bf16 %v824_v61, %v820_v48  ;;  %v7010_v46 = vld [vmem:[%s10878_s3 + $0x3d4] sm:$0xf0]  ;;  %v5802_v60 = vor.u32 %v6914_v55, %v5801_v50 }
 0x123   :  { %v597_v17 = vunpack.c.l.bf16 %v515_v5  ;;  %v598_v18 = vunpack.c.h.bf16 %v515_v5  ;;  %v6186_v47 = vor.u32 %v7010_v46, %v6185_v42  ;;  %v6946_v61 = vld [vmem:[%s10878_s3 + $0x1d4] sm:$0xf0] }
 0x124   :  { %1670 = vmatmul.bf16.gmra.mxu0 %v8043_v8  ;;  %1719 = vmatmul.bf16.gmra.mxu1 %v8045_v13  ;;  %v5930_v62 = vor.u32 %v6946_v61, %v5929_v56  ;;  %v6974_v38 = vld [vmem:[%s10878_s3 + $0x2b4] sm:$0xf0] }
 0x125   :  { %v665_v24 = vadd.f32 %v7707_v53, %v597_v17  ;;  %v666_v25 = vadd.f32 %v7709_v54, %v598_v18  ;;  %v6057_v53 = vld [vmem:[%s10878_s3 + $0x2c8] sm:$0xf]  ;;  %v6978_v54 = vld [vmem:[%s10878_s3 + $0x2d4] sm:$0xf0]  ;;  %2167 = vmatpush.bf16.msrb.mxu3 %v6186_v47  ;;  %2020 = vmatpush.bf16.msrb.mxu0 %v5802_v60  ;;  %v6042_v15 = vor.u32 %v6974_v38, %v6041_v37 }
 0x126   :  { %v6058_v43 = vor.u32 %v6978_v54, %v6057_v53  ;;  %2069 = vmatpush.bf16.msrb.mxu1 %v5930_v62  ;;  %v6170_v17 = vor.u32 %v7006_v16, %v6169_v14  ;;  %v5913_v53 = vld [vmem:[%s10878_s3 + $0x1a8] sm:$0xf]  ;;  %v6970_v61 = vld [vmem:[%s10878_s3 + $0x294] sm:$0xf0] }
 0x127   :  { %v825_v36 = vmax.f32 %v665_v24, 0.0  ;;  %v826_v39 = vmax.f32 %v666_v25, 0.0  ;;  %v6025_v60 = vld [vmem:[%s10878_s3 + $0x288] sm:$0xf] }
 0x128   :  { %2118 = vmatpush.bf16.msrb.mxu2 %v6058_v43  ;;  %v6942_v43 = vld [vmem:[%s10878_s3 + $0x1b4] sm:$0xf0]  ;;  %v6153_v62 = vld [vmem:[%s10878_s3 + $0x388] sm:$0xf] }
 0x129   :  { %v8055_v40 = vpack.c.bf16 %v825_v36, %v821_v30  ;;  %v8057_v41 = vpack.c.bf16 %v826_v39, %v822_v31  ;;  %2168 = vmatpush.bf16.msrb.mxu3 %v6170_v17  ;;  %v5785_v36 = vld [vmem:[%s10878_s3 + $0xa8] sm:$0xf]  ;;  %v6910_v39 = vld [vmem:[%s10878_s3 + $0xb4] sm:$0xf0]  ;;  %v5914_v46 = vor.u32 %v6942_v43, %v5913_v53 }
 0x12a   :  { %v5786_v42 = vor.u32 %v6910_v39, %v5785_v36  ;;  %v6938_v36 = vld [vmem:[%s10878_s3 + $0x194] sm:$0xf0] }
 0x12b   :  { %1768 = vmatmul.bf16.gmra.mxu2 %v8055_v40  ;;  %1817 = vmatmul.bf16.gmra.mxu3 %v8057_v41 }
 0x12c   :  { %2119 = vmatpush.bf16.msrb.mxu2 %v6042_v15  ;;  %2021 = vmatpush.bf16.msrb.mxu0 %v5786_v42 }
 0x12d   :  { %2070 = vmatpush.bf16.msrb.mxu1 %v5914_v46 }
 0x131   :  { %v1636_v48 = vpop.f32.mrf.mxu0  ;;  %v1685_v49 = vpop.f32.mrf.mxu1 }
 0x132   :  { %v1686_v57 = vadd.f32 %v1685_v49, %v1636_v48 }
 0x134   :  { %1831 = vmatmul.bf16.vlgmr.msra.gmra.mxu0 %v7730_v11  ;;  %1880 = vmatmul.bf16.vlgmr.msra.gmra.mxu1 %v7732_v12 }
 0x139   :  { %v1638_v5 = vpop.f32.mrf.mxu0  ;;  %v1687_v6 = vpop.f32.mrf.mxu1 }
 0x13a   :  { %v1688_v7 = vadd.f32 %v1687_v6, %v1638_v5  ;;  %v6026_v5 = vor.u32 %v6970_v61, %v6025_v60  ;;  %v7002_v6 = vld [vmem:[%s10878_s3 + $0x394] sm:$0xf0] }
 0x13b   :  { %1929 = vmatmul.bf16.vlgmr.msra.gmra.mxu2 %v7747_v34  ;;  %1978 = vmatmul.bf16.vlgmr.msra.gmra.mxu3 %v7749_v35  ;;  %v6998_v60 = vld [vmem:[%s10878_s3 + $0x374] sm:$0xf0] }
 0x13c   :  { %2120 = vmatpush.bf16.msrb.mxu2 %v6026_v5 }
 0x13e   :  { %v1734_v18 = vpop.f32.mrf.mxu2  ;;  %v1783_v19 = vpop.f32.mrf.mxu3 }
 0x13f   :  { %v1735_v24 = vadd.f32 %v1734_v18, %v1686_v57  ;;  %v5769_v18 = vld [vmem:[%s10878_s3 + $0x88] sm:$0xf] }
 0x141   :  { %v8101_v25 = vadd.f32 %v1783_v19, %v1735_v24  ;;  %v1641_v30 = vpop.f32.mrf.mxu0  ;;  %v1690_v31 = vpop.f32.mrf.mxu1  ;;  %v6906_v19 = vld [vmem:[%s10878_s3 + $0x94] sm:$0xf0]  ;;  %v5897_v24 = vld [vmem:[%s10878_s3 + $0x188] sm:$0xf] }
 0x142   :  { %v1691_v54 = vadd.f32 %v1690_v31, %v1641_v30  ;;  %v5770_v31 = vor.u32 %v6906_v19, %v5769_v18  ;;  %v5898_v39 = vor.u32 %v6938_v36, %v5897_v24  ;;  %v6934_v24 = vld [vmem:[%s10878_s3 + $0x174] sm:$0xf0] }
 0x144   :  { %1836 = vmatmul.bf16.gmra.mxu0 %v7774_v3  ;;  %1885 = vmatmul.bf16.gmra.mxu1 %v7776_v4 }
 0x145   :  { %2022 = vmatpush.bf16.msrb.mxu0 %v5770_v31  ;;  %2071 = vmatpush.bf16.msrb.mxu1 %v5898_v39 }
 0x146   :  { %v1736_v47 = vpop.f32.mrf.mxu2  ;;  %v1785_v48 = vpop.f32.mrf.mxu3 }
 0x147   :  { %v1737_v49 = vadd.f32 %v1736_v47, %v1688_v7  ;;  %v6154_v7 = vor.u32 %v7002_v6, %v6153_v62 }
 0x149   :  { %v8117_v50 = vadd.f32 %v1785_v48, %v1737_v49  ;;  %v1643_v55 = vpop.f32.mrf.mxu0  ;;  %v1692_v56 = vpop.f32.mrf.mxu1  ;;  %2169 = vmatpush.bf16.msrb.mxu3 %v6154_v7  ;;  %v6009_v49 = vld [vmem:[%s10878_s3 + $0x268] sm:$0xf] }
 0x14a   :  { %v1693_v57 = vadd.f32 %v1692_v56, %v1643_v55  ;;  %v6966_v55 = vld [vmem:[%s10878_s3 + $0x274] sm:$0xf0]  ;;  %v6137_v56 = vld [vmem:[%s10878_s3 + $0x368] sm:$0xf] }
 0x14b   :  { %1934 = vmatmul.bf16.gmra.mxu2 %v7791_v28  ;;  %1983 = vmatmul.bf16.gmra.mxu3 %v7793_v29  ;;  %v6138_v61 = vor.u32 %v6998_v60, %v6137_v56  ;;  %v6994_v56 = vld [vmem:[%s10878_s3 + $0x354] sm:$0xf0] }
 0x14d   :  { %2170 = vmatpush.bf16.msrb.mxu3 %v6138_v61 }
 0x14e   :  { %v1739_v37 = vpop.f32.mrf.mxu2  ;;  %v1788_v38 = vpop.f32.mrf.mxu3 }
 0x14f   :  { %v1740_v14 = vadd.f32 %v1739_v37, %v1691_v54 }
 0x151   :  { %v8133_v15 = vadd.f32 %v1788_v38, %v1740_v14  ;;  %v1646_v16 = vpop.f32.mrf.mxu0  ;;  %v1695_v17 = vpop.f32.mrf.mxu1  ;;  %v5753_v14 = vld [vmem:[%s10878_s3 + $0x68] sm:$0xf] }
 0x152   :  { %v1696_v30 = vadd.f32 %v1695_v17, %v1646_v16  ;;  %v6902_v16 = vld [vmem:[%s10878_s3 + $0x74] sm:$0xf0]  ;;  %v5881_v17 = vld [vmem:[%s10878_s3 + $0x168] sm:$0xf] }
 0x153   :  { %v5754_v19 = vor.u32 %v6902_v16, %v5753_v14  ;;  %v6898_v14 = vld [vmem:[%s10878_s3 + $0x54] sm:$0xf0]  ;;  %v5865_v16 = vld [vmem:[%s10878_s3 + $0x148] sm:$0xf] }
 0x154   :  { %1841 = vmatmul.bf16.gmra.mxu0 %v7818_v63  ;;  %1890 = vmatmul.bf16.gmra.mxu1 %v7820_v0 }
 0x155   :  { %2023 = vmatpush.bf16.msrb.mxu0 %v5754_v19 }
 0x156   :  { %v1741_v53 = vpop.f32.mrf.mxu2  ;;  %v1790_v54 = vpop.f32.mrf.mxu3 }
 0x157   :  { %v1742_v42 = vadd.f32 %v1741_v53, %v1693_v57  ;;  %v6010_v57 = vor.u32 %v6966_v55, %v6009_v49  ;;  %v6962_v49 = vld [vmem:[%s10878_s3 + $0x254] sm:$0xf0] }
 0x159   :  { %v8149_v43 = vadd.f32 %v1790_v54, %v1742_v42  ;;  %v1648_v46 = vpop.f32.mrf.mxu0  ;;  %v1697_v47 = vpop.f32.mrf.mxu1  ;;  %2121 = vmatpush.bf16.msrb.mxu2 %v6010_v57 }
 0x15a   :  { %v1698_v48 = vadd.f32 %v1697_v47, %v1648_v46  ;;  %v5993_v47 = vld [vmem:[%s10878_s3 + $0x248] sm:$0xf] }
 0x15b   :  { %1939 = vmatmul.bf16.gmra.mxu2 %v7835_v26  ;;  %1988 = vmatmul.bf16.gmra.mxu3 %v7837_v27  ;;  %v5994_v55 = vor.u32 %v6962_v49, %v5993_v47  ;;  %v5977_v49 = vld [vmem:[%s10878_s3 + $0x228] sm:$0xf] }
 0x15d   :  { %2122 = vmatpush.bf16.msrb.mxu2 %v5994_v55 }
 0x15e   :  { %v1744_v62 = vpop.f32.mrf.mxu2  ;;  %v1793_v5 = vpop.f32.mrf.mxu3 }
 0x15f   :  { %v1745_v6 = vadd.f32 %v1744_v62, %v1696_v30  ;;  %v5882_v30 = vor.u32 %v6934_v24, %v5881_v17 }
 0x161   :  { %v8165_v7 = vadd.f32 %v1793_v5, %v1745_v6  ;;  %v1651_v37 = vpop.f32.mrf.mxu0  ;;  %v1700_v38 = vpop.f32.mrf.mxu1  ;;  %2072 = vmatpush.bf16.msrb.mxu1 %v5882_v30 }
 0x162   :  { %v1701_v18 = vadd.f32 %v1700_v38, %v1651_v37  ;;  %v5737_v38 = vld [vmem:[%s10878_s3 + $0x48] sm:$0xf] }
 0x163   :  { %v5738_v19 = vor.u32 %v6898_v14, %v5737_v38  ;;  %v5721_v14 = vld [vmem:[%s10878_s3 + $0x28] sm:$0xf] }
 0x164   :  { %1846 = vmatmul.bf16.gmra.mxu0 %v7862_v1  ;;  %1895 = vmatmul.bf16.gmra.mxu1 %v7864_v2 }
 0x165   :  { %2024 = vmatpush.bf16.msrb.mxu0 %v5738_v19  ;;  %v5849_v19 = vld [vmem:[%s10878_s3 + $0x128] sm:$0xf] }
 0x166   :  { %v1746_v31 = vpop.f32.mrf.mxu2  ;;  %v1795_v36 = vpop.f32.mrf.mxu3 }
 0x167   :  { %v1747_v39 = vadd.f32 %v1746_v31, %v1698_v48  ;;  %v6121_v48 = vld [vmem:[%s10878_s3 + $0x348] sm:$0xf] }
 0x168   :  { %v6122_v57 = vor.u32 %v6994_v56, %v6121_v48  ;;  %v6958_v48 = vld [vmem:[%s10878_s3 + $0x234] sm:$0xf0] }
 0x169   :  { %v8181_v53 = vadd.f32 %v1795_v36, %v1747_v39  ;;  %v1653_v54 = vpop.f32.mrf.mxu0  ;;  %v1702_v42 = vpop.f32.mrf.mxu1  ;;  %v5978_v55 = vor.u32 %v6958_v48, %v5977_v49  ;;  %v6990_v56 = vld [vmem:[%s10878_s3 + $0x334] sm:$0xf0] }
 0x16a   :  { %v1703_v46 = vadd.f32 %v1702_v42, %v1653_v54  ;;  %2171 = vmatpush.bf16.msrb.mxu3 %v6122_v57 }
 0x16b   :  { %1944 = vmatmul.bf16.gmra.mxu2 %v7879_v32  ;;  %1993 = vmatmul.bf16.gmra.mxu3 %v7881_v33 }
 0x16c   :  { %2123 = vmatpush.bf16.msrb.mxu2 %v5978_v55  ;;  %v5961_v55 = vld [vmem:[%s10878_s3 + $0x208] sm:$0xf] }
 0x16e   :  { %v1749_v60 = vpop.f32.mrf.mxu2  ;;  %v1798_v61 = vpop.f32.mrf.mxu3 }
 0x16f   :  { %v1750_v62 = vadd.f32 %v1749_v60, %v1701_v18  ;;  %v6930_v18 = vld [vmem:[%s10878_s3 + $0x154] sm:$0xf0] }
 0x170   :  { %v5866_v24 = vor.u32 %v6930_v18, %v5865_v16  ;;  %v6894_v16 = vld [vmem:[%s10878_s3 + $0x34] sm:$0xf0] }
 0x171   :  { %v8197_v5 = vadd.f32 %v1798_v61, %v1750_v62  ;;  %v1656_v6 = vpop.f32.mrf.mxu0  ;;  %v1705_v37 = vpop.f32.mrf.mxu1 }
 0x172   :  { %v1706_v17 = vadd.f32 %v1705_v37, %v1656_v6  ;;  %2073 = vmatpush.bf16.msrb.mxu1 %v5866_v24  ;;  %v5722_v24 = vor.u32 %v6894_v16, %v5721_v14  ;;  %v5705_v14 = vld [vmem:[%s10878_s3 + $0x8] sm:$0xf]  ;;  %v6890_v16 = vld [vmem:[%s10878_s3 + $0x14] sm:$0xf0] }
 0x174   :  { %1851 = vmatmul.bf16.gmra.mxu0 %v7906_v9  ;;  %1900 = vmatmul.bf16.gmra.mxu1 %v7908_v10 }
 0x175   :  { %2025 = vmatpush.bf16.msrb.mxu0 %v5722_v24  ;;  %v5706_v24 = vor.u32 %v6890_v16, %v5705_v14 }
 0x176   :  { %v1751_v30 = vpop.f32.mrf.mxu2  ;;  %v1800_v31 = vpop.f32.mrf.mxu3 }
 0x177   :  { %v1752_v36 = vadd.f32 %v1751_v30, %v1703_v46  ;;  %v6105_v46 = vld [vmem:[%s10878_s3 + $0x328] sm:$0xf] }
 0x178   :  { %v6106_v57 = vor.u32 %v6990_v56, %v6105_v46  ;;  %v6954_v56 = vld [vmem:[%s10878_s3 + $0x214] sm:$0xf0] }
 0x179   :  { %v8213_v39 = vadd.f32 %v1800_v31, %v1752_v36  ;;  %v1658_v54 = vpop.f32.mrf.mxu0  ;;  %v1707_v42 = vpop.f32.mrf.mxu1  ;;  %2026 = vmatpush.bf16.msrb.mxu0 %v5706_v24 }
 0x17a   :  { %v1708_v47 = vadd.f32 %v1707_v42, %v1658_v54  ;;  %2172 = vmatpush.bf16.msrb.mxu3 %v6106_v57  ;;  %v5962_v57 = vor.u32 %v6954_v56, %v5961_v55 }
 0x17b   :  { %1949 = vmatmul.bf16.gmra.mxu2 %v7923_v44  ;;  %1998 = vmatmul.bf16.gmra.mxu3 %v7925_v45 }
 0x17c   :  { %2124 = vmatpush.bf16.msrb.mxu2 %v5962_v57 }
 0x17e   :  { %v1754_v60 = vpop.f32.mrf.mxu2  ;;  %v1803_v61 = vpop.f32.mrf.mxu3 }
 0x17f   :  { %v1755_v62 = vadd.f32 %v1754_v60, %v1706_v17  ;;  %v6926_v17 = vld [vmem:[%s10878_s3 + $0x134] sm:$0xf0] }
 0x180   :  { %v5850_v30 = vor.u32 %v6926_v17, %v5849_v19  ;;  %v6986_v60 = vld [vmem:[%s10878_s3 + $0x314] sm:$0xf0]  ;;  %v5833_v19 = vld [vmem:[%s10878_s3 + $0x108] sm:$0xf] }
 0x181   :  { %v8229_v6 = vadd.f32 %v1803_v61, %v1755_v62  ;;  %v1661_v37 = vpop.f32.mrf.mxu0  ;;  %v1710_v38 = vpop.f32.mrf.mxu1  ;;  %v6922_v17 = vld [vmem:[%s10878_s3 + $0x114] sm:$0xf0] }
 0x182   :  { %v1711_v18 = vadd.f32 %v1710_v38, %v1661_v37  ;;  %2074 = vmatpush.bf16.msrb.mxu1 %v5850_v30 }
 0x184   :  { %1856 = vmatmul.bf16.gmra.mxu0 %v7950_v21  ;;  %1905 = vmatmul.bf16.gmra.mxu1 %v7952_v22 }
 0x186   :  { %v1756_v31 = vpop.f32.mrf.mxu2  ;;  %v1805_v36 = vpop.f32.mrf.mxu3 }
 0x187   :  { %v1757_v54 = vadd.f32 %v1756_v31, %v1708_v47  ;;  %v6089_v47 = vld [vmem:[%s10878_s3 + $0x308] sm:$0xf] }
 0x188   :  { %v6090_v61 = vor.u32 %v6986_v60, %v6089_v47 }
 0x189   :  { %v8245_v42 = vadd.f32 %v1805_v36, %v1757_v54  ;;  %v1663_v49 = vpop.f32.mrf.mxu0  ;;  %v1712_v48 = vpop.f32.mrf.mxu1  ;;  %v5834_v36 = vor.u32 %v6922_v17, %v5833_v19 }
 0x18a   :  { %v1713_v46 = vadd.f32 %v1712_v48, %v1663_v49  ;;  %2173 = vmatpush.bf16.msrb.mxu3 %v6090_v61  ;;  %v6980_v61 = vld [vmem:[%s10878_s3 + $0x2ec] sm:$0xf] }
 0x18b   :  { %1954 = vmatmul.bf16.gmra.mxu2 %v7968_v58  ;;  %2003 = vmatmul.bf16.gmra.mxu3 %v7970_v59 }
 0x18c   :  { %2075 = vmatpush.bf16.msrb.mxu1 %v5834_v36 }
 0x18e   :  { %v1759_v62 = vpop.f32.mrf.mxu2  ;;  %v1808_v37 = vpop.f32.mrf.mxu3 }
 0x18f   :  { %v1760_v38 = vadd.f32 %v1759_v62, %v1711_v18  ;;  %v6075_v62 = vld [vmem:[%s10878_s3 + $0x2f8] sm:$0xf0] }
 0x191   :  { %v8273_v30 = vadd.f32 %v1808_v37, %v1760_v38  ;;  %v1666_v18 = vpop.f32.mrf.mxu0  ;;  %v1715_v31 = vpop.f32.mrf.mxu1  ;;  %v6078_v37 = vor.u32 %v6980_v61, %v6075_v62  ;;  %v6203_v38 = vld [vmem:[%s10878_s3 + $0x3f8] sm:$0xf0] }
 0x192   :  { %v1716_v54 = vadd.f32 %v1715_v31, %v1666_v18  ;;  %v5819_v62 = vld [vmem:[%s10878_s3 + $0xf8] sm:$0xf0] }
 0x193   :  { %2313 = vmatpush.bf16.msra.mxu2 %v6078_v37 }
 0x194   :  { %1861 = vmatmul.bf16.gmra.mxu0 %v8001_v51  ;;  %1910 = vmatmul.bf16.gmra.mxu1 %v8003_v52 }
 0x196   :  { %v1761_v49 = vpop.f32.mrf.mxu2  ;;  %v1810_v48 = vpop.f32.mrf.mxu3 }
 0x197   :  { %v1762_v55 = vadd.f32 %v1761_v49, %v1713_v46  ;;  %v7012_v46 = vld [vmem:[%s10878_s3 + $0x3ec] sm:$0xf] }
 0x198   :  { %v6206_v14 = vor.u32 %v7012_v46, %v6203_v38  ;;  %v6948_v46 = vld [vmem:[%s10878_s3 + $0x1ec] sm:$0xf] }
 0x199   :  { %v8277_v56 = vadd.f32 %v1810_v48, %v1762_v55  ;;  %v1668_v47 = vpop.f32.mrf.mxu0  ;;  %v1717_v57 = vpop.f32.mrf.mxu1 }
 0x19a   :  { %v1718_v60 = vadd.f32 %v1717_v57, %v1668_v47  ;;  %2362 = vmatpush.bf16.msra.mxu3 %v6206_v14 }
 0x19b   :  { %1959 = vmatmul.bf16.gmra.mxu2 %v8012_v20  ;;  %2008 = vmatmul.bf16.gmra.mxu3 %v8014_v23 }
 0x19e   :  { %v1764_v16 = vpop.f32.mrf.mxu2  ;;  %v1813_v19 = vpop.f32.mrf.mxu3 }
 0x19f   :  { %v1765_v24 = vadd.f32 %v1764_v16, %v1716_v54  ;;  %v6916_v54 = vld [vmem:[%s10878_s3 + $0xec] sm:$0xf] }
 0x1a0   :  { %v5822_v38 = vor.u32 %v6916_v54, %v5819_v62  ;;  %v6187_v54 = vld [vmem:[%s10878_s3 + $0x3d8] sm:$0xf0] }
 0x1a1   :  { %v8293_v17 = vadd.f32 %v1813_v19, %v1765_v24  ;;  %v1671_v18 = vpop.f32.mrf.mxu0  ;;  %v1720_v31 = vpop.f32.mrf.mxu1 }
 0x1a2   :  { %v1721_v36 = vadd.f32 %v1720_v31, %v1671_v18  ;;  %2215 = vmatpush.bf16.msra.mxu0 %v5822_v38 }
 0x1a4   :  { %1866 = vmatmul.bf16.gmra.mxu0 %v8043_v8  ;;  %1915 = vmatmul.bf16.gmra.mxu1 %v8045_v13 }
 0x1a6   :  { %v1766_v49 = vpop.f32.mrf.mxu2  ;;  %v1815_v48 = vpop.f32.mrf.mxu3 }
 0x1a7   :  { %v1767_v55 = vadd.f32 %v1766_v49, %v1718_v60  ;;  %v5947_v60 = vld [vmem:[%s10878_s3 + $0x1f8] sm:$0xf0] }
 0x1a8   :  { %v5950_v14 = vor.u32 %v6948_v46, %v5947_v60 }
 0x1a9   :  { %v8297_v47 = vadd.f32 %v1815_v48, %v1767_v55  ;;  %v1673_v57 = vpop.f32.mrf.mxu0  ;;  %v1722_v61 = vpop.f32.mrf.mxu1  ;;  %v6976_v55 = vld [vmem:[%s10878_s3 + $0x2cc] sm:$0xf] }
 0x1aa   :  { %v1723_v37 = vadd.f32 %v1722_v61, %v1673_v57  ;;  %2264 = vmatpush.bf16.msra.mxu1 %v5950_v14  ;;  %v6059_v57 = vld [vmem:[%s10878_s3 + $0x2d8] sm:$0xf0]  ;;  %v7008_v61 = vld [vmem:[%s10878_s3 + $0x3cc] sm:$0xf] }
 0x1ab   :  { %1964 = vmatmul.bf16.gmra.mxu2 %v8055_v40  ;;  %2013 = vmatmul.bf16.gmra.mxu3 %v8057_v41  ;;  %v6190_v62 = vor.u32 %v7008_v61, %v6187_v54  ;;  %v2447_v54 = vld [vmem:[#allocation1 + $0x9] sm:$0xff] }
 0x1ad   :  { %2363 = vmatpush.bf16.msra.mxu3 %v6190_v62 }
 0x1ae   :  { %v1769_v16 = vpop.f32.mrf.mxu2  ;;  %v1818_v19 = vpop.f32.mrf.mxu3 }
 0x1af   :  { %v1770_v24 = vadd.f32 %v1769_v16, %v1721_v36  ;;  %v6062_v36 = vor.u32 %v6976_v55, %v6059_v57 }
 0x1b1   :  { %v8313_v18 = vadd.f32 %v1818_v19, %v1770_v24  ;;  %v1832_v31 = vpop.f32.mrf.mxu0  ;;  %v1881_v49 = vpop.f32.mrf.mxu1  ;;  %2314 = vmatpush.bf16.msra.mxu2 %v6062_v36  ;;  %v6912_v24 = vld [vmem:[%s10878_s3 + $0xcc] sm:$0xf]  ;;  %v2446_v36 = vld [vmem:[#allocation1] sm:$0xff] }
 0x1b2   :  { %v1882_v48 = vadd.f32 %v1881_v49, %v1832_v31  ;;  %v5803_v31 = vld [vmem:[%s10878_s3 + $0xd8] sm:$0xf0]  ;;  %v6944_v49 = vld [vmem:[%s10878_s3 + $0x1cc] sm:$0xf] }
 0x1b3   :  { %v5806_v57 = vor.u32 %v6912_v24, %v5803_v31  ;;  %v6972_v31 = vld [vmem:[%s10878_s3 + $0x2ac] sm:$0xf] }
 0x1b4   :  { %2027 = vmatmul.bf16.vlgmr.msrb.gmra.mxu0 %v7730_v11  ;;  %2076 = vmatmul.bf16.vlgmr.msrb.gmra.mxu1 %v7732_v12 }
 0x1b5   :  { %2216 = vmatpush.bf16.msra.mxu0 %v5806_v57  ;;  %v7004_v57 = vld [vmem:[%s10878_s3 + $0x3ac] sm:$0xf] }
 0x1b6   :  { %v1771_v46 = vpop.f32.mrf.mxu2  ;;  %v1820_v38 = vpop.f32.mrf.mxu3 }
 0x1b7   :  { %v1772_v60 = vadd.f32 %v1771_v46, %v1723_v37  ;;  %v5931_v37 = vld [vmem:[%s10878_s3 + $0x1d8] sm:$0xf0] }
 0x1b8   :  { %v5934_v61 = vor.u32 %v6944_v49, %v5931_v37  ;;  %v6043_v49 = vld [vmem:[%s10878_s3 + $0x2b8] sm:$0xf0] }
 0x1b9   :  { %v8329_v14 = vadd.f32 %v1820_v38, %v1772_v60  ;;  %v1834_v16 = vpop.f32.mrf.mxu0  ;;  %v1883_v19 = vpop.f32.mrf.mxu1  ;;  %v2450_v60 = vpack.i.b16 %v2446_v36, %v2446_v36 }
 0x1ba   :  { %v1884_v55 = vadd.f32 %v1883_v19, %v1834_v16  ;;  %2265 = vmatpush.bf16.msra.mxu1 %v5934_v61  ;;  %v6046_v61 = vor.u32 %v6972_v31, %v6043_v49 }
 0x1bb   :  { %10933 = vst [vmem:[#allocation7_spill] sm:$0xff] %v8329_v14  ;;  %2125 = vmatmul.bf16.vlgmr.msrb.gmra.mxu2 %v7747_v34  ;;  %2174 = vmatmul.bf16.vlgmr.msrb.gmra.mxu3 %v7749_v35  ;;  %v2453_v14 = vpack.i.b16 %v2447_v54, %v2447_v54 }
 0x1bc   :  { %2315 = vmatpush.bf16.msra.mxu2 %v6046_v61 }
 0x1be   :  { %v1930_v62 = vpop.f32.mrf.mxu2  ;;  %v1979_v46 = vpop.f32.mrf.mxu3 }
 0x1bf   :  { %v1931_v38 = vadd.f32 %v1930_v62, %v1882_v48  ;;  %v6171_v48 = vld [vmem:[%s10878_s3 + $0x3b8] sm:$0xf0]  ;;  %v2452_v62 = vperm.slane %v2450_v60, 0 }
 0x1c0   :  { %v6174_v54 = vor.u32 %v7004_v57, %v6171_v48  ;;  %v5787_v60 = vld [vmem:[%s10878_s3 + $0xb8] sm:$0xf0] }
 0x1c1   :  { %v1980_v16 = vadd.f32 %v1979_v46, %v1931_v38  ;;  %v1837_v19 = vpop.f32.mrf.mxu0  ;;  %v1886_v24 = vpop.f32.mrf.mxu1  ;;  %v2455_v46 = vperm.slane %v2453_v14, 0  ;;  %v8360_v31 = vunpack.c.l.bf16 %v2452_v62  ;;  %v6908_v14 = vld [vmem:[%s10878_s3 + $0xac] sm:$0xf] }
 0x1c2   :  { %v1887_v37 = vadd.f32 %v1886_v24, %v1837_v19  ;;  %2364 = vmatpush.bf16.msra.mxu3 %v6174_v54  ;;  %v5790_v61 = vor.u32 %v6908_v14, %v5787_v60 }
 0x1c3   :  { %v2411_v36 = vpack.c.bf16 %v1980_v16, %v8101_v25  ;;  %v8362_v49 = vunpack.c.l.bf16 %v2455_v46 }
 0x1c4   :  { %2032 = vmatmul.bf16.gmra.mxu0 %v7774_v3  ;;  %2081 = vmatmul.bf16.gmra.mxu1 %v7776_v4 }
 0x1c5   :  { %v2462_v19 = vunpack.c.l.bf16 %v2411_v36  ;;  %v2463_v24 = vunpack.c.h.bf16 %v2411_v36  ;;  %2217 = vmatpush.bf16.msra.mxu0 %v5790_v61  ;;  %v6027_v61 = vld [vmem:[%s10878_s3 + $0x298] sm:$0xf0] }
 0x1c6   :  { %v1932_v38 = vpop.f32.mrf.mxu2  ;;  %v1981_v35 = vpop.f32.mrf.mxu3 }
 0x1c7   :  { %v1933_v34 = vadd.f32 %v1932_v38, %v1884_v55  ;;  %v6940_v55 = vld [vmem:[%s10878_s3 + $0x1ac] sm:$0xf]  ;;  %v2530_v36 = vadd.f32 %v8360_v31, %v2462_v19  ;;  %v2531_v54 = vadd.f32 %v8362_v49, %v2463_v24 }
 0x1c8   :  { %v6968_v24 = vld [vmem:[%s10878_s3 + $0x28c] sm:$0xf] }
 0x1c9   :  { %v1982_v12 = vadd.f32 %v1981_v35, %v1933_v34  ;;  %v1839_v25 = vpop.f32.mrf.mxu0  ;;  %v1888_v16 = vpop.f32.mrf.mxu1  ;;  %v5915_v34 = vld [vmem:[%s10878_s3 + $0x1b8] sm:$0xf0]  ;;  %v2691_v60 = vmax.f32 %v2531_v54, 0.0 }
 0x1ca   :  { %v1889_v57 = vadd.f32 %v1888_v16, %v1839_v25  ;;  %v5918_v48 = vor.u32 %v6940_v55, %v5915_v34 }
 0x1cb   :  { %v2413_v35 = vpack.c.bf16 %v1982_v12, %v8117_v50  ;;  %2130 = vmatmul.bf16.gmra.mxu2 %v7791_v28  ;;  %2179 = vmatmul.bf16.gmra.mxu3 %v7793_v29  ;;  %v2690_v50 = vmax.f32 %v2530_v36, 0.0  ;;  %v6155_v36 = vld [vmem:[%s10878_s3 + $0x398] sm:$0xf0] }
 0x1cc   :  { %2266 = vmatpush.bf16.msra.mxu1 %v5918_v48  ;;  %v6030_v48 = vor.u32 %v6968_v24, %v6027_v61 }
 0x1cd   :  { %v2466_v62 = vunpack.c.l.bf16 %v2413_v35  ;;  %v2467_v46 = vunpack.c.h.bf16 %v2413_v35 }
 0x1ce   :  { %v1935_v38 = vpop.f32.mrf.mxu2  ;;  %v1984_v25 = vpop.f32.mrf.mxu3  ;;  %2316 = vmatpush.bf16.msra.mxu2 %v6030_v48 }
 0x1cf   :  { %v2534_v16 = vadd.f32 %v8360_v31, %v2466_v62  ;;  %v2535_v14 = vadd.f32 %v8362_v49, %v2467_v46  ;;  %v1936_v12 = vadd.f32 %v1935_v38, %v1887_v37  ;;  %v7000_v37 = vld [vmem:[%s10878_s3 + $0x38c] sm:$0xf] }
 0x1d0   :  { %v6158_v38 = vor.u32 %v7000_v37, %v6155_v36 }
 0x1d1   :  { %v2694_v28 = vmax.f32 %v2534_v16, 0.0  ;;  %v2695_v29 = vmax.f32 %v2535_v14, 0.0  ;;  %v1985_v55 = vadd.f32 %v1984_v25, %v1936_v12  ;;  %v1842_v34 = vpop.f32.mrf.mxu0  ;;  %v1891_v19 = vpop.f32.mrf.mxu1 }
 0x1d2   :  { %v1892_v35 = vadd.f32 %v1891_v19, %v1842_v34  ;;  %2365 = vmatpush.bf16.msra.mxu3 %v6158_v38 }
 0x1d3   :  { %v8395_v54 = vpack.c.bf16 %v2694_v28, %v2690_v50  ;;  %v8397_v62 = vpack.c.bf16 %v2695_v29, %v2691_v60  ;;  %v2415_v46 = vpack.c.bf16 %v1985_v55, %v8133_v15  ;;  %v6904_v29 = vld [vmem:[%s10878_s3 + $0x8c] sm:$0xf]  ;;  %v5771_v15 = vld [vmem:[%s10878_s3 + $0x98] sm:$0xf0] }
 0x1d4   :  { %2037 = vmatmul.bf16.gmra.mxu0 %v7818_v63  ;;  %2086 = vmatmul.bf16.gmra.mxu1 %v7820_v0  ;;  %v5774_v60 = vor.u32 %v6904_v29, %v5771_v15  ;;  %v6936_v55 = vld [vmem:[%s10878_s3 + $0x18c] sm:$0xf] }
 0x1d5   :  { %v2470_v12 = vunpack.c.l.bf16 %v2415_v46  ;;  %v2471_v34 = vunpack.c.h.bf16 %v2415_v46 }
 0x1d6   :  { %v1937_v25 = vpop.f32.mrf.mxu2  ;;  %v1986_v16 = vpop.f32.mrf.mxu3  ;;  %2218 = vmatpush.bf16.msra.mxu0 %v5774_v60  ;;  %v6011_v60 = vld [vmem:[%s10878_s3 + $0x278] sm:$0xf0] }
 0x1d7   :  { %v1938_v14 = vadd.f32 %v1937_v25, %v1889_v57  ;;  %v5899_v57 = vld [vmem:[%s10878_s3 + $0x198] sm:$0xf0]  ;;  %v2538_v37 = vadd.f32 %v8360_v31, %v2470_v12  ;;  %v2539_v36 = vadd.f32 %v8362_v49, %v2471_v34  ;;  %v6964_v34 = vld [vmem:[%s10878_s3 + $0x26c] sm:$0xf] }
 0x1d8   :  { %v5902_v48 = vor.u32 %v6936_v55, %v5899_v57 }
 0x1d9   :  { %v1987_v19 = vadd.f32 %v1986_v16, %v1938_v14  ;;  %v1844_v24 = vpop.f32.mrf.mxu0  ;;  %v1893_v28 = vpop.f32.mrf.mxu1 }
 0x1da   :  { %v1894_v50 = vadd.f32 %v1893_v28, %v1844_v24  ;;  %2267 = vmatpush.bf16.msra.mxu1 %v5902_v48  ;;  %v2699_v28 = vmax.f32 %v2539_v36, 0.0  ;;  %v6014_v48 = vor.u32 %v6964_v34, %v6011_v60 }
 0x1db   :  { %v2417_v61 = vpack.c.bf16 %v1987_v19, %v8149_v43  ;;  %2135 = vmatmul.bf16.gmra.mxu2 %v7835_v26  ;;  %2184 = vmatmul.bf16.gmra.mxu3 %v7837_v27  ;;  %v2698_v19 = vmax.f32 %v2538_v37, 0.0  ;;  %v6139_v37 = vld [vmem:[%s10878_s3 + $0x378] sm:$0xf0] }
 0x1dc   :  { %2317 = vmatpush.bf16.msra.mxu2 %v6014_v48 }
 0x1dd   :  { %v2474_v46 = vunpack.c.l.bf16 %v2417_v61  ;;  %v2475_v38 = vunpack.c.h.bf16 %v2417_v61 }
 0x1de   :  { %v1940_v25 = vpop.f32.mrf.mxu2  ;;  %v1989_v16 = vpop.f32.mrf.mxu3 }
 0x1df   :  { %v2542_v14 = vadd.f32 %v8360_v31, %v2474_v46  ;;  %v2543_v24 = vadd.f32 %v8362_v49, %v2475_v38  ;;  %v1941_v43 = vadd.f32 %v1940_v25, %v1892_v35  ;;  %v6996_v35 = vld [vmem:[%s10878_s3 + $0x36c] sm:$0xf] }
 0x1e0   :  { %v6142_v46 = vor.u32 %v6996_v35, %v6139_v37 }
 0x1e1   :  { %v2702_v29 = vmax.f32 %v2542_v14, 0.0  ;;  %v2703_v15 = vmax.f32 %v2543_v24, 0.0  ;;  %v1990_v55 = vadd.f32 %v1989_v16, %v1941_v43  ;;  %v1847_v57 = vpop.f32.mrf.mxu0  ;;  %v1896_v12 = vpop.f32.mrf.mxu1 }
 0x1e2   :  { %v1897_v61 = vadd.f32 %v1896_v12, %v1847_v57  ;;  %2366 = vmatpush.bf16.msra.mxu3 %v6142_v46 }
 0x1e3   :  { %v2419_v36 = vpack.c.bf16 %v1990_v55, %v8165_v7  ;;  %v8434_v38 = vpack.c.bf16 %v2702_v29, %v2698_v19  ;;  %v8436_v25 = vpack.c.bf16 %v2703_v15, %v2699_v28  ;;  %v6900_v7 = vld [vmem:[%s10878_s3 + $0x6c] sm:$0xf]  ;;  %v5755_v19 = vld [vmem:[%s10878_s3 + $0x78] sm:$0xf0] }
 0x1e4   :  { %2042 = vmatmul.bf16.gmra.mxu0 %v7862_v1  ;;  %2091 = vmatmul.bf16.gmra.mxu1 %v7864_v2  ;;  %v5758_v29 = vor.u32 %v6900_v7, %v5755_v19  ;;  %v6932_v15 = vld [vmem:[%s10878_s3 + $0x16c] sm:$0xf] }
 0x1e5   :  { %v2478_v43 = vunpack.c.l.bf16 %v2419_v36  ;;  %v2479_v57 = vunpack.c.h.bf16 %v2419_v36 }
 0x1e6   :  { %v1942_v16 = vpop.f32.mrf.mxu2  ;;  %v1991_v14 = vpop.f32.mrf.mxu3  ;;  %2219 = vmatpush.bf16.msra.mxu0 %v5758_v29  ;;  %v5995_v29 = vld [vmem:[%s10878_s3 + $0x258] sm:$0xf0] }
 0x1e7   :  { %v1943_v24 = vadd.f32 %v1942_v16, %v1894_v50  ;;  %v5883_v50 = vld [vmem:[%s10878_s3 + $0x178] sm:$0xf0]  ;;  %v2546_v35 = vadd.f32 %v8360_v31, %v2478_v43  ;;  %v2547_v37 = vadd.f32 %v8362_v49, %v2479_v57  ;;  %v6960_v57 = vld [vmem:[%s10878_s3 + $0x24c] sm:$0xf] }
 0x1e8   :  { %v5886_v48 = vor.u32 %v6932_v15, %v5883_v50 }
 0x1e9   :  { %v1992_v12 = vadd.f32 %v1991_v14, %v1943_v24  ;;  %v1849_v34 = vpop.f32.mrf.mxu0  ;;  %v1898_v60 = vpop.f32.mrf.mxu1 }
 0x1ea   :  { %v1899_v28 = vadd.f32 %v1898_v60, %v1849_v34  ;;  %2268 = vmatpush.bf16.msra.mxu1 %v5886_v48  ;;  %v2707_v60 = vmax.f32 %v2547_v37, 0.0  ;;  %v5998_v48 = vor.u32 %v6960_v57, %v5995_v29 }
 0x1eb   :  { %v2421_v55 = vpack.c.bf16 %v1992_v12, %v8181_v53  ;;  %2140 = vmatmul.bf16.gmra.mxu2 %v7879_v32  ;;  %2189 = vmatmul.bf16.gmra.mxu3 %v7881_v33  ;;  %v2706_v12 = vmax.f32 %v2546_v35, 0.0  ;;  %v6123_v35 = vld [vmem:[%s10878_s3 + $0x358] sm:$0xf0] }
 0x1ec   :  { %2318 = vmatpush.bf16.msra.mxu2 %v5998_v48 }
 0x1ed   :  { %v2482_v36 = vunpack.c.l.bf16 %v2421_v55  ;;  %v2483_v46 = vunpack.c.h.bf16 %v2421_v55 }
 0x1ee   :  { %v1945_v16 = vpop.f32.mrf.mxu2  ;;  %v1994_v14 = vpop.f32.mrf.mxu3 }
 0x1ef   :  { %v2550_v24 = vadd.f32 %v8360_v31, %v2482_v36  ;;  %v2551_v34 = vadd.f32 %v8362_v49, %v2483_v46  ;;  %v1946_v53 = vadd.f32 %v1945_v16, %v1897_v61  ;;  %v6992_v61 = vld [vmem:[%s10878_s3 + $0x34c] sm:$0xf] }
 0x1f0   :  { %v6126_v36 = vor.u32 %v6992_v61, %v6123_v35 }
 0x1f1   :  { %v2710_v7 = vmax.f32 %v2550_v24, 0.0  ;;  %v2711_v19 = vmax.f32 %v2551_v34, 0.0  ;;  %v1995_v15 = vadd.f32 %v1994_v14, %v1946_v53  ;;  %v1852_v50 = vpop.f32.mrf.mxu0  ;;  %v1901_v43 = vpop.f32.mrf.mxu1 }
 0x1f2   :  { %v1902_v55 = vadd.f32 %v1901_v43, %v1852_v50  ;;  %2367 = vmatpush.bf16.msra.mxu3 %v6126_v36 }
 0x1f3   :  { %v2423_v37 = vpack.c.bf16 %v1995_v15, %v8197_v5  ;;  %v8472_v46 = vpack.c.bf16 %v2710_v7, %v2706_v12  ;;  %v8474_v16 = vpack.c.bf16 %v2711_v19, %v2707_v60  ;;  %v6896_v5 = vld [vmem:[%s10878_s3 + $0x4c] sm:$0xf]  ;;  %v5739_v12 = vld [vmem:[%s10878_s3 + $0x58] sm:$0xf0] }
 0x1f4   :  { %2047 = vmatmul.bf16.gmra.mxu0 %v7906_v9  ;;  %2096 = vmatmul.bf16.gmra.mxu1 %v7908_v10  ;;  %v5742_v7 = vor.u32 %v6896_v5, %v5739_v12  ;;  %v6928_v19 = vld [vmem:[%s10878_s3 + $0x14c] sm:$0xf] }
 0x1f5   :  { %v2486_v53 = vunpack.c.l.bf16 %v2423_v37  ;;  %v2487_v50 = vunpack.c.h.bf16 %v2423_v37 }
 0x1f6   :  { %v1947_v14 = vpop.f32.mrf.mxu2  ;;  %v1996_v24 = vpop.f32.mrf.mxu3  ;;  %2220 = vmatpush.bf16.msra.mxu0 %v5742_v7  ;;  %v5979_v7 = vld [vmem:[%s10878_s3 + $0x238] sm:$0xf0] }
 0x1f7   :  { %v1948_v34 = vadd.f32 %v1947_v14, %v1899_v28  ;;  %v5867_v28 = vld [vmem:[%s10878_s3 + $0x158] sm:$0xf0]  ;;  %v2554_v61 = vadd.f32 %v8360_v31, %v2486_v53  ;;  %v2555_v35 = vadd.f32 %v8362_v49, %v2487_v50  ;;  %v6956_v50 = vld [vmem:[%s10878_s3 + $0x22c] sm:$0xf] }
 0x1f8   :  { %v5870_v48 = vor.u32 %v6928_v19, %v5867_v28 }
 0x1f9   :  { %v1997_v43 = vadd.f32 %v1996_v24, %v1948_v34  ;;  %v1854_v57 = vpop.f32.mrf.mxu0  ;;  %v1903_v29 = vpop.f32.mrf.mxu1 }
 0x1fa   :  { %v1904_v60 = vadd.f32 %v1903_v29, %v1854_v57  ;;  %2269 = vmatpush.bf16.msra.mxu1 %v5870_v48  ;;  %v2715_v29 = vmax.f32 %v2555_v35, 0.0  ;;  %v5982_v48 = vor.u32 %v6956_v50, %v5979_v7 }
 0x1fb   :  { %v2425_v15 = vpack.c.bf16 %v1997_v43, %v8213_v39  ;;  %2145 = vmatmul.bf16.gmra.mxu2 %v7923_v44  ;;  %2194 = vmatmul.bf16.gmra.mxu3 %v7925_v45  ;;  %v2714_v43 = vmax.f32 %v2554_v61, 0.0  ;;  %v6107_v61 = vld [vmem:[%s10878_s3 + $0x338] sm:$0xf0] }
 0x1fc   :  { %2319 = vmatpush.bf16.msra.mxu2 %v5982_v48 }
 0x1fd   :  { %v2490_v37 = vunpack.c.l.bf16 %v2425_v15  ;;  %v2491_v36 = vunpack.c.h.bf16 %v2425_v15 }
 0x1fe   :  { %v1950_v14 = vpop.f32.mrf.mxu2  ;;  %v1999_v24 = vpop.f32.mrf.mxu3 }
 0x1ff   :  { %v2558_v34 = vadd.f32 %v8360_v31, %v2490_v37  ;;  %v2559_v57 = vadd.f32 %v8362_v49, %v2491_v36  ;;  %v1951_v39 = vadd.f32 %v1950_v14, %v1902_v55  ;;  %v6988_v55 = vld [vmem:[%s10878_s3 + $0x32c] sm:$0xf] }
 0x200   :  { %v6110_v37 = vor.u32 %v6988_v55, %v6107_v61 }
 0x201   :  { %v2718_v5 = vmax.f32 %v2558_v34, 0.0  ;;  %v2719_v12 = vmax.f32 %v2559_v57, 0.0  ;;  %v2000_v19 = vadd.f32 %v1999_v24, %v1951_v39  ;;  %v1857_v28 = vpop.f32.mrf.mxu0  ;;  %v1906_v53 = vpop.f32.mrf.mxu1 }
 0x202   :  { %v1907_v15 = vadd.f32 %v1906_v53, %v1857_v28  ;;  %2368 = vmatpush.bf16.msra.mxu3 %v6110_v37 }
 0x203   :  { %v2427_v35 = vpack.c.bf16 %v2000_v19, %v8229_v6  ;;  %v8510_v36 = vpack.c.bf16 %v2718_v5, %v2714_v43  ;;  %v8512_v14 = vpack.c.bf16 %v2719_v12, %v2715_v29  ;;  %v6892_v6 = vld [vmem:[%s10878_s3 + $0x2c] sm:$0xf]  ;;  %v5723_v43 = vld [vmem:[%s10878_s3 + $0x38] sm:$0xf0] }
 0x204   :  { %2052 = vmatmul.bf16.gmra.mxu0 %v7950_v21  ;;  %2101 = vmatmul.bf16.gmra.mxu1 %v7952_v22  ;;  %v5726_v5 = vor.u32 %v6892_v6, %v5723_v43  ;;  %v6924_v12 = vld [vmem:[%s10878_s3 + $0x12c] sm:$0xf] }
 0x205   :  { %v2494_v39 = vunpack.c.l.bf16 %v2427_v35  ;;  %v2495_v28 = vunpack.c.h.bf16 %v2427_v35 }
 0x206   :  { %v1952_v24 = vpop.f32.mrf.mxu2  ;;  %v2001_v34 = vpop.f32.mrf.mxu3  ;;  %2221 = vmatpush.bf16.msra.mxu0 %v5726_v5  ;;  %v5835_v5 = vld [vmem:[%s10878_s3 + $0x118] sm:$0xf0] }
 0x207   :  { %v1953_v57 = vadd.f32 %v1952_v24, %v1904_v60  ;;  %v5851_v60 = vld [vmem:[%s10878_s3 + $0x138] sm:$0xf0]  ;;  %v2562_v55 = vadd.f32 %v8360_v31, %v2494_v39  ;;  %v2563_v61 = vadd.f32 %v8362_v49, %v2495_v28  ;;  %v6920_v28 = vld [vmem:[%s10878_s3 + $0x10c] sm:$0xf] }
 0x208   :  { %v5854_v48 = vor.u32 %v6924_v12, %v5851_v60  ;;  %v5707_v39 = vld [vmem:[%s10878_s3 + $0x18] sm:$0xf0] }
 0x209   :  { %v2002_v53 = vadd.f32 %v2001_v34, %v1953_v57  ;;  %v1859_v50 = vpop.f32.mrf.mxu0  ;;  %v1908_v7 = vpop.f32.mrf.mxu1  ;;  %v2723_v6 = vmax.f32 %v2563_v61, 0.0 }
 0x20a   :  { %v1909_v29 = vadd.f32 %v1908_v7, %v1859_v50  ;;  %2270 = vmatpush.bf16.msra.mxu1 %v5854_v48  ;;  %v2722_v7 = vmax.f32 %v2562_v55, 0.0  ;;  %v5838_v55 = vor.u32 %v6920_v28, %v5835_v5 }
 0x20b   :  { %v2429_v19 = vpack.c.bf16 %v2002_v53, %v8245_v42  ;;  %2150 = vmatmul.bf16.gmra.mxu2 %v7968_v58  ;;  %2199 = vmatmul.bf16.gmra.mxu3 %v7970_v59  ;;  %v6888_v53 = vld [vmem:[%s10878_s3 + $0xc] sm:$0xf] }
 0x20c   :  { %v5710_v43 = vor.u32 %v6888_v53, %v5707_v39  ;;  %v6984_v53 = vld [vmem:[%s10878_s3 + $0x30c] sm:$0xf] }
 0x20d   :  { %v2498_v35 = vunpack.c.l.bf16 %v2429_v19  ;;  %v2499_v37 = vunpack.c.h.bf16 %v2429_v19 }
 0x20e   :  { %v1955_v24 = vpop.f32.mrf.mxu2  ;;  %v2004_v34 = vpop.f32.mrf.mxu3  ;;  %2222 = vmatpush.bf16.msra.mxu0 %v5710_v43  ;;  %2271 = vmatpush.bf16.msra.mxu1 %v5838_v55 }
 0x20f   :  { %v2566_v57 = vadd.f32 %v8360_v31, %v2498_v35  ;;  %v2567_v50 = vadd.f32 %v8362_v49, %v2499_v37  ;;  %v1956_v42 = vadd.f32 %v1955_v24, %v1907_v15  ;;  %v6952_v35 = vld [vmem:[%s10878_s3 + $0x20c] sm:$0xf]  ;;  %v5963_v37 = vld [vmem:[%s10878_s3 + $0x218] sm:$0xf0] }
 0x210   :  { %v5966_v24 = vor.u32 %v6952_v35, %v5963_v37 }
 0x211   :  { %v2726_v15 = vmax.f32 %v2566_v57, 0.0  ;;  %v2727_v12 = vmax.f32 %v2567_v50, 0.0  ;;  %v2005_v60 = vadd.f32 %v2004_v34, %v1956_v42  ;;  %v1862_v19 = vpop.f32.mrf.mxu0  ;;  %v1911_v48 = vpop.f32.mrf.mxu1  ;;  %v6091_v34 = vld [vmem:[%s10878_s3 + $0x318] sm:$0xf0] }
 0x212   :  { %v1912_v61 = vadd.f32 %v1911_v48, %v1862_v19  ;;  %v6094_v50 = vor.u32 %v6984_v53, %v6091_v34  ;;  %2320 = vmatpush.bf16.msra.mxu2 %v5966_v24 }
 0x213   :  { %v2431_v57 = vpack.c.bf16 %v2005_v60, %v8273_v30  ;;  %v8560_v42 = vpack.c.bf16 %v2726_v15, %v2722_v7  ;;  %v8562_v39 = vpack.c.bf16 %v2727_v12, %v2723_v6 }
 0x214   :  { %2057 = vmatmul.bf16.gmra.mxu0 %v8001_v51  ;;  %2106 = vmatmul.bf16.gmra.mxu1 %v8003_v52 }
 0x215   :  { %2369 = vmatpush.bf16.msra.mxu3 %v6094_v50  ;;  %v2502_v48 = vunpack.c.l.bf16 %v2431_v57  ;;  %v2503_v35 = vunpack.c.h.bf16 %v2431_v57 }
 0x216   :  { %v1957_v28 = vpop.f32.mrf.mxu2  ;;  %v2006_v5 = vpop.f32.mrf.mxu3 }
 0x217   :  { %v1958_v19 = vadd.f32 %v1957_v28, %v1909_v29  ;;  %v2570_v6 = vadd.f32 %v8360_v31, %v2502_v48  ;;  %v2571_v15 = vadd.f32 %v8362_v49, %v2503_v35 }
 0x219   :  { %v2007_v43 = vadd.f32 %v2006_v5, %v1958_v19  ;;  %v1864_v37 = vpop.f32.mrf.mxu0  ;;  %v1913_v30 = vpop.f32.mrf.mxu1  ;;  %v2730_v50 = vmax.f32 %v2570_v6, 0.0  ;;  %v2731_v28 = vmax.f32 %v2571_v15, 0.0 }
 0x21a   :  { %v1914_v60 = vadd.f32 %v1913_v30, %v1864_v37 }
 0x21b   :  { %v2433_v7 = vpack.c.bf16 %v2007_v43, %v8277_v56  ;;  %2155 = vmatmul.bf16.gmra.mxu2 %v8012_v20  ;;  %2204 = vmatmul.bf16.gmra.mxu3 %v8014_v23 }
 0x21d   :  { %v2506_v12 = vunpack.c.l.bf16 %v2433_v7  ;;  %v2507_v55 = vunpack.c.h.bf16 %v2433_v7 }
 0x21e   :  { %v1960_v24 = vpop.f32.mrf.mxu2  ;;  %v2009_v29 = vpop.f32.mrf.mxu3 }
 0x21f   :  { %v2574_v53 = vadd.f32 %v8360_v31, %v2506_v12  ;;  %v2575_v34 = vadd.f32 %v8362_v49, %v2507_v55  ;;  %v1961_v57 = vadd.f32 %v1960_v24, %v1912_v61 }
 0x221   :  { %v2734_v56 = vmax.f32 %v2574_v53, 0.0  ;;  %v2735_v5 = vmax.f32 %v2575_v34, 0.0  ;;  %v2010_v19 = vadd.f32 %v2009_v29, %v1961_v57  ;;  %v1867_v43 = vpop.f32.mrf.mxu0  ;;  %v1916_v37 = vpop.f32.mrf.mxu1 }
 0x222   :  { %v1917_v30 = vadd.f32 %v1916_v37, %v1867_v43 }
 0x223   :  { %v2435_v48 = vpack.c.bf16 %v2010_v19, %v8293_v17  ;;  %v8574_v35 = vpack.c.bf16 %v2734_v56, %v2730_v50  ;;  %v8576_v7 = vpack.c.bf16 %v2735_v5, %v2731_v28 }
 0x224   :  { %2062 = vmatmul.bf16.gmra.mxu0 %v8043_v8  ;;  %2111 = vmatmul.bf16.gmra.mxu1 %v8045_v13 }
 0x225   :  { %v2510_v15 = vunpack.c.l.bf16 %v2435_v48  ;;  %v2511_v55 = vunpack.c.h.bf16 %v2435_v48 }
 0x226   :  { %v1962_v12 = vpop.f32.mrf.mxu2  ;;  %v2011_v61 = vpop.f32.mrf.mxu3 }
 0x227   :  { %v1963_v6 = vadd.f32 %v1962_v12, %v1914_v60  ;;  %v2578_v17 = vadd.f32 %v8360_v31, %v2510_v15  ;;  %v2579_v50 = vadd.f32 %v8362_v49, %v2511_v55 }
 0x229   :  { %v2012_v24 = vadd.f32 %v2011_v61, %v1963_v6  ;;  %v1869_v29 = vpop.f32.mrf.mxu0  ;;  %v1918_v53 = vpop.f32.mrf.mxu1  ;;  %v2738_v48 = vmax.f32 %v2578_v17, 0.0  ;;  %v2739_v12 = vmax.f32 %v2579_v50, 0.0  ;;  %v7109_v17 = vld [vmem:[%s10882_s5 + $0x2ec] sm:$0xf0] }
 0x22a   :  { %v1919_v34 = vadd.f32 %v1918_v53, %v1869_v29 }
 0x22b   :  { %v2437_v57 = vpack.c.bf16 %v2012_v24, %v8297_v47  ;;  %2160 = vmatmul.bf16.gmra.mxu2 %v8055_v40  ;;  %2209 = vmatmul.bf16.gmra.mxu3 %v8057_v41 }
 0x22d   :  { %v2514_v28 = vunpack.c.l.bf16 %v2437_v57  ;;  %v2515_v56 = vunpack.c.h.bf16 %v2437_v57 }
 0x22e   :  { %v1965_v5 = vpop.f32.mrf.mxu2  ;;  %v2014_v60 = vpop.f32.mrf.mxu3 }
 0x22f   :  { %v2582_v19 = vadd.f32 %v8360_v31, %v2514_v28  ;;  %v2583_v43 = vadd.f32 %v8362_v49, %v2515_v56  ;;  %v1966_v37 = vadd.f32 %v1965_v5, %v1917_v30  ;;  %v10935_v28 = vld [vmem:[#allocation2_spill] sm:$0xff]  ;;  %v6577_v30 = vld [vmem:[%s10882_s5 + $0x2e0] sm:$0xf] }
 0x230   :  { %v6578_v50 = vor.u32 %v7109_v17, %v6577_v30  ;;  %v10938_v30 = vld [vmem:[#allocation4_spill] sm:$0xff] }
 0x231   :  { %v2742_v47 = vmax.f32 %v2582_v19, 0.0  ;;  %v2743_v61 = vmax.f32 %v2583_v43, 0.0  ;;  %v2015_v6 = vadd.f32 %v2014_v60, %v1966_v37  ;;  %v2028_v24 = vpop.f32.mrf.mxu0  ;;  %v2077_v29 = vpop.f32.mrf.mxu1 }
 0x232   :  { %v2078_v53 = vadd.f32 %v2077_v29, %v2028_v24  ;;  %3662 = vmatpush.bf16.msrb.mxu2 %v6578_v50  ;;  %v6449_v24 = vld [vmem:[%s10882_s5 + $0x1e0] sm:$0xf]  ;;  %v10936_v29 = vld [vmem:[#allocation7_spill] sm:$0xff] }
 0x233   :  { %v2439_v15 = vpack.c.bf16 %v2015_v6, %v8313_v18  ;;  %v8588_v55 = vpack.c.bf16 %v2742_v47, %v2738_v48  ;;  %v8590_v57 = vpack.c.bf16 %v2743_v61, %v2739_v12  ;;  %v6321_v48 = vld [vmem:[%s10882_s5 + $0xe0] sm:$0xf]  ;;  %v7045_v12 = vld [vmem:[%s10882_s5 + $0xec] sm:$0xf0] }
 0x234   :  { %2223 = vmatmul.bf16.vlgmr.msra.gmra.mxu0 %v7730_v11  ;;  %2272 = vmatmul.bf16.vlgmr.msra.gmra.mxu1 %v10935_v28  ;;  %v6322_v61 = vor.u32 %v7045_v12, %v6321_v48  ;;  %v7141_v6 = vld [vmem:[%s10882_s5 + $0x3ec] sm:$0xf0] }
 0x235   :  { %10934 = vst [vmem:[#allocation8_spill] sm:$0xff] %v8590_v57  ;;  %v2518_v60 = vunpack.c.l.bf16 %v2439_v15  ;;  %v2519_v19 = vunpack.c.h.bf16 %v2439_v15  ;;  %v10937_v28 = vld [vmem:[#allocation3_spill] sm:$0xff] }
 0x236   :  { %v1967_v56 = vpop.f32.mrf.mxu2  ;;  %v2016_v5 = vpop.f32.mrf.mxu3  ;;  %v7077_v50 = vld [vmem:[%s10882_s5 + $0x1ec] sm:$0xf0]  ;;  %3564 = vmatpush.bf16.msrb.mxu0 %v6322_v61 }
 0x237   :  { %v1968_v18 = vadd.f32 %v1967_v56, %v1919_v34  ;;  %v6705_v34 = vld [vmem:[%s10882_s5 + $0x3e0] sm:$0xf]  ;;  %v2586_v56 = vadd.f32 %v8360_v31, %v2518_v60 }
 0x238   :  { %v6706_v17 = vor.u32 %v7141_v6, %v6705_v34 }
 0x239   :  { %v2017_v43 = vadd.f32 %v2016_v5, %v1968_v18  ;;  %v2030_v37 = vpop.f32.mrf.mxu0  ;;  %v2079_v11 = vpop.f32.mrf.mxu1  ;;  %v6450_v5 = vor.u32 %v7077_v50, %v6449_v24  ;;  %v2587_v18 = vadd.f32 %v8362_v49, %v2519_v19 }
 0x23a   :  { %v2080_v47 = vadd.f32 %v2079_v11, %v2030_v37  ;;  %3711 = vmatpush.bf16.msrb.mxu3 %v6706_v17 }
 0x23b   :  { %v2441_v15 = vpack.c.bf16 %v2017_v43, %v10936_v29  ;;  %2321 = vmatmul.bf16.vlgmr.msra.gmra.mxu2 %v10937_v28  ;;  %2370 = vmatmul.bf16.vlgmr.msra.gmra.mxu3 %v10938_v30  ;;  %v2746_v29 = vmax.f32 %v2586_v56, 0.0  ;;  %v2747_v28 = vmax.f32 %v2587_v18, 0.0 }
 0x23c   :  { %3613 = vmatpush.bf16.msrb.mxu1 %v6450_v5 }
 0x23d   :  { %v2522_v37 = vunpack.c.l.bf16 %v2441_v15  ;;  %v2523_v11 = vunpack.c.h.bf16 %v2441_v15 }
 0x23e   :  { %v2126_v48 = vpop.f32.mrf.mxu2  ;;  %v2175_v43 = vpop.f32.mrf.mxu3 }
 0x23f   :  { %v2590_v12 = vadd.f32 %v8360_v31, %v2522_v37  ;;  %v2591_v34 = vadd.f32 %v8362_v49, %v2523_v11  ;;  %v2127_v6 = vadd.f32 %v2126_v48, %v2078_v53  ;;  %v6561_v31 = vld [vmem:[%s10882_s5 + $0x2c0] sm:$0xf]  ;;  %v7105_v49 = vld [vmem:[%s10882_s5 + $0x2cc] sm:$0xf0] }
 0x240   :  { %v6562_v53 = vor.u32 %v7105_v49, %v6561_v31  ;;  %v6689_v11 = vld [vmem:[%s10882_s5 + $0x3c0] sm:$0xf] }
 0x241   :  { %v2750_v30 = vmax.f32 %v2590_v12, 0.0  ;;  %v2751_v57 = vmax.f32 %v2591_v34, 0.0  ;;  %v8625_v60 = vadd.f32 %v2175_v43, %v2127_v6  ;;  %v2033_v61 = vpop.f32.mrf.mxu0  ;;  %v2082_v24 = vpop.f32.mrf.mxu1  ;;  %v6433_v12 = vld [vmem:[%s10882_s5 + $0x1c0] sm:$0xf]  ;;  %v7073_v34 = vld [vmem:[%s10882_s5 + $0x1cc] sm:$0xf0] }
 0x242   :  { %v2083_v19 = vadd.f32 %v2082_v24, %v2033_v61  ;;  %3663 = vmatpush.bf16.msrb.mxu2 %v6562_v53  ;;  %v10939_v6 = vld [vmem:[#allocation5_spill] sm:$0xff] }
 0x243   :  { %v8627_v50 = vpack.c.bf16 %v2750_v30, %v2746_v29  ;;  %v8629_v15 = vpack.c.bf16 %v2751_v57, %v2747_v28  ;;  %v10940_v29 = vld [vmem:[#allocation6_spill] sm:$0xff]  ;;  %v6434_v30 = vor.u32 %v7073_v34, %v6433_v12  ;;  %v6673_v12 = vld [vmem:[%s10882_s5 + $0x3a0] sm:$0xf] }
 0x244   :  { %2228 = vmatmul.bf16.gmra.mxu0 %v7774_v3  ;;  %2277 = vmatmul.bf16.gmra.mxu1 %v7776_v4  ;;  %v6305_v3 = vld [vmem:[%s10882_s5 + $0xc0] sm:$0xf]  ;;  %v7041_v4 = vld [vmem:[%s10882_s5 + $0xcc] sm:$0xf0] }
 0x245   :  { %v6306_v43 = vor.u32 %v7041_v4, %v6305_v3  ;;  %3614 = vmatpush.bf16.msrb.mxu1 %v6434_v30 }
 0x246   :  { %v2128_v17 = vpop.f32.mrf.mxu2  ;;  %v2177_v56 = vpop.f32.mrf.mxu3 }
 0x247   :  { %v2129_v5 = vadd.f32 %v2128_v17, %v2080_v47  ;;  %v7137_v47 = vld [vmem:[%s10882_s5 + $0x3cc] sm:$0xf0]  ;;  %3565 = vmatpush.bf16.msrb.mxu0 %v6306_v43 }
 0x248   :  { %v6690_v28 = vor.u32 %v7137_v47, %v6689_v11 }
 0x249   :  { %v8639_v18 = vadd.f32 %v2177_v56, %v2129_v5  ;;  %v2035_v57 = vpop.f32.mrf.mxu0  ;;  %v2084_v37 = vpop.f32.mrf.mxu1  ;;  %v6545_v5 = vld [vmem:[%s10882_s5 + $0x2a0] sm:$0xf] }
 0x24a   :  { %v2085_v48 = vadd.f32 %v2084_v37, %v2035_v57  ;;  %3712 = vmatpush.bf16.msrb.mxu3 %v6690_v28  ;;  %v7101_v57 = vld [vmem:[%s10882_s5 + $0x2ac] sm:$0xf0] }
 0x24b   :  { %2326 = vmatmul.bf16.gmra.mxu2 %v10939_v6  ;;  %2375 = vmatmul.bf16.gmra.mxu3 %v10940_v29  ;;  %v6546_v37 = vor.u32 %v7101_v57, %v6545_v5  ;;  %v6417_v29 = vld [vmem:[%s10882_s5 + $0x1a0] sm:$0xf]  ;;  %v7069_v28 = vld [vmem:[%s10882_s5 + $0x1ac] sm:$0xf0] }
 0x24d   :  { %3664 = vmatpush.bf16.msrb.mxu2 %v6546_v37 }
 0x24e   :  { %v2131_v61 = vpop.f32.mrf.mxu2  ;;  %v2180_v24 = vpop.f32.mrf.mxu3 }
 0x24f   :  { %v2132_v31 = vadd.f32 %v2131_v61, %v2083_v19  ;;  %v6418_v61 = vor.u32 %v7069_v28, %v6417_v29  ;;  %v7065_v29 = vld [vmem:[%s10882_s5 + $0x18c] sm:$0xf0] }
 0x251   :  { %v8661_v49 = vadd.f32 %v2180_v24, %v2132_v31  ;;  %v2038_v53 = vpop.f32.mrf.mxu0  ;;  %v2087_v17 = vpop.f32.mrf.mxu1  ;;  %3615 = vmatpush.bf16.msrb.mxu1 %v6418_v61 }
 0x252   :  { %v2088_v56 = vadd.f32 %v2087_v17, %v2038_v53 }
 0x254   :  { %2233 = vmatmul.bf16.gmra.mxu0 %v7818_v63  ;;  %2282 = vmatmul.bf16.gmra.mxu1 %v7820_v0  ;;  %v6289_v63 = vld [vmem:[%s10882_s5 + $0xa0] sm:$0xf]  ;;  %v7037_v0 = vld [vmem:[%s10882_s5 + $0xac] sm:$0xf0] }
 0x255   :  { %v6290_v6 = vor.u32 %v7037_v0, %v6289_v63  ;;  %v6657_v0 = vld [vmem:[%s10882_s5 + $0x380] sm:$0xf] }
 0x256   :  { %v2133_v3 = vpop.f32.mrf.mxu2  ;;  %v2182_v19 = vpop.f32.mrf.mxu3 }
 0x257   :  { %v2134_v4 = vadd.f32 %v2133_v3, %v2085_v48  ;;  %v7133_v48 = vld [vmem:[%s10882_s5 + $0x3ac] sm:$0xf0]  ;;  %3566 = vmatpush.bf16.msrb.mxu0 %v6290_v6 }
 0x258   :  { %v6674_v30 = vor.u32 %v7133_v48, %v6673_v12  ;;  %v6401_v48 = vld [vmem:[%s10882_s5 + $0x180] sm:$0xf] }
 0x259   :  { %v8671_v11 = vadd.f32 %v2182_v19, %v2134_v4  ;;  %v2040_v43 = vpop.f32.mrf.mxu0  ;;  %v2089_v47 = vpop.f32.mrf.mxu1 }
 0x25a   :  { %v2090_v34 = vadd.f32 %v2089_v47, %v2040_v43  ;;  %3713 = vmatpush.bf16.msrb.mxu3 %v6674_v30  ;;  %v6402_v30 = vor.u32 %v7065_v29, %v6401_v48 }
 0x25b   :  { %2331 = vmatmul.bf16.gmra.mxu2 %v7835_v26  ;;  %2380 = vmatmul.bf16.gmra.mxu3 %v7837_v27  ;;  %v6529_v26 = vld [vmem:[%s10882_s5 + $0x280] sm:$0xf]  ;;  %v7097_v27 = vld [vmem:[%s10882_s5 + $0x28c] sm:$0xf0] }
 0x25c   :  { %v6530_v3 = vor.u32 %v7097_v27, %v6529_v26  ;;  %3616 = vmatpush.bf16.msrb.mxu1 %v6402_v30 }
 0x25e   :  { %v2136_v24 = vpop.f32.mrf.mxu2  ;;  %v2185_v31 = vpop.f32.mrf.mxu3  ;;  %3665 = vmatpush.bf16.msrb.mxu2 %v6530_v3 }
 0x25f   :  { %v2137_v53 = vadd.f32 %v2136_v24, %v2088_v56 }
 0x261   :  { %v8693_v17 = vadd.f32 %v2185_v31, %v2137_v53  ;;  %v2043_v5 = vpop.f32.mrf.mxu0  ;;  %v2092_v57 = vpop.f32.mrf.mxu1 }
 0x262   :  { %v2093_v37 = vadd.f32 %v2092_v57, %v2043_v5 }
 0x264   :  { %2238 = vmatmul.bf16.gmra.mxu0 %v7862_v1  ;;  %2287 = vmatmul.bf16.gmra.mxu1 %v7864_v2  ;;  %v6273_v1 = vld [vmem:[%s10882_s5 + $0x80] sm:$0xf]  ;;  %v7033_v2 = vld [vmem:[%s10882_s5 + $0x8c] sm:$0xf0] }
 0x265   :  { %v6274_v6 = vor.u32 %v7033_v2, %v6273_v1 }
 0x266   :  { %v2138_v19 = vpop.f32.mrf.mxu2  ;;  %v2187_v56 = vpop.f32.mrf.mxu3 }
 0x267   :  { %v2139_v4 = vadd.f32 %v2138_v19, %v2090_v34  ;;  %v7129_v34 = vld [vmem:[%s10882_s5 + $0x38c] sm:$0xf0]  ;;  %3567 = vmatpush.bf16.msrb.mxu0 %v6274_v6 }
 0x268   :  { %v6658_v28 = vor.u32 %v7129_v34, %v6657_v0  ;;  %v7125_v0 = vld [vmem:[%s10882_s5 + $0x36c] sm:$0xf0] }
 0x269   :  { %v8703_v43 = vadd.f32 %v2187_v56, %v2139_v4  ;;  %v2045_v47 = vpop.f32.mrf.mxu0  ;;  %v2094_v63 = vpop.f32.mrf.mxu1  ;;  %v7061_v6 = vld [vmem:[%s10882_s5 + $0x16c] sm:$0xf0] }
 0x26a   :  { %v2095_v12 = vadd.f32 %v2094_v63, %v2045_v47  ;;  %3714 = vmatpush.bf16.msrb.mxu3 %v6658_v28  ;;  %v6641_v63 = vld [vmem:[%s10882_s5 + $0x360] sm:$0xf] }
 0x26b   :  { %2336 = vmatmul.bf16.gmra.mxu2 %v7879_v32  ;;  %2385 = vmatmul.bf16.gmra.mxu3 %v7881_v33  ;;  %v6513_v32 = vld [vmem:[%s10882_s5 + $0x260] sm:$0xf]  ;;  %v7093_v33 = vld [vmem:[%s10882_s5 + $0x26c] sm:$0xf0]  ;;  %v6642_v34 = vor.u32 %v7125_v0, %v6641_v63 }
 0x26c   :  { %v6514_v27 = vor.u32 %v7093_v33, %v6513_v32  ;;  %v6369_v33 = vld [vmem:[%s10882_s5 + $0x140] sm:$0xf]  ;;  %v7021_v0 = vld [vmem:[%s10882_s5 + $0x2c] sm:$0xf0] }
 0x26e   :  { %v2141_v61 = vpop.f32.mrf.mxu2  ;;  %v2190_v24 = vpop.f32.mrf.mxu3  ;;  %3666 = vmatpush.bf16.msrb.mxu2 %v6514_v27  ;;  %3715 = vmatpush.bf16.msrb.mxu3 %v6642_v34 }
 0x26f   :  { %v2142_v31 = vadd.f32 %v2141_v61, %v2093_v37 }
 0x271   :  { %v8725_v53 = vadd.f32 %v2190_v24, %v2142_v31  ;;  %v2048_v5 = vpop.f32.mrf.mxu0  ;;  %v2097_v57 = vpop.f32.mrf.mxu1 }
 0x272   :  { %v2098_v26 = vadd.f32 %v2097_v57, %v2048_v5 }
 0x274   :  { %2243 = vmatmul.bf16.gmra.mxu0 %v7906_v9  ;;  %2292 = vmatmul.bf16.gmra.mxu1 %v7908_v10  ;;  %v6257_v9 = vld [vmem:[%s10882_s5 + $0x60] sm:$0xf]  ;;  %v7029_v10 = vld [vmem:[%s10882_s5 + $0x6c] sm:$0xf0] }
 0x275   :  { %v6258_v2 = vor.u32 %v7029_v10, %v6257_v9 }
 0x276   :  { %v2143_v3 = vpop.f32.mrf.mxu2  ;;  %v2192_v37 = vpop.f32.mrf.mxu3 }
 0x277   :  { %v2144_v19 = vadd.f32 %v2143_v3, %v2095_v12  ;;  %v6385_v12 = vld [vmem:[%s10882_s5 + $0x160] sm:$0xf]  ;;  %3568 = vmatpush.bf16.msrb.mxu0 %v6258_v2  ;;  %v7057_v3 = vld [vmem:[%s10882_s5 + $0x14c] sm:$0xf0] }
 0x278   :  { %v6386_v48 = vor.u32 %v7061_v6, %v6385_v12  ;;  %v6370_v9 = vor.u32 %v7057_v3, %v6369_v33  ;;  %v6225_v2 = vld [vmem:[%s10882_s5 + $0x20] sm:$0xf] }
 0x279   :  { %v8735_v56 = vadd.f32 %v2192_v37, %v2144_v19  ;;  %v2050_v4 = vpop.f32.mrf.mxu0  ;;  %v2099_v47 = vpop.f32.mrf.mxu1  ;;  %v6353_v12 = vld [vmem:[%s10882_s5 + $0x120] sm:$0xf]  ;;  %v6226_v6 = vor.u32 %v7021_v0, %v6225_v2 }
 0x27a   :  { %v8746_v1 = vadd.f32 %v2099_v47, %v2050_v4  ;;  %3617 = vmatpush.bf16.msrb.mxu1 %v6386_v48  ;;  %v6625_v4 = vld [vmem:[%s10882_s5 + $0x340] sm:$0xf]  ;;  %v7121_v47 = vld [vmem:[%s10882_s5 + $0x34c] sm:$0xf0] }
 0x27b   :  { %2341 = vmatmul.bf16.gmra.mxu2 %v7923_v44  ;;  %2390 = vmatmul.bf16.gmra.mxu3 %v7925_v45  ;;  %v6497_v44 = vld [vmem:[%s10882_s5 + $0x240] sm:$0xf]  ;;  %v7089_v45 = vld [vmem:[%s10882_s5 + $0x24c] sm:$0xf0]  ;;  %v6626_v63 = vor.u32 %v7121_v47, %v6625_v4 }
 0x27c   :  { %v6498_v57 = vor.u32 %v7089_v45, %v6497_v44  ;;  %v7049_v44 = vld [vmem:[%s10882_s5 + $0x10c] sm:$0xf0]  ;;  %v6481_v33 = vld [vmem:[%s10882_s5 + $0x220] sm:$0xf] }
 0x27d   :  { %3716 = vmatpush.bf16.msrb.mxu3 %v6626_v63 }
 0x27e   :  { %v2146_v29 = vpop.f32.mrf.mxu2  ;;  %v2195_v28 = vpop.f32.mrf.mxu3  ;;  %3667 = vmatpush.bf16.msrb.mxu2 %v6498_v57  ;;  %3618 = vmatpush.bf16.msrb.mxu1 %v6370_v9 }
 0x27f   :  { %v2147_v30 = vadd.f32 %v2146_v29, %v2098_v26 }
 0x281   :  { %v8759_v61 = vadd.f32 %v2195_v28, %v2147_v30  ;;  %v2053_v24 = vpop.f32.mrf.mxu0  ;;  %v2102_v31 = vpop.f32.mrf.mxu1  ;;  %v6209_v28 = vld [vmem:[%s10882_s5] sm:$0xf]  ;;  %v7017_v30 = vld [vmem:[%s10882_s5 + $0xc] sm:$0xf0] }
 0x282   :  { %v2103_v5 = vadd.f32 %v2102_v31, %v2053_v24  ;;  %v6337_v24 = vld [vmem:[%s10882_s5 + $0x100] sm:$0xf]  ;;  %v6210_v31 = vor.u32 %v7017_v30, %v6209_v28  ;;  %v7081_v30 = vld [vmem:[%s10882_s5 + $0x20c] sm:$0xf0] }
 0x284   :  { %2248 = vmatmul.bf16.gmra.mxu0 %v7950_v21  ;;  %2297 = vmatmul.bf16.gmra.mxu1 %v7952_v22  ;;  %v6241_v21 = vld [vmem:[%s10882_s5 + $0x40] sm:$0xf]  ;;  %v7025_v22 = vld [vmem:[%s10882_s5 + $0x4c] sm:$0xf0] }
 0x285   :  { %v6242_v27 = vor.u32 %v7025_v22, %v6241_v21  ;;  %v6338_v21 = vor.u32 %v7049_v44, %v6337_v24 }
 0x286   :  { %v8769_v32 = vpop.f32.mrf.mxu2  ;;  %v8771_v26 = vpop.f32.mrf.mxu3 }
 0x287   :  { %3569 = vmatpush.bf16.msrb.mxu0 %v6242_v27  ;;  %v7085_v27 = vld [vmem:[%s10882_s5 + $0x22c] sm:$0xf0] }
 0x288   :  { %v6482_v3 = vor.u32 %v7085_v27, %v6481_v33 }
 0x289   :  { %v2055_v37 = vpop.f32.mrf.mxu0  ;;  %v2104_v19 = vpop.f32.mrf.mxu1 }
 0x28a   :  { %v8791_v10 = vadd.f32 %v2104_v19, %v2055_v37  ;;  %3668 = vmatpush.bf16.msrb.mxu2 %v6482_v3 }
 0x28b   :  { %2346 = vmatmul.bf16.gmra.mxu2 %v7968_v58  ;;  %2395 = vmatmul.bf16.gmra.mxu3 %v7970_v59  ;;  %v7053_v58 = vld [vmem:[%s10882_s5 + $0x12c] sm:$0xf0] }
 0x28c   :  { %v6354_v59 = vor.u32 %v7053_v58, %v6353_v12  ;;  %3570 = vmatpush.bf16.msrb.mxu0 %v6226_v6 }
 0x28e   :  { %v2151_v34 = vpop.f32.mrf.mxu2  ;;  %v2200_v48 = vpop.f32.mrf.mxu3  ;;  %3619 = vmatpush.bf16.msrb.mxu1 %v6354_v59 }
 0x28f   :  { %v2152_v29 = vadd.f32 %v2151_v34, %v2103_v5 }
 0x290   :  { %3571 = vmatpush.bf16.msrb.mxu0 %v6210_v31 }
 0x291   :  { %v8819_v45 = vadd.f32 %v2200_v48, %v2152_v29  ;;  %v2058_v5 = vpop.f32.mrf.mxu0  ;;  %v2107_v57 = vpop.f32.mrf.mxu1 }
 0x292   :  { %v2108_v22 = vadd.f32 %v2107_v57, %v2058_v5  ;;  %3620 = vmatpush.bf16.msrb.mxu1 %v6338_v21  ;;  %v6593_v5 = vld [vmem:[%s10882_s5 + $0x300] sm:$0xf]  ;;  %v7113_v57 = vld [vmem:[%s10882_s5 + $0x30c] sm:$0xf0] }
 0x293   :  { %v6594_v21 = vor.u32 %v7113_v57, %v6593_v5  ;;  %v6707_v5 = vld [vmem:[%s10882_s5 + $0x3f0] sm:$0xf0]  ;;  %v7075_v57 = vld [vmem:[%s10882_s5 + $0x1e4] sm:$0xf] }
 0x294   :  { %2253 = vmatmul.bf16.gmra.mxu0 %v8001_v51  ;;  %2302 = vmatmul.bf16.gmra.mxu1 %v8003_v52  ;;  %v6609_v51 = vld [vmem:[%s10882_s5 + $0x320] sm:$0xf]  ;;  %v7117_v52 = vld [vmem:[%s10882_s5 + $0x32c] sm:$0xf0] }
 0x295   :  { %v6610_v63 = vor.u32 %v7117_v52, %v6609_v51  ;;  %v6579_v51 = vld [vmem:[%s10882_s5 + $0x2f0] sm:$0xf0] }
 0x296   :  { %v8829_v37 = vpop.f32.mrf.mxu2  ;;  %v8831_v19 = vpop.f32.mrf.mxu3 }
 0x297   :  { %3717 = vmatpush.bf16.msrb.mxu3 %v6610_v63 }
 0x299   :  { %v2060_v4 = vpop.f32.mrf.mxu0  ;;  %v2109_v47 = vpop.f32.mrf.mxu1 }
 0x29a   :  { %v8839_v9 = vadd.f32 %v2109_v47, %v2060_v4  ;;  %v7107_v47 = vld [vmem:[%s10882_s5 + $0x2e4] sm:$0xf] }
 0x29b   :  { %2351 = vmatmul.bf16.gmra.mxu2 %v8012_v20  ;;  %2400 = vmatmul.bf16.gmra.mxu3 %v8014_v23  ;;  %v6465_v23 = vld [vmem:[%s10882_s5 + $0x200] sm:$0xf]  ;;  %v6582_v52 = vor.u32 %v7107_v47, %v6579_v51 }
 0x29c   :  { %v6466_v31 = vor.u32 %v7081_v30, %v6465_v23  ;;  %3718 = vmatpush.bf16.msrb.mxu3 %v6594_v21  ;;  %v6451_v21 = vld [vmem:[%s10882_s5 + $0x1f0] sm:$0xf0] }
 0x29e   :  { %v2156_v2 = vpop.f32.mrf.mxu2  ;;  %v2205_v0 = vpop.f32.mrf.mxu3  ;;  %3669 = vmatpush.bf16.msrb.mxu2 %v6466_v31  ;;  %v7043_v31 = vld [vmem:[%s10882_s5 + $0xe4] sm:$0xf] }
 0x29f   :  { %v2157_v12 = vadd.f32 %v2156_v2, %v2108_v22  ;;  %v2448_v2 = vld [vmem:[#allocation1 + $0x12] sm:$0xff] }
 0x2a1   :  { %v8843_v6 = vadd.f32 %v2205_v0, %v2157_v12  ;;  %v2063_v58 = vpop.f32.mrf.mxu0  ;;  %v2112_v59 = vpop.f32.mrf.mxu1  ;;  %v2449_v0 = vld [vmem:[#allocation1 + $0x1b] sm:$0xff] }
 0x2a2   :  { %v2113_v34 = vadd.f32 %v2112_v59, %v2063_v58  ;;  %3858 = vmatpush.bf16.msra.mxu2 %v6582_v52 }
 0x2a4   :  { %2258 = vmatmul.bf16.gmra.mxu0 %v8043_v8  ;;  %2307 = vmatmul.bf16.gmra.mxu1 %v8045_v13 }
 0x2a6   :  { %v8847_v48 = vpop.f32.mrf.mxu2  ;;  %v8849_v29 = vpop.f32.mrf.mxu3 }
 0x2a9   :  { %v2065_v20 = vpop.f32.mrf.mxu0  ;;  %v2114_v28 = vpop.f32.mrf.mxu1 }
 0x2aa   :  { %v8857_v24 = vadd.f32 %v2114_v28, %v2065_v20  ;;  %v2459_v20 = vpack.i.b16 %v2449_v0, %v2449_v0 }
 0x2ab   :  { %2356 = vmatmul.bf16.gmra.mxu2 %v8055_v40  ;;  %2405 = vmatmul.bf16.gmra.mxu3 %v8057_v41 }
 0x2ac   :  { %v2461_v52 = vperm.slane %v2459_v20, 0 }
 0x2ae   :  { %v2161_v8 = vpop.f32.mrf.mxu2  ;;  %v2210_v13 = vpop.f32.mrf.mxu3 }
 0x2af   :  { %v2162_v44 = vadd.f32 %v2161_v8, %v2113_v34  ;;  %v2456_v34 = vpack.i.b16 %v2448_v2, %v2448_v2  ;;  %v6323_v8 = vld [vmem:[%s10882_s5 + $0xf0] sm:$0xf0] }
 0x2b1   :  { %v8867_v22 = vadd.f32 %v2210_v13, %v2162_v44  ;;  %v2224_v33 = vpop.f32.mrf.mxu0  ;;  %v2273_v27 = vpop.f32.mrf.mxu1  ;;  %v7139_v13 = vld [vmem:[%s10882_s5 + $0x3e4] sm:$0xf]  ;;  %v6326_v44 = vor.u32 %v7043_v31, %v6323_v8  ;;  %v2458_v51 = vperm.slane %v2456_v34, 0  ;;  %v8904_v8 = vunpack.c.l.bf16 %v2461_v52 }
 0x2b2   :  { %v2274_v63 = vadd.f32 %v2273_v27, %v2224_v33  ;;  %v6710_v33 = vor.u32 %v7139_v13, %v6707_v5  ;;  %v6454_v27 = vor.u32 %v7075_v57, %v6451_v21 }
 0x2b3   :  { %3760 = vmatpush.bf16.msra.mxu0 %v6326_v44  ;;  %v8902_v31 = vunpack.c.l.bf16 %v2458_v51 }
 0x2b4   :  { %3572 = vmatmul.bf16.vlgmr.msrb.gmra.mxu0 %v8395_v54  ;;  %3621 = vmatmul.bf16.vlgmr.msrb.gmra.mxu1 %v8397_v62 }
 0x2b5   :  { %3907 = vmatpush.bf16.msra.mxu3 %v6710_v33  ;;  %3809 = vmatpush.bf16.msra.mxu1 %v6454_v27 }
 0x2b6   :  { %v8871_v40 = vpop.f32.mrf.mxu2  ;;  %v8873_v41 = vpop.f32.mrf.mxu3 }
 0x2b9   :  { %v2226_v3 = vpop.f32.mrf.mxu0  ;;  %v2275_v4 = vpop.f32.mrf.mxu1 }
 0x2be   :  { %v2322_v12 = vpop.f32.mrf.mxu2  ;;  %v2371_v58 = vpop.f32.mrf.mxu3 }
 0x2bf   :  { %v2323_v59 = vadd.f32 %v2322_v12, %v2274_v63  ;;  %v2276_v63 = vadd.f32 %v2275_v4, %v2226_v3  ;;  %v6563_v3 = vld [vmem:[%s10882_s5 + $0x2d0] sm:$0xf0] }
 0x2c1   :  { %v2372_v28 = vadd.f32 %v2371_v58, %v2323_v59  ;;  %v2229_v23 = vpop.f32.mrf.mxu0  ;;  %v2278_v30 = vpop.f32.mrf.mxu1 }
 0x2c2   :  { %v2279_v57 = vadd.f32 %v2278_v30, %v2229_v23  ;;  %v7039_v23 = vld [vmem:[%s10882_s5 + $0xc4] sm:$0xf]  ;;  %v6307_v30 = vld [vmem:[%s10882_s5 + $0xd0] sm:$0xf0] }
 0x2c3   :  { %v2412_v47 = vpack.c.bf16 %v2372_v28, %v8625_v60  ;;  %v7103_v28 = vld [vmem:[%s10882_s5 + $0x2c4] sm:$0xf] }
 0x2c4   :  { %3577 = vmatmul.bf16.gmra.mxu0 %v8434_v38  ;;  %3626 = vmatmul.bf16.gmra.mxu1 %v8436_v25  ;;  %v6566_v4 = vor.u32 %v7103_v28, %v6563_v3  ;;  %v7135_v3 = vld [vmem:[%s10882_s5 + $0x3c4] sm:$0xf] }
 0x2c5   :  { %v2464_v58 = vunpack.c.l.bf16 %v2412_v47  ;;  %v2465_v59 = vunpack.c.h.bf16 %v2412_v47 }
 0x2c6   :  { %v2324_v2 = vpop.f32.mrf.mxu2  ;;  %v2373_v0 = vpop.f32.mrf.mxu3  ;;  %3859 = vmatpush.bf16.msra.mxu2 %v6566_v4  ;;  %v6691_v4 = vld [vmem:[%s10882_s5 + $0x3d0] sm:$0xf0] }
 0x2c7   :  { %v2325_v12 = vadd.f32 %v2324_v2, %v2276_v63  ;;  %v2532_v44 = vadd.f32 %v8902_v31, %v2464_v58  ;;  %v2533_v5 = vadd.f32 %v8904_v8, %v2465_v59  ;;  %v6310_v59 = vor.u32 %v7039_v23, %v6307_v30 }
 0x2c9   :  { %v2374_v60 = vadd.f32 %v2373_v0, %v2325_v12  ;;  %v2231_v34 = vpop.f32.mrf.mxu0  ;;  %v2280_v20 = vpop.f32.mrf.mxu1  ;;  %v2692_v2 = vmax.f32 %v2532_v44, 0.0  ;;  %v2693_v0 = vmax.f32 %v2533_v5, 0.0  ;;  %3761 = vmatpush.bf16.msra.mxu0 %v6310_v59 }
 0x2cb   :  { %v2414_v13 = vpack.c.bf16 %v2374_v60, %v8639_v18 }
 0x2cd   :  { %v2468_v21 = vunpack.c.l.bf16 %v2414_v13  ;;  %v2469_v33 = vunpack.c.h.bf16 %v2414_v13  ;;  %v7071_v13 = vld [vmem:[%s10882_s5 + $0x1c4] sm:$0xf] }
 0x2ce   :  { %v2327_v27 = vpop.f32.mrf.mxu2  ;;  %v2376_v47 = vpop.f32.mrf.mxu3 }
 0x2cf   :  { %v2536_v51 = vadd.f32 %v8902_v31, %v2468_v21  ;;  %v2537_v52 = vadd.f32 %v8904_v8, %v2469_v33  ;;  %v2328_v63 = vadd.f32 %v2327_v27, %v2279_v57  ;;  %v6694_v57 = vor.u32 %v7135_v3, %v6691_v4  ;;  %v6435_v21 = vld [vmem:[%s10882_s5 + $0x1d0] sm:$0xf0] }
 0x2d0   :  { %v6438_v27 = vor.u32 %v7071_v13, %v6435_v21 }
 0x2d1   :  { %v2696_v12 = vmax.f32 %v2536_v51, 0.0  ;;  %v2697_v28 = vmax.f32 %v2537_v52, 0.0  ;;  %v2377_v18 = vadd.f32 %v2376_v47, %v2328_v63  ;;  %v2234_v60 = vpop.f32.mrf.mxu0  ;;  %v2283_v58 = vpop.f32.mrf.mxu1  ;;  %v2281_v47 = vadd.f32 %v2280_v20, %v2231_v34  ;;  %3908 = vmatpush.bf16.msra.mxu3 %v6694_v57  ;;  %v6547_v34 = vld [vmem:[%s10882_s5 + $0x2b0] sm:$0xf0] }
 0x2d2   :  { %3810 = vmatpush.bf16.msra.mxu1 %v6438_v27  ;;  %v2284_v3 = vadd.f32 %v2283_v58, %v2234_v60  ;;  %v7035_v60 = vld [vmem:[%s10882_s5 + $0xa4] sm:$0xf]  ;;  %v6291_v58 = vld [vmem:[%s10882_s5 + $0xb0] sm:$0xf0] }
 0x2d3   :  { %v8932_v44 = vpack.c.bf16 %v2696_v12, %v2692_v2  ;;  %v8934_v5 = vpack.c.bf16 %v2697_v28, %v2693_v0  ;;  %v2416_v33 = vpack.c.bf16 %v2377_v18, %v8661_v49  ;;  %v7099_v18 = vld [vmem:[%s10882_s5 + $0x2a4] sm:$0xf] }
 0x2d4   :  { %3582 = vmatmul.bf16.gmra.mxu0 %v8472_v46  ;;  %3631 = vmatmul.bf16.gmra.mxu1 %v8474_v16  ;;  %v6550_v20 = vor.u32 %v7099_v18, %v6547_v34  ;;  %v7131_v34 = vld [vmem:[%s10882_s5 + $0x3a4] sm:$0xf] }
 0x2d5   :  { %3670 = vmatmul.bf16.vlgmr.msrb.gmra.mxu2 %v8932_v44  ;;  %3719 = vmatmul.bf16.vlgmr.msrb.gmra.mxu3 %v8934_v5  ;;  %v2472_v2 = vunpack.c.l.bf16 %v2416_v33  ;;  %v2473_v0 = vunpack.c.h.bf16 %v2416_v33 }
 0x2d6   :  { %v2329_v51 = vpop.f32.mrf.mxu2  ;;  %v2378_v52 = vpop.f32.mrf.mxu3  ;;  %3860 = vmatpush.bf16.msra.mxu2 %v6550_v20  ;;  %v6675_v20 = vld [vmem:[%s10882_s5 + $0x3b0] sm:$0xf0] }
 0x2d7   :  { %v2330_v63 = vadd.f32 %v2329_v51, %v2281_v47  ;;  %v2540_v30 = vadd.f32 %v8902_v31, %v2472_v2  ;;  %v2541_v59 = vadd.f32 %v8904_v8, %v2473_v0  ;;  %v6294_v0 = vor.u32 %v7035_v60, %v6291_v58 }
 0x2d9   :  { %v2379_v12 = vadd.f32 %v2378_v52, %v2330_v63  ;;  %v2236_v49 = vpop.f32.mrf.mxu0  ;;  %v2285_v28 = vpop.f32.mrf.mxu1  ;;  %v2700_v51 = vmax.f32 %v2540_v30, 0.0  ;;  %v2701_v52 = vmax.f32 %v2541_v59, 0.0  ;;  %3762 = vmatpush.bf16.msra.mxu0 %v6294_v0 }
 0x2db   :  { %v2418_v23 = vpack.c.bf16 %v2379_v12, %v8671_v11 }
 0x2dd   :  { %v2476_v4 = vunpack.c.l.bf16 %v2418_v23  ;;  %v2477_v13 = vunpack.c.h.bf16 %v2418_v23  ;;  %v7067_v23 = vld [vmem:[%s10882_s5 + $0x1a4] sm:$0xf] }
 0x2de   :  { %v2332_v57 = vpop.f32.mrf.mxu2  ;;  %v2381_v21 = vpop.f32.mrf.mxu3 }
 0x2df   :  { %v2544_v33 = vadd.f32 %v8902_v31, %v2476_v4  ;;  %v2545_v27 = vadd.f32 %v8904_v8, %v2477_v13  ;;  %v2333_v47 = vadd.f32 %v2332_v57, %v2284_v3  ;;  %v6678_v3 = vor.u32 %v7131_v34, %v6675_v20  ;;  %v6419_v4 = vld [vmem:[%s10882_s5 + $0x1b0] sm:$0xf0] }
 0x2e0   :  { %v6422_v57 = vor.u32 %v7067_v23, %v6419_v4 }
 0x2e1   :  { %v2704_v63 = vmax.f32 %v2544_v33, 0.0  ;;  %v2705_v18 = vmax.f32 %v2545_v27, 0.0  ;;  %v2382_v11 = vadd.f32 %v2381_v21, %v2333_v47  ;;  %v2239_v12 = vpop.f32.mrf.mxu0  ;;  %v2288_v2 = vpop.f32.mrf.mxu1  ;;  %v2286_v21 = vadd.f32 %v2285_v28, %v2236_v49  ;;  %3909 = vmatpush.bf16.msra.mxu3 %v6678_v3  ;;  %v6531_v49 = vld [vmem:[%s10882_s5 + $0x290] sm:$0xf0] }
 0x2e2   :  { %3811 = vmatpush.bf16.msra.mxu1 %v6422_v57  ;;  %v2289_v34 = vadd.f32 %v2288_v2, %v2239_v12  ;;  %v7031_v12 = vld [vmem:[%s10882_s5 + $0x84] sm:$0xf]  ;;  %v6275_v2 = vld [vmem:[%s10882_s5 + $0x90] sm:$0xf0] }
 0x2e3   :  { %v8970_v30 = vpack.c.bf16 %v2704_v63, %v2700_v51  ;;  %v8972_v59 = vpack.c.bf16 %v2705_v18, %v2701_v52  ;;  %v2420_v13 = vpack.c.bf16 %v2382_v11, %v8693_v17  ;;  %v7095_v11 = vld [vmem:[%s10882_s5 + $0x284] sm:$0xf] }
 0x2e4   :  { %3587 = vmatmul.bf16.gmra.mxu0 %v8510_v36  ;;  %3636 = vmatmul.bf16.gmra.mxu1 %v8512_v14  ;;  %v6534_v28 = vor.u32 %v7095_v11, %v6531_v49  ;;  %v7127_v49 = vld [vmem:[%s10882_s5 + $0x384] sm:$0xf] }
 0x2e5   :  { %3675 = vmatmul.bf16.gmra.mxu2 %v8970_v30  ;;  %3724 = vmatmul.bf16.gmra.mxu3 %v8972_v59  ;;  %v2480_v51 = vunpack.c.l.bf16 %v2420_v13  ;;  %v2481_v52 = vunpack.c.h.bf16 %v2420_v13 }
 0x2e6   :  { %v2334_v33 = vpop.f32.mrf.mxu2  ;;  %v2383_v27 = vpop.f32.mrf.mxu3  ;;  %3861 = vmatpush.bf16.msra.mxu2 %v6534_v28  ;;  %v6659_v28 = vld [vmem:[%s10882_s5 + $0x390] sm:$0xf0] }
 0x2e7   :  { %v2335_v47 = vadd.f32 %v2334_v33, %v2286_v21  ;;  %v2548_v58 = vadd.f32 %v8902_v31, %v2480_v51  ;;  %v2549_v0 = vadd.f32 %v8904_v8, %v2481_v52  ;;  %v6278_v52 = vor.u32 %v7031_v12, %v6275_v2 }
 0x2e9   :  { %v2384_v63 = vadd.f32 %v2383_v27, %v2335_v47  ;;  %v2241_v17 = vpop.f32.mrf.mxu0  ;;  %v2290_v18 = vpop.f32.mrf.mxu1  ;;  %v2708_v33 = vmax.f32 %v2548_v58, 0.0  ;;  %v2709_v27 = vmax.f32 %v2549_v0, 0.0  ;;  %3763 = vmatpush.bf16.msra.mxu0 %v6278_v52 }
 0x2eb   :  { %v2422_v60 = vpack.c.bf16 %v2384_v63, %v8703_v43 }
 0x2ed   :  { %v2484_v20 = vunpack.c.l.bf16 %v2422_v60  ;;  %v2485_v23 = vunpack.c.h.bf16 %v2422_v60  ;;  %v7063_v60 = vld [vmem:[%s10882_s5 + $0x184] sm:$0xf] }
 0x2ee   :  { %v2337_v3 = vpop.f32.mrf.mxu2  ;;  %v2386_v4 = vpop.f32.mrf.mxu3 }
 0x2ef   :  { %v2552_v13 = vadd.f32 %v8902_v31, %v2484_v20  ;;  %v2553_v57 = vadd.f32 %v8904_v8, %v2485_v23  ;;  %v2338_v21 = vadd.f32 %v2337_v3, %v2289_v34  ;;  %v6662_v34 = vor.u32 %v7127_v49, %v6659_v28  ;;  %v6403_v20 = vld [vmem:[%s10882_s5 + $0x190] sm:$0xf0] }
 0x2f0   :  { %v6406_v3 = vor.u32 %v7063_v60, %v6403_v20 }
 0x2f1   :  { %v2712_v47 = vmax.f32 %v2552_v13, 0.0  ;;  %v2713_v11 = vmax.f32 %v2553_v57, 0.0  ;;  %v2387_v43 = vadd.f32 %v2386_v4, %v2338_v21  ;;  %v2244_v63 = vpop.f32.mrf.mxu0  ;;  %v2293_v51 = vpop.f32.mrf.mxu1  ;;  %v2291_v4 = vadd.f32 %v2290_v18, %v2241_v17  ;;  %3910 = vmatpush.bf16.msra.mxu3 %v6662_v34  ;;  %v6515_v17 = vld [vmem:[%s10882_s5 + $0x270] sm:$0xf0] }
 0x2f2   :  { %3812 = vmatpush.bf16.msra.mxu1 %v6406_v3  ;;  %v2294_v49 = vadd.f32 %v2293_v51, %v2244_v63  ;;  %v7027_v63 = vld [vmem:[%s10882_s5 + $0x64] sm:$0xf]  ;;  %v6259_v51 = vld [vmem:[%s10882_s5 + $0x70] sm:$0xf0] }
 0x2f3   :  { %v9008_v58 = vpack.c.bf16 %v2712_v47, %v2708_v33  ;;  %v9010_v0 = vpack.c.bf16 %v2713_v11, %v2709_v27  ;;  %v2424_v23 = vpack.c.bf16 %v2387_v43, %v8725_v53  ;;  %v7091_v43 = vld [vmem:[%s10882_s5 + $0x264] sm:$0xf] }
 0x2f4   :  { %3592 = vmatmul.bf16.gmra.mxu0 %v8560_v42  ;;  %3641 = vmatmul.bf16.gmra.mxu1 %v8562_v39  ;;  %v6518_v18 = vor.u32 %v7091_v43, %v6515_v17  ;;  %v7123_v17 = vld [vmem:[%s10882_s5 + $0x364] sm:$0xf] }
 0x2f5   :  { %3680 = vmatmul.bf16.gmra.mxu2 %v9008_v58  ;;  %3729 = vmatmul.bf16.gmra.mxu3 %v9010_v0  ;;  %v2488_v33 = vunpack.c.l.bf16 %v2424_v23  ;;  %v2489_v27 = vunpack.c.h.bf16 %v2424_v23 }
 0x2f6   :  { %v2339_v13 = vpop.f32.mrf.mxu2  ;;  %v2388_v57 = vpop.f32.mrf.mxu3  ;;  %3862 = vmatpush.bf16.msra.mxu2 %v6518_v18  ;;  %v6643_v18 = vld [vmem:[%s10882_s5 + $0x370] sm:$0xf0] }
 0x2f7   :  { %v2340_v21 = vadd.f32 %v2339_v13, %v2291_v4  ;;  %v2556_v2 = vadd.f32 %v8902_v31, %v2488_v33  ;;  %v2557_v52 = vadd.f32 %v8904_v8, %v2489_v27  ;;  %v6262_v27 = vor.u32 %v7027_v63, %v6259_v51 }
 0x2f9   :  { %v2389_v47 = vadd.f32 %v2388_v57, %v2340_v21  ;;  %v2246_v53 = vpop.f32.mrf.mxu0  ;;  %v2295_v11 = vpop.f32.mrf.mxu1  ;;  %v2716_v13 = vmax.f32 %v2556_v2, 0.0  ;;  %v2717_v57 = vmax.f32 %v2557_v52, 0.0  ;;  %3764 = vmatpush.bf16.msra.mxu0 %v6262_v27  ;;  %v7087_v27 = vld [vmem:[%s10882_s5 + $0x244] sm:$0xf] }
 0x2fb   :  { %v2426_v12 = vpack.c.bf16 %v2389_v47, %v8735_v56 }
 0x2fd   :  { %v2492_v28 = vunpack.c.l.bf16 %v2426_v12  ;;  %v2493_v60 = vunpack.c.h.bf16 %v2426_v12  ;;  %v7059_v12 = vld [vmem:[%s10882_s5 + $0x164] sm:$0xf] }
 0x2fe   :  { %v2342_v34 = vpop.f32.mrf.mxu2  ;;  %v2391_v20 = vpop.f32.mrf.mxu3 }
 0x2ff   :  { %v2560_v23 = vadd.f32 %v8902_v31, %v2492_v28  ;;  %v2561_v3 = vadd.f32 %v8904_v8, %v2493_v60  ;;  %v2343_v4 = vadd.f32 %v2342_v34, %v2294_v49  ;;  %v6646_v49 = vor.u32 %v7123_v17, %v6643_v18  ;;  %v6387_v28 = vld [vmem:[%s10882_s5 + $0x170] sm:$0xf0] }
 0x300   :  { %v6390_v34 = vor.u32 %v7059_v12, %v6387_v28  ;;  %v6499_v17 = vld [vmem:[%s10882_s5 + $0x250] sm:$0xf0] }
 0x301   :  { %v2720_v21 = vmax.f32 %v2560_v23, 0.0  ;;  %v2721_v43 = vmax.f32 %v2561_v3, 0.0  ;;  %v2392_v56 = vadd.f32 %v2391_v20, %v2343_v4  ;;  %v2249_v47 = vpop.f32.mrf.mxu0  ;;  %v2298_v33 = vpop.f32.mrf.mxu1  ;;  %v2149_v20 = vadd.f32 %v8769_v32, %v8746_v1  ;;  %3911 = vmatpush.bf16.msra.mxu3 %v6646_v49  ;;  %v7055_v1 = vld [vmem:[%s10882_s5 + $0x144] sm:$0xf]  ;;  %v6227_v28 = vld [vmem:[%s10882_s5 + $0x30] sm:$0xf0] }
 0x302   :  { %v2296_v23 = vadd.f32 %v2295_v11, %v2246_v53  ;;  %3813 = vmatpush.bf16.msra.mxu1 %v6390_v34  ;;  %v6502_v12 = vor.u32 %v7087_v27, %v6499_v17 }
 0x303   :  { %v9046_v2 = vpack.c.bf16 %v2720_v21, %v2716_v13  ;;  %v9048_v52 = vpack.c.bf16 %v2721_v43, %v2717_v57  ;;  %v2428_v60 = vpack.c.bf16 %v2392_v56, %v8759_v61  ;;  %v7023_v61 = vld [vmem:[%s10882_s5 + $0x44] sm:$0xf]  ;;  %v6243_v57 = vld [vmem:[%s10882_s5 + $0x50] sm:$0xf0]  ;;  %v2198_v43 = vadd.f32 %v8771_v26, %v2149_v20 }
 0x304   :  { %3597 = vmatmul.bf16.gmra.mxu0 %v8574_v35  ;;  %3646 = vmatmul.bf16.gmra.mxu1 %v8576_v7  ;;  %v6246_v11 = vor.u32 %v7023_v61, %v6243_v57  ;;  %v6371_v21 = vld [vmem:[%s10882_s5 + $0x150] sm:$0xf0]  ;;  %v7019_v26 = vld [vmem:[%s10882_s5 + $0x24] sm:$0xf] }
 0x305   :  { %3685 = vmatmul.bf16.gmra.mxu2 %v9046_v2  ;;  %3734 = vmatmul.bf16.gmra.mxu3 %v9048_v52  ;;  %v2496_v32 = vunpack.c.l.bf16 %v2428_v60  ;;  %v2497_v53 = vunpack.c.h.bf16 %v2428_v60  ;;  %v6374_v18 = vor.u32 %v7055_v1, %v6371_v21  ;;  %v7051_v60 = vld [vmem:[%s10882_s5 + $0x124] sm:$0xf] }
 0x306   :  { %v2344_v3 = vpop.f32.mrf.mxu2  ;;  %v2393_v4 = vpop.f32.mrf.mxu3  ;;  %3765 = vmatpush.bf16.msra.mxu0 %v6246_v11  ;;  %3863 = vmatpush.bf16.msra.mxu2 %v6502_v12 }
 0x307   :  { %v2345_v13 = vadd.f32 %v2344_v3, %v2296_v23  ;;  %3814 = vmatpush.bf16.msra.mxu1 %v6374_v18  ;;  %v2564_v34 = vadd.f32 %v8902_v31, %v2496_v32  ;;  %v2565_v20 = vadd.f32 %v8904_v8, %v2497_v53  ;;  %v6230_v23 = vor.u32 %v7019_v26, %v6227_v28  ;;  %v6355_v3 = vld [vmem:[%s10882_s5 + $0x130] sm:$0xf0]  ;;  %v7015_v53 = vld [vmem:[%s10882_s5 + $0x4] sm:$0xf] }
 0x308   :  { %v6358_v57 = vor.u32 %v7051_v60, %v6355_v3  ;;  %v6339_v18 = vld [vmem:[%s10882_s5 + $0x110] sm:$0xf0] }
 0x309   :  { %v2394_v56 = vadd.f32 %v2393_v4, %v2345_v13  ;;  %v2251_v63 = vpop.f32.mrf.mxu0  ;;  %v2300_v51 = vpop.f32.mrf.mxu1  ;;  %v2299_v4 = vadd.f32 %v2298_v33, %v2249_v47  ;;  %v6211_v47 = vld [vmem:[%s10882_s5 + $0x10] sm:$0xf0]  ;;  %v7047_v33 = vld [vmem:[%s10882_s5 + $0x104] sm:$0xf]  ;;  %v2725_v27 = vmax.f32 %v2565_v20, 0.0 }
 0x30a   :  { %3766 = vmatpush.bf16.msra.mxu0 %v6230_v23  ;;  %v6214_v17 = vor.u32 %v7015_v53, %v6211_v47  ;;  %v7119_v23 = vld [vmem:[%s10882_s5 + $0x344] sm:$0xf]  ;;  %v6627_v3 = vld [vmem:[%s10882_s5 + $0x350] sm:$0xf0] }
 0x30b   :  { %v2430_v49 = vpack.c.bf16 %v2394_v56, %v2198_v43  ;;  %3815 = vmatpush.bf16.msra.mxu1 %v6358_v57  ;;  %v2724_v56 = vmax.f32 %v2564_v34, 0.0  ;;  %v6342_v34 = vor.u32 %v7047_v33, %v6339_v18  ;;  %v6630_v20 = vor.u32 %v7119_v23, %v6627_v3  ;;  %v10941_v57 = vld [vmem:[#allocation8_spill] sm:$0xff] }
 0x30d   :  { %v2500_v13 = vunpack.c.l.bf16 %v2430_v49  ;;  %v2501_v61 = vunpack.c.h.bf16 %v2430_v49  ;;  %3912 = vmatpush.bf16.msra.mxu3 %v6630_v20 }
 0x30e   :  { %v2347_v1 = vpop.f32.mrf.mxu2  ;;  %v2396_v11 = vpop.f32.mrf.mxu3  ;;  %3767 = vmatpush.bf16.msra.mxu0 %v6214_v17 }
 0x30f   :  { %v2568_v21 = vadd.f32 %v8902_v31, %v2500_v13  ;;  %v2569_v43 = vadd.f32 %v8904_v8, %v2501_v61  ;;  %v2348_v32 = vadd.f32 %v2347_v1, %v2299_v4  ;;  %3816 = vmatpush.bf16.msra.mxu1 %v6342_v34  ;;  %v2154_v1 = vadd.f32 %v8829_v37, %v8791_v10  ;;  %v7083_v10 = vld [vmem:[%s10882_s5 + $0x224] sm:$0xf]  ;;  %v6483_v37 = vld [vmem:[%s10882_s5 + $0x230] sm:$0xf0] }
 0x311   :  { %v2728_v12 = vmax.f32 %v2568_v21, 0.0  ;;  %v2729_v49 = vmax.f32 %v2569_v43, 0.0  ;;  %v2397_v26 = vadd.f32 %v2396_v11, %v2348_v32  ;;  %v2254_v28 = vpop.f32.mrf.mxu0  ;;  %v2303_v60 = vpop.f32.mrf.mxu1  ;;  %v2301_v11 = vadd.f32 %v2300_v51, %v2251_v63 }
 0x312   :  { %v6486_v63 = vor.u32 %v7083_v10, %v6483_v37  ;;  %v2159_v37 = vadd.f32 %v8847_v48, %v8839_v9  ;;  %v6595_v48 = vld [vmem:[%s10882_s5 + $0x310] sm:$0xf0] }
 0x313   :  { %v9113_v4 = vpack.c.bf16 %v2728_v12, %v2724_v56  ;;  %v9115_v13 = vpack.c.bf16 %v2729_v49, %v2725_v27  ;;  %v2432_v61 = vpack.c.bf16 %v2397_v26, %v8819_v45  ;;  %v2203_v45 = vadd.f32 %v8831_v19, %v2154_v1 }
 0x314   :  { %3602 = vmatmul.bf16.gmra.mxu0 %v8588_v55  ;;  %3651 = vmatmul.bf16.gmra.mxu1 %v10941_v57  ;;  %v2304_v12 = vadd.f32 %v2303_v60, %v2254_v28  ;;  %v7115_v28 = vld [vmem:[%s10882_s5 + $0x324] sm:$0xf]  ;;  %v6611_v60 = vld [vmem:[%s10882_s5 + $0x330] sm:$0xf0] }
 0x315   :  { %3690 = vmatmul.bf16.gmra.mxu2 %v9113_v4  ;;  %3739 = vmatmul.bf16.gmra.mxu3 %v9115_v13  ;;  %v2504_v53 = vunpack.c.l.bf16 %v2432_v61  ;;  %v2505_v47 = vunpack.c.h.bf16 %v2432_v61 }
 0x316   :  { %v2349_v21 = vpop.f32.mrf.mxu2  ;;  %v2398_v43 = vpop.f32.mrf.mxu3  ;;  %3864 = vmatpush.bf16.msra.mxu2 %v6486_v63 }
 0x317   :  { %v2350_v32 = vadd.f32 %v2349_v21, %v2301_v11  ;;  %v2572_v17 = vadd.f32 %v8902_v31, %v2504_v53  ;;  %v2573_v18 = vadd.f32 %v8904_v8, %v2505_v47  ;;  %v6614_v47 = vor.u32 %v7115_v28, %v6611_v60 }
 0x319   :  { %v2399_v33 = vadd.f32 %v2398_v43, %v2350_v32  ;;  %v2256_v56 = vpop.f32.mrf.mxu0  ;;  %v2305_v27 = vpop.f32.mrf.mxu1  ;;  %v2732_v61 = vmax.f32 %v2572_v17, 0.0  ;;  %v2733_v1 = vmax.f32 %v2573_v18, 0.0  ;;  %v7111_v17 = vld [vmem:[%s10882_s5 + $0x304] sm:$0xf]  ;;  %3913 = vmatpush.bf16.msra.mxu3 %v6614_v47 }
 0x31a   :  { %v2306_v63 = vadd.f32 %v2305_v27, %v2256_v56  ;;  %v6598_v27 = vor.u32 %v7111_v17, %v6595_v48 }
 0x31b   :  { %v2434_v51 = vpack.c.bf16 %v2399_v33, %v2203_v45 }
 0x31d   :  { %v2508_v19 = vunpack.c.l.bf16 %v2434_v51  ;;  %v2509_v49 = vunpack.c.h.bf16 %v2434_v51  ;;  %v7079_v51 = vld [vmem:[%s10882_s5 + $0x204] sm:$0xf]  ;;  %3914 = vmatpush.bf16.msra.mxu3 %v6598_v27 }
 0x31e   :  { %v2352_v26 = vpop.f32.mrf.mxu2  ;;  %v2401_v23 = vpop.f32.mrf.mxu3 }
 0x31f   :  { %v2576_v3 = vadd.f32 %v8902_v31, %v2508_v19  ;;  %v2577_v34 = vadd.f32 %v8904_v8, %v2509_v49  ;;  %v2353_v20 = vadd.f32 %v2352_v26, %v2304_v12  ;;  %v2208_v49 = vadd.f32 %v8849_v29, %v2159_v37 }
 0x321   :  { %v2736_v11 = vmax.f32 %v2576_v3, 0.0  ;;  %v2737_v21 = vmax.f32 %v2577_v34, 0.0  ;;  %v2402_v43 = vadd.f32 %v2401_v23, %v2353_v20  ;;  %v2259_v32 = vpop.f32.mrf.mxu0  ;;  %v2308_v53 = vpop.f32.mrf.mxu1 }
 0x323   :  { %v9141_v45 = vpack.c.bf16 %v2736_v11, %v2732_v61  ;;  %v9143_v33 = vpack.c.bf16 %v2737_v21, %v2733_v1  ;;  %v2436_v10 = vpack.c.bf16 %v2402_v43, %v8843_v6  ;;  %v6467_v6 = vld [vmem:[%s10882_s5 + $0x210] sm:$0xf0]  ;;  %v9168_v61 = vld [vmem:[%s10883_s6] sm:$0xf]  ;;  %v2309_v21 = vadd.f32 %v2308_v53, %v2259_v32 }
 0x324   :  { %3607 = vmatmul.bf16.gmra.mxu0 %v8627_v50  ;;  %3656 = vmatmul.bf16.gmra.mxu1 %v8629_v15  ;;  %v6470_v9 = vor.u32 %v7079_v51, %v6467_v6  ;;  %v9173_v47 = vperm.slane %v9168_v61, 0 }
 0x325   :  { %3695 = vmatmul.bf16.gmra.mxu2 %v9141_v45  ;;  %3744 = vmatmul.bf16.gmra.mxu3 %v9143_v33  ;;  %v2512_v19 = vunpack.c.l.bf16 %v2436_v10  ;;  %v2513_v26 = vunpack.c.h.bf16 %v2436_v10 }
 0x326   :  { %v2354_v18 = vpop.f32.mrf.mxu2  ;;  %v2403_v12 = vpop.f32.mrf.mxu3  ;;  %3865 = vmatpush.bf16.msra.mxu2 %v6470_v9 }
 0x327   :  { %v2355_v56 = vadd.f32 %v2354_v18, %v2306_v63  ;;  %v2580_v1 = vadd.f32 %v8902_v31, %v2512_v19  ;;  %v2581_v11 = vadd.f32 %v8904_v8, %v2513_v26  ;;  %v2164_v19 = vadd.f32 %v8871_v40, %v8857_v24 }
 0x329   :  { %v2404_v23 = vadd.f32 %v2403_v12, %v2355_v56  ;;  %v2261_v3 = vpop.f32.mrf.mxu0  ;;  %v2310_v34 = vpop.f32.mrf.mxu1  ;;  %v2740_v51 = vmax.f32 %v2580_v1, 0.0  ;;  %v2741_v6 = vmax.f32 %v2581_v11, 0.0  ;;  %v6329_v1 = vld [vmem:[%s10882_s5 + $0xe8] sm:$0xf] }
 0x32b   :  { %v2438_v20 = vpack.c.bf16 %v2404_v23, %v2208_v49  ;;  %v2311_v49 = vadd.f32 %v2310_v34, %v2261_v3  ;;  %v6585_v23 = vld [vmem:[%s10882_s5 + $0x2e8] sm:$0xf]  ;;  %v7142_v34 = vld [vmem:[%s10882_s5 + $0x3f4] sm:$0xf0] }
 0x32c   :  { %v6713_v3 = vld [vmem:[%s10882_s5 + $0x3e8] sm:$0xf] }
 0x32d   :  { %v2516_v43 = vunpack.c.l.bf16 %v2438_v20  ;;  %v2517_v28 = vunpack.c.h.bf16 %v2438_v20  ;;  %v7110_v20 = vld [vmem:[%s10882_s5 + $0x2f4] sm:$0xf0] }
 0x32e   :  { %v2357_v60 = vpop.f32.mrf.mxu2  ;;  %v2406_v29 = vpop.f32.mrf.mxu3  ;;  %v6586_v40 = vor.u32 %v7110_v20, %v6585_v23 }
 0x32f   :  { %v2584_v10 = vadd.f32 %v8902_v31, %v2516_v43  ;;  %v2585_v37 = vadd.f32 %v8904_v8, %v2517_v28  ;;  %v2358_v63 = vadd.f32 %v2357_v60, %v2309_v21  ;;  %v6714_v28 = vor.u32 %v7142_v34, %v6713_v3 }
 0x330   :  { %4054 = vmatpush.bf16.msrb.mxu2 %v6586_v40  ;;  %v2213_v60 = vadd.f32 %v8873_v41, %v2164_v19 }
 0x331   :  { %v2744_v17 = vmax.f32 %v2584_v10, 0.0  ;;  %v2745_v18 = vmax.f32 %v2585_v37, 0.0  ;;  %v2407_v12 = vadd.f32 %v2406_v29, %v2358_v63  ;;  %v3573_v9 = vpop.f32.mrf.mxu0  ;;  %v3622_v48 = vpop.f32.mrf.mxu1  ;;  %4103 = vmatpush.bf16.msrb.mxu3 %v6714_v28  ;;  %v6313_v28 = vld [vmem:[%s10882_s5 + $0xc8] sm:$0xf] }
 0x332   :  { %v3574_v32 = vadd.f32 %v3573_v9, %v9173_v47 }
 0x333   :  { %v9178_v53 = vpack.c.bf16 %v2744_v17, %v2740_v51  ;;  %v9180_v56 = vpack.c.bf16 %v2745_v18, %v2741_v6  ;;  %v2440_v26 = vpack.c.bf16 %v2407_v12, %v8867_v22  ;;  %v7046_v22 = vld [vmem:[%s10882_s5 + $0xf4] sm:$0xf0] }
 0x334   :  { %v9182_v27 = vadd.f32 %v3622_v48, %v3574_v32  ;;  %3768 = vmatmul.bf16.vlgmr.msra.gmra.mxu0 %v8395_v54  ;;  %3817 = vmatmul.bf16.vlgmr.msra.gmra.mxu1 %v8397_v62  ;;  %v6330_v21 = vor.u32 %v7046_v22, %v6329_v1 }
 0x335   :  { %3700 = vmatmul.bf16.gmra.mxu2 %v9178_v53  ;;  %3749 = vmatmul.bf16.gmra.mxu3 %v9180_v56  ;;  %v2520_v29 = vunpack.c.l.bf16 %v2440_v26  ;;  %v2521_v10 = vunpack.c.h.bf16 %v2440_v26  ;;  %v7078_v26 = vld [vmem:[%s10882_s5 + $0x1f4] sm:$0xf0] }
 0x336   :  { %v2359_v24 = vpop.f32.mrf.mxu2  ;;  %v2408_v43 = vpop.f32.mrf.mxu3  ;;  %3956 = vmatpush.bf16.msrb.mxu0 %v6330_v21  ;;  %v6569_v21 = vld [vmem:[%s10882_s5 + $0x2c8] sm:$0xf] }
 0x337   :  { %v2360_v11 = vadd.f32 %v2359_v24, %v2311_v49  ;;  %v2588_v12 = vadd.f32 %v8902_v31, %v2520_v29  ;;  %v2589_v9 = vadd.f32 %v8904_v8, %v2521_v10  ;;  %v6457_v49 = vld [vmem:[%s10882_s5 + $0x1e8] sm:$0xf]  ;;  %v7042_v29 = vld [vmem:[%s10882_s5 + $0xd4] sm:$0xf0] }
 0x338   :  { %v6458_v23 = vor.u32 %v7078_v26, %v6457_v49  ;;  %v6697_v10 = vld [vmem:[%s10882_s5 + $0x3c8] sm:$0xf] }
 0x339   :  { %v2409_v37 = vadd.f32 %v2408_v43, %v2360_v11  ;;  %v3575_v63 = vpop.f32.mrf.mxu0  ;;  %v3624_v51 = vpop.f32.mrf.mxu1  ;;  %v2748_v20 = vmax.f32 %v2588_v12, 0.0  ;;  %v2749_v1 = vmax.f32 %v2589_v9, 0.0  ;;  %v7106_v43 = vld [vmem:[%s10882_s5 + $0x2d4] sm:$0xf0] }
 0x33a   :  { %v3576_v6 = vadd.f32 %v3575_v63, %v9173_v47  ;;  %4005 = vmatpush.bf16.msrb.mxu1 %v6458_v23 }
 0x33b   :  { %v2442_v17 = vpack.c.bf16 %v2409_v37, %v2213_v60  ;;  %v6570_v60 = vor.u32 %v7106_v43, %v6569_v21  ;;  %v7138_v37 = vld [vmem:[%s10882_s5 + $0x3d4] sm:$0xf0]  ;;  %v6681_v21 = vld [vmem:[%s10882_s5 + $0x3a8] sm:$0xf] }
 0x33c   :  { %v9211_v18 = vadd.f32 %v3624_v51, %v3576_v6  ;;  %v6314_v6 = vor.u32 %v7042_v29, %v6313_v28  ;;  %v7134_v43 = vld [vmem:[%s10882_s5 + $0x3b4] sm:$0xf0] }
 0x33d   :  { %v2524_v48 = vunpack.c.l.bf16 %v2442_v17  ;;  %v2525_v32 = vunpack.c.h.bf16 %v2442_v17  ;;  %v6698_v17 = vor.u32 %v7138_v37, %v6697_v10  ;;  %4055 = vmatpush.bf16.msrb.mxu2 %v6570_v60  ;;  %v6682_v37 = vor.u32 %v7134_v43, %v6681_v21  ;;  %v7034_v21 = vld [vmem:[%s10882_s5 + $0x94] sm:$0xf0]  ;;  %v6665_v43 = vld [vmem:[%s10882_s5 + $0x388] sm:$0xf] }
 0x33e   :  { %3957 = vmatpush.bf16.msrb.mxu0 %v6314_v6 }
 0x33f   :  { %v2592_v41 = vadd.f32 %v8902_v31, %v2524_v48  ;;  %v2593_v19 = vadd.f32 %v8904_v8, %v2525_v32  ;;  %4104 = vmatpush.bf16.msrb.mxu3 %v6698_v17  ;;  %v6441_v48 = vld [vmem:[%s10882_s5 + $0x1c8] sm:$0xf]  ;;  %v7074_v32 = vld [vmem:[%s10882_s5 + $0x1d4] sm:$0xf0] }
 0x340   :  { %v6425_v17 = vld [vmem:[%s10882_s5 + $0x1a8] sm:$0xf] }
 0x341   :  { %v2752_v24 = vmax.f32 %v2592_v41, 0.0  ;;  %v2753_v40 = vmax.f32 %v2593_v19, 0.0  ;;  %v3578_v22 = vpop.f32.mrf.mxu0  ;;  %v3627_v3 = vpop.f32.mrf.mxu1  ;;  %v6442_v41 = vor.u32 %v7074_v32, %v6441_v48 }
 0x342   :  { %v3579_v34 = vadd.f32 %v3578_v22, %v9173_v47 }
 0x343   :  { %v9224_v31 = vpack.c.bf16 %v2752_v24, %v2748_v20  ;;  %v9226_v8 = vpack.c.bf16 %v2753_v40, %v2749_v1  ;;  %4006 = vmatpush.bf16.msrb.mxu1 %v6442_v41  ;;  %v6553_v20 = vld [vmem:[%s10882_s5 + $0x2a8] sm:$0xf]  ;;  %v7102_v1 = vld [vmem:[%s10882_s5 + $0x2b4] sm:$0xf0]  ;;  %4105 = vmatpush.bf16.msrb.mxu3 %v6682_v37 }
 0x344   :  { %v9228_v11 = vadd.f32 %v3627_v3, %v3579_v34  ;;  %3773 = vmatmul.bf16.gmra.mxu0 %v8434_v38  ;;  %3822 = vmatmul.bf16.gmra.mxu1 %v8436_v25  ;;  %v6297_v24 = vld [vmem:[%s10882_s5 + $0xa8] sm:$0xf]  ;;  %v6554_v3 = vor.u32 %v7102_v1, %v6553_v20  ;;  %v7038_v34 = vld [vmem:[%s10882_s5 + $0xb4] sm:$0xf0] }
 0x345   :  { %3705 = vmatmul.bf16.gmra.mxu2 %v9224_v31  ;;  %3754 = vmatmul.bf16.gmra.mxu3 %v9226_v8  ;;  %v6298_v10 = vor.u32 %v7038_v34, %v6297_v24  ;;  %v7098_v24 = vld [vmem:[%s10882_s5 + $0x294] sm:$0xf0] }
 0x346   :  { %4056 = vmatpush.bf16.msrb.mxu2 %v6554_v3 }
 0x347   :  { %3958 = vmatpush.bf16.msrb.mxu0 %v6298_v10 }
 0x349   :  { %v3580_v63 = vpop.f32.mrf.mxu0  ;;  %v3629_v51 = vpop.f32.mrf.mxu1 }
 0x34a   :  { %v3581_v12 = vadd.f32 %v3580_v63, %v9173_v47 }
 0x34c   :  { %v9253_v9 = vadd.f32 %v3629_v51, %v3581_v12 }
 0x351   :  { %v3583_v19 = vpop.f32.mrf.mxu0  ;;  %v3632_v49 = vpop.f32.mrf.mxu1 }
 0x352   :  { %v3584_v26 = vadd.f32 %v3583_v19, %v9173_v47 }
 0x354   :  { %v9262_v23 = vadd.f32 %v3632_v49, %v3584_v26  ;;  %3778 = vmatmul.bf16.gmra.mxu0 %v8472_v46  ;;  %3827 = vmatmul.bf16.gmra.mxu1 %v8474_v16 }
 0x355   :  { %3866 = vmatmul.bf16.vlgmr.msra.gmra.mxu2 %v8932_v44  ;;  %3915 = vmatmul.bf16.vlgmr.msra.gmra.mxu3 %v8934_v5 }
 0x358   :  { %v3671_v40 = vpop.f32.mrf.mxu2  ;;  %v3720_v22 = vpop.f32.mrf.mxu3 }
 0x359   :  { %v3672_v28 = vadd.f32 %v3671_v40, %v9182_v27  ;;  %v3585_v60 = vpop.f32.mrf.mxu0  ;;  %v3634_v29 = vpop.f32.mrf.mxu1  ;;  %v7070_v27 = vld [vmem:[%s10882_s5 + $0x1b4] sm:$0xf0]  ;;  %v6281_v40 = vld [vmem:[%s10882_s5 + $0x88] sm:$0xf] }
 0x35a   :  { %v3586_v63 = vadd.f32 %v3585_v60, %v9173_v47  ;;  %v6426_v32 = vor.u32 %v7070_v27, %v6425_v17  ;;  %v6282_v37 = vor.u32 %v7034_v21, %v6281_v40 }
 0x35b   :  { %v9288_v51 = vadd.f32 %v3720_v22, %v3672_v28  ;;  %v7130_v28 = vld [vmem:[%s10882_s5 + $0x394] sm:$0xf0] }
 0x35c   :  { %v9290_v6 = vadd.f32 %v3634_v29, %v3586_v63  ;;  %4007 = vmatpush.bf16.msrb.mxu1 %v6426_v32  ;;  %v6666_v63 = vor.u32 %v7130_v28, %v6665_v43  ;;  %3959 = vmatpush.bf16.msrb.mxu0 %v6282_v37 }
 0x35e   :  { %4106 = vmatpush.bf16.msrb.mxu3 %v6666_v63 }
 0x360   :  { %v3673_v12 = vpop.f32.mrf.mxu2  ;;  %v3722_v48 = vpop.f32.mrf.mxu3 }
 0x361   :  { %v3674_v41 = vadd.f32 %v3673_v12, %v9211_v18  ;;  %v3588_v19 = vpop.f32.mrf.mxu0  ;;  %v3637_v49 = vpop.f32.mrf.mxu1  ;;  %v6537_v18 = vld [vmem:[%s10882_s5 + $0x288] sm:$0xf] }
 0x362   :  { %v3589_v26 = vadd.f32 %v3588_v19, %v9173_v47  ;;  %v6538_v34 = vor.u32 %v7098_v24, %v6537_v18 }
 0x363   :  { %v9300_v20 = vadd.f32 %v3722_v48, %v3674_v41  ;;  %v6409_v48 = vld [vmem:[%s10882_s5 + $0x188] sm:$0xf] }
 0x364   :  { %v9302_v1 = vadd.f32 %v3637_v49, %v3589_v26  ;;  %3783 = vmatmul.bf16.gmra.mxu0 %v8510_v36  ;;  %3832 = vmatmul.bf16.gmra.mxu1 %v8512_v14 }
 0x365   :  { %3871 = vmatmul.bf16.gmra.mxu2 %v8970_v30  ;;  %3920 = vmatmul.bf16.gmra.mxu3 %v8972_v59 }
 0x366   :  { %4057 = vmatpush.bf16.msrb.mxu2 %v6538_v34  ;;  %v6265_v34 = vld [vmem:[%s10882_s5 + $0x68] sm:$0xf] }
 0x368   :  { %v3676_v22 = vpop.f32.mrf.mxu2  ;;  %v3725_v3 = vpop.f32.mrf.mxu3 }
 0x369   :  { %v3677_v60 = vadd.f32 %v3676_v22, %v9228_v11  ;;  %v3590_v29 = vpop.f32.mrf.mxu0  ;;  %v3639_v10 = vpop.f32.mrf.mxu1  ;;  %v7066_v11 = vld [vmem:[%s10882_s5 + $0x194] sm:$0xf0] }
 0x36a   :  { %v3591_v17 = vadd.f32 %v3590_v29, %v9173_v47  ;;  %v6410_v19 = vor.u32 %v7066_v11, %v6409_v48  ;;  %v6649_v29 = vld [vmem:[%s10882_s5 + $0x368] sm:$0xf] }
 0x36b   :  { %v9328_v27 = vadd.f32 %v3725_v3, %v3677_v60  ;;  %v7094_v3 = vld [vmem:[%s10882_s5 + $0x274] sm:$0xf0] }
 0x36c   :  { %v9330_v12 = vadd.f32 %v3639_v10, %v3591_v17  ;;  %4008 = vmatpush.bf16.msrb.mxu1 %v6410_v19  ;;  %v7030_v60 = vld [vmem:[%s10882_s5 + $0x74] sm:$0xf0] }
 0x36d   :  { %v7126_v10 = vld [vmem:[%s10882_s5 + $0x374] sm:$0xf0]  ;;  %v6266_v48 = vor.u32 %v7030_v60, %v6265_v34 }
 0x36e   :  { %v6650_v11 = vor.u32 %v7126_v10, %v6649_v29  ;;  %v7090_v60 = vld [vmem:[%s10882_s5 + $0x254] sm:$0xf0]  ;;  %v6249_v29 = vld [vmem:[%s10882_s5 + $0x48] sm:$0xf] }
 0x36f   :  { %3960 = vmatpush.bf16.msrb.mxu0 %v6266_v48  ;;  %v6633_v48 = vld [vmem:[%s10882_s5 + $0x348] sm:$0xf] }
 0x370   :  { %v3678_v32 = vpop.f32.mrf.mxu2  ;;  %v3727_v41 = vpop.f32.mrf.mxu3  ;;  %4107 = vmatpush.bf16.msrb.mxu3 %v6650_v11  ;;  %v7122_v11 = vld [vmem:[%s10882_s5 + $0x354] sm:$0xf0] }
 0x371   :  { %v3679_v49 = vadd.f32 %v3678_v32, %v9253_v9  ;;  %v3593_v26 = vpop.f32.mrf.mxu0  ;;  %v3642_v18 = vpop.f32.mrf.mxu1  ;;  %v6521_v9 = vld [vmem:[%s10882_s5 + $0x268] sm:$0xf] }
 0x372   :  { %v3594_v24 = vadd.f32 %v3593_v26, %v9173_v47  ;;  %v6522_v28 = vor.u32 %v7094_v3, %v6521_v9 }
 0x373   :  { %v9340_v40 = vadd.f32 %v3727_v41, %v3679_v49  ;;  %v6393_v49 = vld [vmem:[%s10882_s5 + $0x168] sm:$0xf] }
 0x374   :  { %v9342_v22 = vadd.f32 %v3642_v18, %v3594_v24  ;;  %3788 = vmatmul.bf16.gmra.mxu0 %v8560_v42  ;;  %3837 = vmatmul.bf16.gmra.mxu1 %v8562_v39 }
 0x375   :  { %10942 = vst [vmem:[#allocation2_spill] sm:$0xff] %v9340_v40  ;;  %3876 = vmatmul.bf16.gmra.mxu2 %v9008_v58  ;;  %3925 = vmatmul.bf16.gmra.mxu3 %v9010_v0 }
 0x376   :  { %4058 = vmatpush.bf16.msrb.mxu2 %v6522_v28 }
 0x378   :  { %v3681_v21 = vpop.f32.mrf.mxu2  ;;  %v3730_v43 = vpop.f32.mrf.mxu3 }
 0x379   :  { %v3682_v37 = vadd.f32 %v3681_v21, %v9262_v23  ;;  %v3595_v63 = vpop.f32.mrf.mxu0  ;;  %v3644_v17 = vpop.f32.mrf.mxu1  ;;  %v7062_v23 = vld [vmem:[%s10882_s5 + $0x174] sm:$0xf0] }
 0x37a   :  { %v3596_v32 = vadd.f32 %v3595_v63, %v9173_v47  ;;  %v6394_v24 = vor.u32 %v7062_v23, %v6393_v49 }
 0x37b   :  { %v9368_v41 = vadd.f32 %v3730_v43, %v3682_v37 }
 0x37c   :  { %v9370_v19 = vadd.f32 %v3644_v17, %v3596_v32  ;;  %4009 = vmatpush.bf16.msrb.mxu1 %v6394_v24  ;;  %v7026_v17 = vld [vmem:[%s10882_s5 + $0x54] sm:$0xf0]  ;;  %v6377_v24 = vld [vmem:[%s10882_s5 + $0x148] sm:$0xf] }
 0x37d   :  { %10943 = vst [vmem:[#allocation7_spill] sm:$0xff] %v9368_v41 }
 0x380   :  { %v3683_v26 = vpop.f32.mrf.mxu2  ;;  %v3732_v18 = vpop.f32.mrf.mxu3 }
 0x381   :  { %v3684_v9 = vadd.f32 %v3683_v26, %v9290_v6  ;;  %v3598_v3 = vpop.f32.mrf.mxu0  ;;  %v3647_v34 = vpop.f32.mrf.mxu1  ;;  %v6505_v6 = vld [vmem:[%s10882_s5 + $0x248] sm:$0xf]  ;;  %v6250_v26 = vor.u32 %v7026_v17, %v6249_v29 }
 0x382   :  { %v3599_v21 = vadd.f32 %v3598_v3, %v9173_v47  ;;  %v6506_v63 = vor.u32 %v7090_v60, %v6505_v6  ;;  %v7022_v6 = vld [vmem:[%s10882_s5 + $0x34] sm:$0xf0]  ;;  %v6361_v60 = vld [vmem:[%s10882_s5 + $0x128] sm:$0xf] }
 0x383   :  { %v9380_v43 = vadd.f32 %v3732_v18, %v3684_v9  ;;  %v6634_v18 = vor.u32 %v7122_v11, %v6633_v48  ;;  %v7058_v9 = vld [vmem:[%s10882_s5 + $0x154] sm:$0xf0]  ;;  %3961 = vmatpush.bf16.msrb.mxu0 %v6250_v26  ;;  %v6217_v17 = vld [vmem:[%s10882_s5 + $0x8] sm:$0xf] }
 0x384   :  { %v9382_v28 = vadd.f32 %v3647_v34, %v3599_v21  ;;  %3793 = vmatmul.bf16.gmra.mxu0 %v8574_v35  ;;  %3842 = vmatmul.bf16.gmra.mxu1 %v8576_v7  ;;  %v6378_v34 = vor.u32 %v7058_v9, %v6377_v24  ;;  %v7018_v48 = vld [vmem:[%s10882_s5 + $0x14] sm:$0xf0]  ;;  %v6345_v11 = vld [vmem:[%s10882_s5 + $0x108] sm:$0xf] }
 0x385   :  { %10944 = vst [vmem:[#allocation3_spill] sm:$0xff] %v9380_v43  ;;  %3881 = vmatmul.bf16.gmra.mxu2 %v9046_v2  ;;  %3930 = vmatmul.bf16.gmra.mxu3 %v9048_v52  ;;  %v7050_v26 = vld [vmem:[%s10882_s5 + $0x114] sm:$0xf0] }
 0x386   :  { %4059 = vmatpush.bf16.msrb.mxu2 %v6506_v63  ;;  %4108 = vmatpush.bf16.msrb.mxu3 %v6634_v18 }
 0x387   :  { %4010 = vmatpush.bf16.msrb.mxu1 %v6378_v34  ;;  %v6346_v34 = vor.u32 %v7050_v26, %v6345_v11 }
 0x388   :  { %v3686_v10 = vpop.f32.mrf.mxu2  ;;  %v3735_v37 = vpop.f32.mrf.mxu3 }
 0x389   :  { %v3687_v32 = vadd.f32 %v3686_v10, %v9302_v1  ;;  %v3600_v49 = vpop.f32.mrf.mxu0  ;;  %v3649_v23 = vpop.f32.mrf.mxu1  ;;  %v6233_v1 = vld [vmem:[%s10882_s5 + $0x28] sm:$0xf] }
 0x38a   :  { %v3601_v3 = vadd.f32 %v3600_v49, %v9173_v47  ;;  %v6234_v10 = vor.u32 %v7022_v6, %v6233_v1 }
 0x38b   :  { %v9414_v21 = vadd.f32 %v3735_v37, %v3687_v32  ;;  %v7054_v37 = vld [vmem:[%s10882_s5 + $0x134] sm:$0xf0] }
 0x38c   :  { %v9425_v29 = vadd.f32 %v3649_v23, %v3601_v3  ;;  %v6362_v63 = vor.u32 %v7054_v37, %v6361_v60  ;;  %3962 = vmatpush.bf16.msrb.mxu0 %v6234_v10  ;;  %v6218_v23 = vor.u32 %v7018_v48, %v6217_v17  ;;  %v7086_v60 = vld [vmem:[%s10882_s5 + $0x234] sm:$0xf0]  ;;  %v6617_v10 = vld [vmem:[%s10882_s5 + $0x328] sm:$0xf] }
 0x38d   :  { %10945 = vst [vmem:[#allocation4_spill] sm:$0xff] %v9414_v21  ;;  %v7118_v48 = vld [vmem:[%s10882_s5 + $0x334] sm:$0xf0]  ;;  %v7060_v21 = vld [vmem:[%s10882_s5 + $0x16c] sm:$0xf] }
 0x38e   :  { %4011 = vmatpush.bf16.msrb.mxu1 %v6362_v63 }
 0x390   :  { %v3688_v32 = vpop.f32.mrf.mxu2  ;;  %v3737_v49 = vpop.f32.mrf.mxu3  ;;  %3963 = vmatpush.bf16.msrb.mxu0 %v6218_v23  ;;  %v6618_v23 = vor.u32 %v7118_v48, %v6617_v10  ;;  %v7082_v10 = vld [vmem:[%s10882_s5 + $0x214] sm:$0xf0] }
 0x391   :  { %v3689_v18 = vadd.f32 %v3688_v32, %v9330_v12  ;;  %v3603_v24 = vpop.f32.mrf.mxu0  ;;  %v3652_v9 = vpop.f32.mrf.mxu1  ;;  %v6489_v12 = vld [vmem:[%s10882_s5 + $0x228] sm:$0xf] }
 0x392   :  { %v3604_v3 = vadd.f32 %v3603_v24, %v9173_v47  ;;  %4012 = vmatpush.bf16.msrb.mxu1 %v6346_v34  ;;  %v6490_v17 = vor.u32 %v7086_v60, %v6489_v12  ;;  %4109 = vmatpush.bf16.msrb.mxu3 %v6618_v23 }
 0x393   :  { %v9444_v1 = vadd.f32 %v3737_v49, %v3689_v18 }
 0x394   :  { %v9446_v6 = vadd.f32 %v3652_v9, %v3604_v3  ;;  %3798 = vmatmul.bf16.gmra.mxu0 %v8588_v55  ;;  %3847 = vmatmul.bf16.gmra.mxu1 %v10941_v57 }
 0x395   :  { %10946 = vst [vmem:[#allocation5_spill] sm:$0xff] %v9444_v1  ;;  %3886 = vmatmul.bf16.gmra.mxu2 %v9113_v4  ;;  %3935 = vmatmul.bf16.gmra.mxu3 %v9115_v13 }
 0x396   :  { %4060 = vmatpush.bf16.msrb.mxu2 %v6490_v17 }
 0x398   :  { %v3691_v37 = vpop.f32.mrf.mxu2  ;;  %v3740_v63 = vpop.f32.mrf.mxu3 }
 0x399   :  { %v3692_v11 = vadd.f32 %v3691_v37, %v9342_v22  ;;  %v3605_v32 = vpop.f32.mrf.mxu0  ;;  %v3654_v49 = vpop.f32.mrf.mxu1 }
 0x39a   :  { %v3606_v26 = vadd.f32 %v3605_v32, %v9173_v47 }
 0x39b   :  { %v9466_v18 = vadd.f32 %v3740_v63, %v3692_v11  ;;  %v7114_v11 = vld [vmem:[%s10882_s5 + $0x314] sm:$0xf0] }
 0x39c   :  { %v9468_v24 = vadd.f32 %v3654_v49, %v3606_v26 }
 0x39d   :  { %10947 = vst [vmem:[#allocation6_spill] sm:$0xff] %v9466_v18 }
 0x3a0   :  { %v3693_v9 = vpop.f32.mrf.mxu2  ;;  %v3742_v3 = vpop.f32.mrf.mxu3 }
 0x3a1   :  { %v3694_v34 = vadd.f32 %v3693_v9, %v9370_v19  ;;  %v3608_v12 = vpop.f32.mrf.mxu0  ;;  %v3657_v60 = vpop.f32.mrf.mxu1  ;;  %v6473_v19 = vld [vmem:[%s10882_s5 + $0x208] sm:$0xf] }
 0x3a2   :  { %v3609_v1 = vadd.f32 %v3608_v12, %v9173_v47  ;;  %v6474_v48 = vor.u32 %v7082_v10, %v6473_v19  ;;  %v9499_v12 = vperm.slane %v9168_v61, 1  ;;  %v7108_v61 = vld [vmem:[%s10882_s5 + $0x2ec] sm:$0xf] }
 0x3a3   :  { %v9472_v22 = vadd.f32 %v3742_v3, %v3694_v34 }
 0x3a4   :  { %v9474_v37 = vadd.f32 %v3657_v60, %v3609_v1  ;;  %3803 = vmatmul.bf16.gmra.mxu0 %v8627_v50  ;;  %3852 = vmatmul.bf16.gmra.mxu1 %v8629_v15  ;;  %v6601_v1 = vld [vmem:[%s10882_s5 + $0x308] sm:$0xf] }
 0x3a5   :  { %10948 = vst [vmem:[#allocation8_spill] sm:$0xff] %v9472_v22  ;;  %3891 = vmatmul.bf16.gmra.mxu2 %v9141_v45  ;;  %3940 = vmatmul.bf16.gmra.mxu3 %v9143_v33  ;;  %v6602_v26 = vor.u32 %v7114_v11, %v6601_v1 }
 0x3a6   :  { %4061 = vmatpush.bf16.msrb.mxu2 %v6474_v48 }
 0x3a7   :  { %4110 = vmatpush.bf16.msrb.mxu3 %v6602_v26 }
 0x3a8   :  { %v3696_v63 = vpop.f32.mrf.mxu2  ;;  %v3745_v17 = vpop.f32.mrf.mxu3 }
 0x3a9   :  { %v3697_v32 = vadd.f32 %v3696_v63, %v9382_v28  ;;  %v3610_v49 = vpop.f32.mrf.mxu0  ;;  %v3659_v23 = vpop.f32.mrf.mxu1 }
 0x3aa   :  { %v3611_v9 = vadd.f32 %v3610_v49, %v9173_v47  ;;  %v7140_v49 = vld [vmem:[%s10882_s5 + $0x3ec] sm:$0xf] }
 0x3ab   :  { %v9494_v3 = vadd.f32 %v3745_v17, %v3697_v32  ;;  %v6331_v32 = vld [vmem:[%s10882_s5 + $0xf8] sm:$0xf0] }
 0x3ac   :  { %v9496_v34 = vadd.f32 %v3659_v23, %v3611_v9  ;;  %v6715_v23 = vld [vmem:[%s10882_s5 + $0x3f8] sm:$0xf0] }
 0x3ad   :  { %10949 = vst [vmem:[#allocation9_spill] sm:$0xff] %v9494_v3  ;;  %v7064_v3 = vld [vmem:[%s10882_s5 + $0x18c] sm:$0xf] }
 0x3b0   :  { %v3698_v60 = vpop.f32.mrf.mxu2  ;;  %v3747_v19 = vpop.f32.mrf.mxu3 }
 0x3b1   :  { %v3699_v10 = vadd.f32 %v3698_v60, %v9425_v29  ;;  %v3769_v22 = vpop.f32.mrf.mxu0  ;;  %v3818_v28 = vpop.f32.mrf.mxu1  ;;  %v6587_v29 = vld [vmem:[%s10882_s5 + $0x2f8] sm:$0xf0] }
 0x3b2   :  { %v3770_v63 = vadd.f32 %v3769_v22, %v9499_v12  ;;  %v7044_v22 = vld [vmem:[%s10882_s5 + $0xec] sm:$0xf]  ;;  %v6590_v11 = vor.u32 %v7108_v61, %v6587_v29 }
 0x3b3   :  { %v9503_v1 = vadd.f32 %v3747_v19, %v3699_v10  ;;  %v6334_v19 = vor.u32 %v7044_v22, %v6331_v32  ;;  %v6718_v10 = vor.u32 %v7140_v49, %v6715_v23  ;;  %v7076_v29 = vld [vmem:[%s10882_s5 + $0x1ec] sm:$0xf] }
 0x3b4   :  { %v9505_v47 = vadd.f32 %v3818_v28, %v3770_v63  ;;  %3964 = vmatmul.bf16.vlgmr.msrb.gmra.mxu0 %v8395_v54  ;;  %4013 = vmatmul.bf16.vlgmr.msrb.gmra.mxu1 %v8397_v62 }
 0x3b5   :  { %10950 = vst [vmem:[#allocation10_spill] sm:$0xff] %v9503_v1  ;;  %3896 = vmatmul.bf16.gmra.mxu2 %v9178_v53  ;;  %3945 = vmatmul.bf16.gmra.mxu3 %v9180_v56 }
 0x3b6   :  { %4250 = vmatpush.bf16.msra.mxu2 %v6590_v11  ;;  %4152 = vmatpush.bf16.msra.mxu0 %v6334_v19  ;;  %v7040_v19 = vld [vmem:[%s10882_s5 + $0xcc] sm:$0xf] }
 0x3b7   :  { %4299 = vmatpush.bf16.msra.mxu3 %v6718_v10 }
 0x3b8   :  { %v3701_v17 = vpop.f32.mrf.mxu2  ;;  %v3750_v48 = vpop.f32.mrf.mxu3 }
 0x3b9   :  { %v3702_v26 = vadd.f32 %v3701_v17, %v9446_v6  ;;  %v3771_v9 = vpop.f32.mrf.mxu0  ;;  %v3820_v60 = vpop.f32.mrf.mxu1  ;;  %v6459_v6 = vld [vmem:[%s10882_s5 + $0x1f8] sm:$0xf0] }
 0x3ba   :  { %v3772_v28 = vadd.f32 %v3771_v9, %v9499_v12  ;;  %v6462_v32 = vor.u32 %v7076_v29, %v6459_v6  ;;  %v6315_v6 = vld [vmem:[%s10882_s5 + $0xd8] sm:$0xf0] }
 0x3bb   :  { %v9531_v63 = vadd.f32 %v3750_v48, %v3702_v26 }
 0x3bc   :  { %v9533_v61 = vadd.f32 %v3820_v60, %v3772_v28  ;;  %4201 = vmatpush.bf16.msra.mxu1 %v6462_v32  ;;  %v6571_v60 = vld [vmem:[%s10882_s5 + $0x2d8] sm:$0xf0] }
 0x3bd   :  { %10951 = vst [vmem:[#allocation11_spill] sm:$0xff] %v9531_v63  ;;  %v7072_v63 = vld [vmem:[%s10882_s5 + $0x1cc] sm:$0xf] }
 0x3c0   :  { %v3703_v17 = vpop.f32.mrf.mxu2  ;;  %v3752_v22 = vpop.f32.mrf.mxu3 }
 0x3c1   :  { %v3704_v49 = vadd.f32 %v3703_v17, %v9468_v24  ;;  %v3774_v11 = vpop.f32.mrf.mxu0  ;;  %v3823_v48 = vpop.f32.mrf.mxu1  ;;  %v7104_v24 = vld [vmem:[%s10882_s5 + $0x2cc] sm:$0xf] }
 0x3c2   :  { %v3775_v23 = vadd.f32 %v3774_v11, %v9499_v12  ;;  %v6574_v29 = vor.u32 %v7104_v24, %v6571_v60  ;;  %v7136_v17 = vld [vmem:[%s10882_s5 + $0x3cc] sm:$0xf] }
 0x3c3   :  { %v9543_v26 = vadd.f32 %v3752_v22, %v3704_v49  ;;  %v6699_v22 = vld [vmem:[%s10882_s5 + $0x3d8] sm:$0xf0] }
 0x3c4   :  { %v9545_v9 = vadd.f32 %v3823_v48, %v3775_v23  ;;  %3969 = vmatmul.bf16.gmra.mxu0 %v8434_v38  ;;  %4018 = vmatmul.bf16.gmra.mxu1 %v8436_v25  ;;  %v6318_v48 = vor.u32 %v7040_v19, %v6315_v6  ;;  %v6702_v23 = vor.u32 %v7136_v17, %v6699_v22 }
 0x3c5   :  { %10952 = vst [vmem:[#allocation12_spill] sm:$0xff] %v9543_v26  ;;  %3901 = vmatmul.bf16.gmra.mxu2 %v9224_v31  ;;  %3950 = vmatmul.bf16.gmra.mxu3 %v9226_v8 }
 0x3c6   :  { %4251 = vmatpush.bf16.msra.mxu2 %v6574_v29  ;;  %4153 = vmatpush.bf16.msra.mxu0 %v6318_v48 }
 0x3c7   :  { %4300 = vmatpush.bf16.msra.mxu3 %v6702_v23 }
 0x3c8   :  { %v3706_v10 = vpop.f32.mrf.mxu2  ;;  %v3755_v28 = vpop.f32.mrf.mxu3 }
 0x3c9   :  { %v3707_v32 = vadd.f32 %v3706_v10, %v9474_v37  ;;  %v3776_v49 = vpop.f32.mrf.mxu0  ;;  %v3825_v11 = vpop.f32.mrf.mxu1  ;;  %v6443_v37 = vld [vmem:[%s10882_s5 + $0x1d8] sm:$0xf0] }
 0x3ca   :  { %v3777_v24 = vadd.f32 %v3776_v49, %v9499_v12  ;;  %v6446_v6 = vor.u32 %v7072_v63, %v6443_v37  ;;  %v6555_v63 = vld [vmem:[%s10882_s5 + $0x2b8] sm:$0xf0] }
 0x3cb   :  { %v9571_v60 = vadd.f32 %v3755_v28, %v3707_v32  ;;  %v6299_v37 = vld [vmem:[%s10882_s5 + $0xb8] sm:$0xf0] }
 0x3cc   :  { %v9573_v26 = vadd.f32 %v3825_v11, %v3777_v24  ;;  %4202 = vmatpush.bf16.msra.mxu1 %v6446_v6  ;;  %v7036_v11 = vld [vmem:[%s10882_s5 + $0xac] sm:$0xf] }
 0x3cd   :  { %10953 = vst [vmem:[#allocation13_spill] sm:$0xff] %v9571_v60  ;;  %v7068_v60 = vld [vmem:[%s10882_s5 + $0x1ac] sm:$0xf] }
 0x3d0   :  { %v3708_v10 = vpop.f32.mrf.mxu2  ;;  %v3757_v19 = vpop.f32.mrf.mxu3 }
 0x3d1   :  { %v3709_v17 = vadd.f32 %v3708_v10, %v9496_v34  ;;  %v3779_v29 = vpop.f32.mrf.mxu0  ;;  %v3828_v28 = vpop.f32.mrf.mxu1  ;;  %v7100_v34 = vld [vmem:[%s10882_s5 + $0x2ac] sm:$0xf] }
 0x3d2   :  { %v3780_v22 = vadd.f32 %v3779_v29, %v9499_v12  ;;  %v6558_v24 = vor.u32 %v7100_v34, %v6555_v63  ;;  %v7132_v10 = vld [vmem:[%s10882_s5 + $0x3ac] sm:$0xf] }
 0x3d3   :  { %v9583_v32 = vadd.f32 %v3757_v19, %v3709_v17  ;;  %v6683_v19 = vld [vmem:[%s10882_s5 + $0x3b8] sm:$0xf0] }
 0x3d4   :  { %v9585_v49 = vadd.f32 %v3828_v28, %v3780_v22  ;;  %3974 = vmatmul.bf16.gmra.mxu0 %v8472_v46  ;;  %4023 = vmatmul.bf16.gmra.mxu1 %v8474_v16  ;;  %v6302_v28 = vor.u32 %v7036_v11, %v6299_v37  ;;  %v6686_v22 = vor.u32 %v7132_v10, %v6683_v19 }
 0x3d5   :  { %10954 = vst [vmem:[#allocation14_spill] sm:$0xff] %v9583_v32  ;;  %4062 = vmatmul.bf16.vlgmr.msrb.gmra.mxu2 %v8932_v44  ;;  %4111 = vmatmul.bf16.vlgmr.msrb.gmra.mxu3 %v8934_v5 }
 0x3d6   :  { %4252 = vmatpush.bf16.msra.mxu2 %v6558_v24  ;;  %4154 = vmatpush.bf16.msra.mxu0 %v6302_v28 }
 0x3d7   :  { %4301 = vmatpush.bf16.msra.mxu3 %v6686_v22 }
 0x3d8   :  { %v3867_v48 = vpop.f32.mrf.mxu2  ;;  %v3916_v23 = vpop.f32.mrf.mxu3 }
 0x3d9   :  { %v3868_v6 = vadd.f32 %v3867_v48, %v9505_v47  ;;  %v3781_v17 = vpop.f32.mrf.mxu0  ;;  %v3830_v29 = vpop.f32.mrf.mxu1  ;;  %v6427_v47 = vld [vmem:[%s10882_s5 + $0x1b8] sm:$0xf0] }
 0x3da   :  { %v3782_v34 = vadd.f32 %v3781_v17, %v9499_v12  ;;  %v6430_v37 = vor.u32 %v7068_v60, %v6427_v47  ;;  %v6539_v60 = vld [vmem:[%s10882_s5 + $0x298] sm:$0xf0] }
 0x3db   :  { %v9611_v63 = vadd.f32 %v3916_v23, %v3868_v6  ;;  %v6283_v47 = vld [vmem:[%s10882_s5 + $0x98] sm:$0xf0] }
 0x3dc   :  { %v9613_v32 = vadd.f32 %v3830_v29, %v3782_v34  ;;  %4203 = vmatpush.bf16.msra.mxu1 %v6430_v37  ;;  %v7032_v29 = vld [vmem:[%s10882_s5 + $0x8c] sm:$0xf] }
 0x3e0   :  { %v3869_v48 = vpop.f32.mrf.mxu2  ;;  %v3918_v11 = vpop.f32.mrf.mxu3 }
 0x3e1   :  { %v3870_v10 = vadd.f32 %v3869_v48, %v9533_v61  ;;  %v3784_v24 = vpop.f32.mrf.mxu0  ;;  %v3833_v23 = vpop.f32.mrf.mxu1  ;;  %v7096_v61 = vld [vmem:[%s10882_s5 + $0x28c] sm:$0xf] }
 0x3e2   :  { %v3785_v19 = vadd.f32 %v3784_v24, %v9499_v12  ;;  %v6542_v34 = vor.u32 %v7096_v61, %v6539_v60  ;;  %v7128_v48 = vld [vmem:[%s10882_s5 + $0x38c] sm:$0xf] }
 0x3e3   :  { %v9623_v6 = vadd.f32 %v3918_v11, %v3870_v10  ;;  %v6667_v11 = vld [vmem:[%s10882_s5 + $0x398] sm:$0xf0] }
 0x3e4   :  { %v9625_v17 = vadd.f32 %v3833_v23, %v3785_v19  ;;  %3979 = vmatmul.bf16.gmra.mxu0 %v8510_v36  ;;  %4028 = vmatmul.bf16.gmra.mxu1 %v8512_v14  ;;  %v6286_v23 = vor.u32 %v7032_v29, %v6283_v47  ;;  %v6670_v19 = vor.u32 %v7128_v48, %v6667_v11 }
 0x3e5   :  { %4067 = vmatmul.bf16.gmra.mxu2 %v8970_v30  ;;  %4116 = vmatmul.bf16.gmra.mxu3 %v8972_v59 }
 0x3e6   :  { %4253 = vmatpush.bf16.msra.mxu2 %v6542_v34  ;;  %4155 = vmatpush.bf16.msra.mxu0 %v6286_v23 }
 0x3e7   :  { %4302 = vmatpush.bf16.msra.mxu3 %v6670_v19 }
 0x3e8   :  { %v3872_v28 = vpop.f32.mrf.mxu2  ;;  %v3921_v22 = vpop.f32.mrf.mxu3 }
 0x3e9   :  { %v3873_v37 = vadd.f32 %v3872_v28, %v9545_v9  ;;  %v3786_v10 = vpop.f32.mrf.mxu0  ;;  %v3835_v24 = vpop.f32.mrf.mxu1  ;;  %v6411_v9 = vld [vmem:[%s10882_s5 + $0x198] sm:$0xf0] }
 0x3ea   :  { %v3787_v61 = vadd.f32 %v3786_v10, %v9499_v12  ;;  %v6414_v47 = vor.u32 %v7064_v3, %v6411_v9  ;;  %v7092_v3 = vld [vmem:[%s10882_s5 + $0x26c] sm:$0xf]  ;;  %v6267_v9 = vld [vmem:[%s10882_s5 + $0x78] sm:$0xf0] }
 0x3eb   :  { %v9651_v60 = vadd.f32 %v3921_v22, %v3873_v37 }
 0x3ec   :  { %v9653_v1 = vadd.f32 %v3835_v24, %v3787_v61  ;;  %4204 = vmatpush.bf16.msra.mxu1 %v6414_v47  ;;  %v7028_v24 = vld [vmem:[%s10882_s5 + $0x6c] sm:$0xf] }
 0x3f0   :  { %v3874_v28 = vpop.f32.mrf.mxu2  ;;  %v3923_v29 = vpop.f32.mrf.mxu3 }
 0x3f1   :  { %v3875_v48 = vadd.f32 %v3874_v28, %v9573_v26  ;;  %v3789_v34 = vpop.f32.mrf.mxu0  ;;  %v3838_v22 = vpop.f32.mrf.mxu1  ;;  %v6523_v26 = vld [vmem:[%s10882_s5 + $0x278] sm:$0xf0]  ;;  %v7124_v28 = vld [vmem:[%s10882_s5 + $0x36c] sm:$0xf] }
 0x3f2   :  { %v3790_v11 = vadd.f32 %v3789_v34, %v9499_v12  ;;  %v6526_v61 = vor.u32 %v7092_v3, %v6523_v26 }
 0x3f3   :  { %v9663_v37 = vadd.f32 %v3923_v29, %v3875_v48  ;;  %v6651_v29 = vld [vmem:[%s10882_s5 + $0x378] sm:$0xf0] }
 0x3f4   :  { %v9665_v10 = vadd.f32 %v3838_v22, %v3790_v11  ;;  %3984 = vmatmul.bf16.gmra.mxu0 %v8560_v42  ;;  %4033 = vmatmul.bf16.gmra.mxu1 %v8562_v39  ;;  %v6270_v22 = vor.u32 %v7028_v24, %v6267_v9  ;;  %v6654_v11 = vor.u32 %v7124_v28, %v6651_v29 }
 0x3f5   :  { %4072 = vmatmul.bf16.gmra.mxu2 %v9008_v58  ;;  %4121 = vmatmul.bf16.gmra.mxu3 %v9010_v0 }
 0x3f6   :  { %4254 = vmatpush.bf16.msra.mxu2 %v6526_v61  ;;  %4156 = vmatpush.bf16.msra.mxu0 %v6270_v22 }
 0x3f7   :  { %4303 = vmatpush.bf16.msra.mxu3 %v6654_v11 }
 0x3f8   :  { %v3877_v23 = vpop.f32.mrf.mxu2  ;;  %v3926_v19 = vpop.f32.mrf.mxu3 }
 0x3f9   :  { %v3878_v47 = vadd.f32 %v3877_v23, %v9585_v49  ;;  %v3791_v48 = vpop.f32.mrf.mxu0  ;;  %v3840_v34 = vpop.f32.mrf.mxu1  ;;  %v6395_v49 = vld [vmem:[%s10882_s5 + $0x178] sm:$0xf0] }
 0x3fa   :  { %v3792_v3 = vadd.f32 %v3791_v48, %v9499_v12  ;;  %v6398_v9 = vor.u32 %v7060_v21, %v6395_v49  ;;  %v7088_v21 = vld [vmem:[%s10882_s5 + $0x24c] sm:$0xf]  ;;  %v6251_v49 = vld [vmem:[%s10882_s5 + $0x58] sm:$0xf0] }
 0x3fb   :  { %v9691_v26 = vadd.f32 %v3926_v19, %v3878_v47 }
 0x3fc   :  { %v9693_v18 = vadd.f32 %v3840_v34, %v3792_v3  ;;  %4205 = vmatpush.bf16.msra.mxu1 %v6398_v9  ;;  %v7024_v34 = vld [vmem:[%s10882_s5 + $0x4c] sm:$0xf] }
 0x3fd   :  { %10955 = vst [vmem:[#allocation15_spill] sm:$0xff] %v9691_v26 }
 0x400   :  { %v3879_v23 = vpop.f32.mrf.mxu2  ;;  %v3928_v24 = vpop.f32.mrf.mxu3 }
 0x401   :  { %v3880_v28 = vadd.f32 %v3879_v23, %v9613_v32  ;;  %v3794_v61 = vpop.f32.mrf.mxu0  ;;  %v3843_v19 = vpop.f32.mrf.mxu1  ;;  %v6507_v32 = vld [vmem:[%s10882_s5 + $0x258] sm:$0xf0]  ;;  %v7120_v23 = vld [vmem:[%s10882_s5 + $0x34c] sm:$0xf] }
 0x402   :  { %v3795_v29 = vadd.f32 %v3794_v61, %v9499_v12  ;;  %v6510_v3 = vor.u32 %v7088_v21, %v6507_v32  ;;  %v7056_v21 = vld [vmem:[%s10882_s5 + $0x14c] sm:$0xf]  ;;  %v6379_v32 = vld [vmem:[%s10882_s5 + $0x158] sm:$0xf0] }
 0x403   :  { %v9703_v47 = vadd.f32 %v3928_v24, %v3880_v28  ;;  %v6635_v24 = vld [vmem:[%s10882_s5 + $0x358] sm:$0xf0] }
 0x404   :  { %v9705_v48 = vadd.f32 %v3843_v19, %v3795_v29  ;;  %3989 = vmatmul.bf16.gmra.mxu0 %v8574_v35  ;;  %4038 = vmatmul.bf16.gmra.mxu1 %v8576_v7  ;;  %v6254_v19 = vor.u32 %v7024_v34, %v6251_v49  ;;  %v6638_v29 = vor.u32 %v7120_v23, %v6635_v24  ;;  %v6235_v34 = vld [vmem:[%s10882_s5 + $0x38] sm:$0xf0]  ;;  %v7016_v24 = vld [vmem:[%s10882_s5 + $0xc] sm:$0xf] }
 0x405   :  { %10956 = vst [vmem:[#allocation16_spill] sm:$0xff] %v9703_v47  ;;  %4077 = vmatmul.bf16.gmra.mxu2 %v9046_v2  ;;  %4126 = vmatmul.bf16.gmra.mxu3 %v9048_v52  ;;  %v6382_v47 = vor.u32 %v7056_v21, %v6379_v32 }
 0x406   :  { %4255 = vmatpush.bf16.msra.mxu2 %v6510_v3  ;;  %4157 = vmatpush.bf16.msra.mxu0 %v6254_v19  ;;  %v6347_v19 = vld [vmem:[%s10882_s5 + $0x118] sm:$0xf0] }
 0x407   :  { %4304 = vmatpush.bf16.msra.mxu3 %v6638_v29  ;;  %4206 = vmatpush.bf16.msra.mxu1 %v6382_v47 }
 0x408   :  { %v3882_v22 = vpop.f32.mrf.mxu2  ;;  %v3931_v11 = vpop.f32.mrf.mxu3 }
 0x409   :  { %v3883_v9 = vadd.f32 %v3882_v22, %v9625_v17  ;;  %v3796_v28 = vpop.f32.mrf.mxu0  ;;  %v3845_v61 = vpop.f32.mrf.mxu1  ;;  %v7020_v17 = vld [vmem:[%s10882_s5 + $0x2c] sm:$0xf] }
 0x40a   :  { %v3797_v43 = vadd.f32 %v3796_v28, %v9499_v12  ;;  %v7052_v22 = vld [vmem:[%s10882_s5 + $0x12c] sm:$0xf]  ;;  %v6238_v3 = vor.u32 %v7020_v17, %v6235_v34 }
 0x40b   :  { %v9737_v41 = vadd.f32 %v3931_v11, %v3883_v9  ;;  %v6363_v11 = vld [vmem:[%s10882_s5 + $0x138] sm:$0xf0] }
 0x40c   :  { %v9748_v49 = vadd.f32 %v3845_v61, %v3797_v43  ;;  %v6366_v23 = vor.u32 %v7052_v22, %v6363_v11  ;;  %4158 = vmatpush.bf16.msra.mxu0 %v6238_v3  ;;  %v6219_v9 = vld [vmem:[%s10882_s5 + $0x18] sm:$0xf0]  ;;  %v7048_v43 = vld [vmem:[%s10882_s5 + $0x10c] sm:$0xf] }
 0x40d   :  { %10957 = vst [vmem:[#allocation17_spill] sm:$0xff] %v9737_v41  ;;  %v6222_v61 = vor.u32 %v7016_v24, %v6219_v9  ;;  %v6350_v34 = vor.u32 %v7048_v43, %v6347_v19  ;;  %v6491_v11 = vld [vmem:[%s10882_s5 + $0x238] sm:$0xf0] }
 0x40e   :  { %4207 = vmatpush.bf16.msra.mxu1 %v6366_v23  ;;  %v7116_v23 = vld [vmem:[%s10882_s5 + $0x32c] sm:$0xf] }
 0x410   :  { %v3884_v47 = vpop.f32.mrf.mxu2  ;;  %v3933_v28 = vpop.f32.mrf.mxu3  ;;  %4159 = vmatpush.bf16.msra.mxu0 %v6222_v61 }
 0x411   :  { %v3885_v29 = vadd.f32 %v3884_v47, %v9653_v1  ;;  %v3799_v21 = vpop.f32.mrf.mxu0  ;;  %v3848_v32 = vpop.f32.mrf.mxu1  ;;  %v7084_v1 = vld [vmem:[%s10882_s5 + $0x22c] sm:$0xf]  ;;  %v6619_v47 = vld [vmem:[%s10882_s5 + $0x338] sm:$0xf0] }
 0x412   :  { %v3800_v17 = vadd.f32 %v3799_v21, %v9499_v12  ;;  %4208 = vmatpush.bf16.msra.mxu1 %v6350_v34  ;;  %v6494_v43 = vor.u32 %v7084_v1, %v6491_v11 }
 0x413   :  { %v9767_v22 = vadd.f32 %v3933_v28, %v3885_v29  ;;  %v6622_v29 = vor.u32 %v7116_v23, %v6619_v47  ;;  %v7080_v23 = vld [vmem:[%s10882_s5 + $0x20c] sm:$0xf] }
 0x414   :  { %v9769_v3 = vadd.f32 %v3848_v32, %v3800_v17  ;;  %3994 = vmatmul.bf16.gmra.mxu0 %v8588_v55  ;;  %4043 = vmatmul.bf16.gmra.mxu1 %v10941_v57 }
 0x415   :  { %10958 = vst [vmem:[#allocation18_spill] sm:$0xff] %v9767_v22  ;;  %4082 = vmatmul.bf16.gmra.mxu2 %v9113_v4  ;;  %4131 = vmatmul.bf16.gmra.mxu3 %v9115_v13 }
 0x416   :  { %4256 = vmatpush.bf16.msra.mxu2 %v6494_v43  ;;  %4305 = vmatpush.bf16.msra.mxu3 %v6622_v29 }
 0x418   :  { %v3887_v24 = vpop.f32.mrf.mxu2  ;;  %v3936_v9 = vpop.f32.mrf.mxu3 }
 0x419   :  { %v3888_v28 = vadd.f32 %v3887_v24, %v9665_v10  ;;  %v3801_v61 = vpop.f32.mrf.mxu0  ;;  %v3850_v19 = vpop.f32.mrf.mxu1 }
 0x41a   :  { %v3802_v21 = vadd.f32 %v3801_v61, %v9499_v12 }
 0x41b   :  { %v9789_v32 = vadd.f32 %v3936_v9, %v3888_v28  ;;  %v6603_v9 = vld [vmem:[%s10882_s5 + $0x318] sm:$0xf0] }
 0x41c   :  { %v3851_v17 = vadd.f32 %v3850_v19, %v3802_v21 }
 0x420   :  { %v3889_v34 = vpop.f32.mrf.mxu2  ;;  %v3938_v22 = vpop.f32.mrf.mxu3 }
 0x421   :  { %v3890_v1 = vadd.f32 %v3889_v34, %v9693_v18  ;;  %v3804_v11 = vpop.f32.mrf.mxu0  ;;  %v3853_v41 = vpop.f32.mrf.mxu1  ;;  %v6475_v18 = vld [vmem:[%s10882_s5 + $0x218] sm:$0xf0]  ;;  %v9818_v34 = vld [vmem:[%s10883_s6] sm:$0xf] }
 0x422   :  { %v3805_v26 = vadd.f32 %v3804_v11, %v9499_v12  ;;  %v6478_v24 = vor.u32 %v7080_v23, %v6475_v18 }
 0x423   :  { %v9793_v40 = vadd.f32 %v3938_v22, %v3890_v1  ;;  %v9821_v1 = vperm.slane %v9818_v34, 2 }
 0x424   :  { %v3854_v10 = vadd.f32 %v3853_v41, %v3805_v26  ;;  %3999 = vmatmul.bf16.gmra.mxu0 %v8627_v50  ;;  %4048 = vmatmul.bf16.gmra.mxu1 %v8629_v15  ;;  %v7112_v41 = vld [vmem:[%s10882_s5 + $0x30c] sm:$0xf] }
 0x425   :  { %4087 = vmatmul.bf16.gmra.mxu2 %v9141_v45  ;;  %4136 = vmatmul.bf16.gmra.mxu3 %v9143_v33  ;;  %v6606_v61 = vor.u32 %v7112_v41, %v6603_v9 }
 0x426   :  { %4257 = vmatpush.bf16.msra.mxu2 %v6478_v24 }
 0x427   :  { %4306 = vmatpush.bf16.msra.mxu3 %v6606_v61 }
 0x428   :  { %v3892_v26 = vpop.f32.mrf.mxu2  ;;  %v3941_v22 = vpop.f32.mrf.mxu3 }
 0x429   :  { %v3893_v43 = vadd.f32 %v3892_v26, %v9705_v48  ;;  %v3806_v47 = vpop.f32.mrf.mxu0  ;;  %v3855_v28 = vpop.f32.mrf.mxu1 }
 0x42a   :  { %v3807_v19 = vadd.f32 %v3806_v47, %v9499_v12 }
 0x42b   :  { %v9813_v29 = vadd.f32 %v3941_v22, %v3893_v43 }
 0x42c   :  { %v3856_v21 = vadd.f32 %v3855_v28, %v3807_v19 }
 0x430   :  { %v3894_v11 = vpop.f32.mrf.mxu2  ;;  %v3943_v48 = vpop.f32.mrf.mxu3 }
 0x431   :  { %v3895_v23 = vadd.f32 %v3894_v11, %v9748_v49  ;;  %v3965_v18 = vpop.f32.mrf.mxu0  ;;  %v4014_v41 = vpop.f32.mrf.mxu1 }
 0x432   :  { %v3966_v12 = vadd.f32 %v3965_v18, %v9821_v1 }
 0x433   :  { %v9825_v26 = vadd.f32 %v3943_v48, %v3895_v23 }
 0x434   :  { %v4015_v22 = vadd.f32 %v4014_v41, %v3966_v12  ;;  %4160 = vmatmul.bf16.vlgmr.msra.gmra.mxu0 %v8395_v54  ;;  %4209 = vmatmul.bf16.vlgmr.msra.gmra.mxu1 %v8397_v62 }
 0x435   :  { %4092 = vmatmul.bf16.gmra.mxu2 %v9178_v53  ;;  %4141 = vmatmul.bf16.gmra.mxu3 %v9180_v56 }
 0x438   :  { %v3897_v24 = vpop.f32.mrf.mxu2  ;;  %v3946_v9 = vpop.f32.mrf.mxu3 }
 0x439   :  { %v3898_v43 = vadd.f32 %v3897_v24, %v9769_v3  ;;  %v3967_v49 = vpop.f32.mrf.mxu0  ;;  %v4016_v47 = vpop.f32.mrf.mxu1 }
 0x43a   :  { %v3968_v28 = vadd.f32 %v3967_v49, %v9821_v1 }
 0x43b   :  { %v9833_v61 = vadd.f32 %v3946_v9, %v3898_v43 }
 0x43c   :  { %v4017_v19 = vadd.f32 %v4016_v47, %v3968_v28 }
 0x440   :  { %v3899_v11 = vpop.f32.mrf.mxu2  ;;  %v3948_v48 = vpop.f32.mrf.mxu3 }
 0x441   :  { %v3900_v54 = vadd.f32 %v3899_v11, %v3851_v17  ;;  %v3970_v23 = vpop.f32.mrf.mxu0  ;;  %v4019_v62 = vpop.f32.mrf.mxu1 }
 0x442   :  { %v3971_v18 = vadd.f32 %v3970_v23, %v9821_v1 }
 0x443   :  { %v9836_v41 = vadd.f32 %v3948_v48, %v3900_v54 }
 0x444   :  { %v4020_v12 = vadd.f32 %v4019_v62, %v3971_v18  ;;  %4165 = vmatmul.bf16.gmra.mxu0 %v8434_v38  ;;  %4214 = vmatmul.bf16.gmra.mxu1 %v8436_v25 }
 0x445   :  { %4097 = vmatmul.bf16.gmra.mxu2 %v9224_v31  ;;  %4146 = vmatmul.bf16.gmra.mxu3 %v9226_v8 }
 0x448   :  { %v3902_v3 = vpop.f32.mrf.mxu2  ;;  %v3951_v24 = vpop.f32.mrf.mxu3 }
 0x449   :  { %v3903_v9 = vadd.f32 %v3902_v3, %v3854_v10  ;;  %v3972_v43 = vpop.f32.mrf.mxu0  ;;  %v4021_v17 = vpop.f32.mrf.mxu1 }
 0x44a   :  { %v3973_v49 = vadd.f32 %v3972_v43, %v9821_v1 }
 0x44b   :  { %v9843_v47 = vadd.f32 %v3951_v24, %v3903_v9 }
 0x44c   :  { %v4022_v28 = vadd.f32 %v4021_v17, %v3973_v49 }
 0x450   :  { %v3904_v11 = vpop.f32.mrf.mxu2  ;;  %v3953_v48 = vpop.f32.mrf.mxu3 }
 0x451   :  { %v3905_v54 = vadd.f32 %v3904_v11, %v3856_v21  ;;  %v3975_v38 = vpop.f32.mrf.mxu0  ;;  %v4024_v23 = vpop.f32.mrf.mxu1 }
 0x452   :  { %v3976_v25 = vadd.f32 %v3975_v38, %v9821_v1 }
 0x453   :  { %v9846_v62 = vadd.f32 %v3953_v48, %v3905_v54 }
 0x454   :  { %v4025_v18 = vadd.f32 %v4024_v23, %v3976_v25  ;;  %4170 = vmatmul.bf16.gmra.mxu0 %v8472_v46  ;;  %4219 = vmatmul.bf16.gmra.mxu1 %v8474_v16 }
 0x455   :  { %10959 = vst [vmem:[#allocation19_spill] sm:$0xff] %v9846_v62  ;;  %4258 = vmatmul.bf16.vlgmr.msra.gmra.mxu2 %v8932_v44  ;;  %4307 = vmatmul.bf16.vlgmr.msra.gmra.mxu3 %v8934_v5 }
 0x458   :  { %v4063_v10 = vpop.f32.mrf.mxu2  ;;  %v4112_v3 = vpop.f32.mrf.mxu3 }
 0x459   :  { %v4064_v24 = vadd.f32 %v4063_v10, %v4015_v22  ;;  %v3977_v9 = vpop.f32.mrf.mxu0  ;;  %v4026_v21 = vpop.f32.mrf.mxu1 }
 0x45a   :  { %v3978_v43 = vadd.f32 %v3977_v9, %v9821_v1 }
 0x45b   :  { %v9853_v17 = vadd.f32 %v4112_v3, %v4064_v24 }
 0x45c   :  { %v4027_v49 = vadd.f32 %v4026_v21, %v3978_v43 }
 0x460   :  { %v4065_v11 = vpop.f32.mrf.mxu2  ;;  %v4114_v48 = vpop.f32.mrf.mxu3 }
 0x461   :  { %v4066_v54 = vadd.f32 %v4065_v11, %v4017_v19  ;;  %v3980_v46 = vpop.f32.mrf.mxu0  ;;  %v4029_v38 = vpop.f32.mrf.mxu1 }
 0x462   :  { %v3981_v16 = vadd.f32 %v3980_v46, %v9821_v1 }
 0x463   :  { %v9856_v44 = vadd.f32 %v4114_v48, %v4066_v54 }
 0x464   :  { %v4030_v5 = vadd.f32 %v4029_v38, %v3981_v16  ;;  %4175 = vmatmul.bf16.gmra.mxu0 %v8510_v36  ;;  %4224 = vmatmul.bf16.gmra.mxu1 %v8512_v14 }
 0x465   :  { %4263 = vmatmul.bf16.gmra.mxu2 %v8970_v30  ;;  %4312 = vmatmul.bf16.gmra.mxu3 %v8972_v59 }
 0x468   :  { %v4068_v22 = vpop.f32.mrf.mxu2  ;;  %v4117_v23 = vpop.f32.mrf.mxu3 }
 0x469   :  { %v4069_v25 = vadd.f32 %v4068_v22, %v4020_v12  ;;  %v3982_v10 = vpop.f32.mrf.mxu0  ;;  %v4031_v19 = vpop.f32.mrf.mxu1 }
 0x46a   :  { %v3983_v3 = vadd.f32 %v3982_v10, %v9821_v1 }
 0x46b   :  { %v9863_v24 = vadd.f32 %v4117_v23, %v4069_v25 }
 0x46c   :  { %v4032_v9 = vadd.f32 %v4031_v19, %v3983_v3 }
 0x470   :  { %v4070_v21 = vpop.f32.mrf.mxu2  ;;  %v4119_v43 = vpop.f32.mrf.mxu3 }
 0x471   :  { %v4071_v11 = vadd.f32 %v4070_v21, %v4022_v28  ;;  %v3985_v36 = vpop.f32.mrf.mxu0  ;;  %v4034_v48 = vpop.f32.mrf.mxu1 }
 0x472   :  { %v3986_v14 = vadd.f32 %v3985_v36, %v9821_v1 }
 0x473   :  { %v9866_v30 = vadd.f32 %v4119_v43, %v4071_v11 }
 0x474   :  { %v4035_v59 = vadd.f32 %v4034_v48, %v3986_v14  ;;  %4180 = vmatmul.bf16.gmra.mxu0 %v8560_v42  ;;  %4229 = vmatmul.bf16.gmra.mxu1 %v8562_v39 }
 0x475   :  { %4268 = vmatmul.bf16.gmra.mxu2 %v9008_v58  ;;  %4317 = vmatmul.bf16.gmra.mxu3 %v9010_v0 }
 0x478   :  { %v4073_v12 = vpop.f32.mrf.mxu2  ;;  %v4122_v54 = vpop.f32.mrf.mxu3 }
 0x479   :  { %v4074_v46 = vadd.f32 %v4073_v12, %v4025_v18  ;;  %v9872_v38 = vpop.f32.mrf.mxu0  ;;  %v9874_v28 = vpop.f32.mrf.mxu1 }
 0x47b   :  { %v9876_v16 = vadd.f32 %v4122_v54, %v4074_v46 }
 0x480   :  { %v4075_v22 = vpop.f32.mrf.mxu2  ;;  %v4124_v23 = vpop.f32.mrf.mxu3 }
 0x481   :  { %v4076_v25 = vadd.f32 %v4075_v22, %v4027_v49  ;;  %v3990_v10 = vpop.f32.mrf.mxu0  ;;  %v4039_v42 = vpop.f32.mrf.mxu1 }
 0x482   :  { %v3991_v39 = vadd.f32 %v3990_v10, %v9821_v1 }
 0x483   :  { %v9879_v19 = vadd.f32 %v4124_v23, %v4076_v25 }
 0x484   :  { %v4040_v58 = vadd.f32 %v4039_v42, %v3991_v39  ;;  %4185 = vmatmul.bf16.gmra.mxu0 %v8574_v35  ;;  %4234 = vmatmul.bf16.gmra.mxu1 %v8576_v7 }
 0x485   :  { %4273 = vmatmul.bf16.gmra.mxu2 %v9046_v2  ;;  %4322 = vmatmul.bf16.gmra.mxu3 %v9048_v52 }
 0x488   :  { %v4078_v0 = vpop.f32.mrf.mxu2  ;;  %v4127_v18 = vpop.f32.mrf.mxu3 }
 0x489   :  { %v4079_v3 = vadd.f32 %v4078_v0, %v4030_v5  ;;  %v9885_v21 = vpop.f32.mrf.mxu0  ;;  %v9887_v49 = vpop.f32.mrf.mxu1 }
 0x48b   :  { %v9889_v43 = vadd.f32 %v4127_v18, %v4079_v3 }
 0x490   :  { %v4080_v11 = vpop.f32.mrf.mxu2  ;;  %v4129_v36 = vpop.f32.mrf.mxu3 }
 0x491   :  { %v4081_v48 = vadd.f32 %v4080_v11, %v4032_v9  ;;  %v3995_v14 = vpop.f32.mrf.mxu0  ;;  %v4044_v35 = vpop.f32.mrf.mxu1 }
 0x492   :  { %v3996_v7 = vadd.f32 %v3995_v14, %v9821_v1 }
 0x493   :  { %v9892_v12 = vadd.f32 %v4129_v36, %v4081_v48 }
 0x494   :  { %v4045_v2 = vadd.f32 %v4044_v35, %v3996_v7  ;;  %4190 = vmatmul.bf16.gmra.mxu0 %v8588_v55  ;;  %4239 = vmatmul.bf16.gmra.mxu1 %v10941_v57 }
 0x495   :  { %4278 = vmatmul.bf16.gmra.mxu2 %v9113_v4  ;;  %4327 = vmatmul.bf16.gmra.mxu3 %v9115_v13 }
 0x498   :  { %v4083_v52 = vpop.f32.mrf.mxu2  ;;  %v4132_v5 = vpop.f32.mrf.mxu3 }
 0x499   :  { %v4084_v54 = vadd.f32 %v4083_v52, %v4035_v59  ;;  %v9898_v46 = vpop.f32.mrf.mxu0  ;;  %v9900_v9 = vpop.f32.mrf.mxu1 }
 0x49b   :  { %v9902_v22 = vadd.f32 %v4132_v5, %v4084_v54 }
 0x4a0   :  { %v9904_v23 = vpop.f32.mrf.mxu2  ;;  %v9906_v25 = vpop.f32.mrf.mxu3 }
 0x4a1   :  { %v4000_v55 = vpop.f32.mrf.mxu0  ;;  %v4049_v10 = vpop.f32.mrf.mxu1 }
 0x4a2   :  { %v4001_v57 = vadd.f32 %v4000_v55, %v9821_v1 }
 0x4a4   :  { %v4050_v4 = vadd.f32 %v4049_v10, %v4001_v57  ;;  %4195 = vmatmul.bf16.gmra.mxu0 %v8627_v50  ;;  %4244 = vmatmul.bf16.gmra.mxu1 %v8629_v15 }
 0x4a5   :  { %4283 = vmatmul.bf16.gmra.mxu2 %v9141_v45  ;;  %4332 = vmatmul.bf16.gmra.mxu3 %v9143_v33 }
 0x4a8   :  { %v4088_v13 = vpop.f32.mrf.mxu2  ;;  %v4137_v59 = vpop.f32.mrf.mxu3 }
 0x4a9   :  { %v4089_v42 = vadd.f32 %v4088_v13, %v4040_v58  ;;  %v9913_v39 = vpop.f32.mrf.mxu0  ;;  %v9917_v18 = vpop.f32.mrf.mxu1 }
 0x4ab   :  { %v9915_v0 = vadd.f32 %v4137_v59, %v4089_v42  ;;  %v9954_v42 = vmax.f32 %v9853_v17, 0.0 }
 0x4ad   :  { %10962 = vst [vmem:[#allocation22_spill] sm:$0xff] %v9954_v42 }
 0x4b0   :  { %v9919_v3 = vpop.f32.mrf.mxu2  ;;  %v9921_v11 = vpop.f32.mrf.mxu3 }
 0x4b1   :  { %v4161_v50 = vpop.f32.mrf.mxu0  ;;  %v4210_v15 = vpop.f32.mrf.mxu1 }
 0x4b5   :  { %4288 = vmatmul.bf16.gmra.mxu2 %v9178_v53  ;;  %4337 = vmatmul.bf16.gmra.mxu3 %v9180_v56 }
 0x4b8   :  { %v4093_v45 = vpop.f32.mrf.mxu2  ;;  %v4142_v33 = vpop.f32.mrf.mxu3 }
 0x4b9   :  { %v4094_v36 = vadd.f32 %v4093_v45, %v4045_v2  ;;  %v4163_v48 = vpop.f32.mrf.mxu0  ;;  %v4212_v7 = vpop.f32.mrf.mxu1  ;;  %v9936_v2 = vperm.slane %v9818_v34, 3 }
 0x4bb   :  { %v9925_v58 = vadd.f32 %v4142_v33, %v4094_v36  ;;  %v4162_v59 = vadd.f32 %v4161_v50, %v9936_v2 }
 0x4bd   :  { %v4211_v34 = vadd.f32 %v4210_v15, %v4162_v59  ;;  %v9968_v59 = vmax.f32 %v9623_v6, 0.0 }
 0x4c0   :  { %v9927_v14 = vpop.f32.mrf.mxu2  ;;  %v9929_v35 = vpop.f32.mrf.mxu3 }
 0x4c1   :  { %v4166_v52 = vpop.f32.mrf.mxu0  ;;  %v4215_v54 = vpop.f32.mrf.mxu1 }
 0x4c5   :  { %4293 = vmatmul.bf16.gmra.mxu2 %v9224_v31  ;;  %4342 = vmatmul.bf16.gmra.mxu3 %v9226_v8  ;;  %v9946_v31 = vmax.f32 %v9611_v63, 0.0 }
 0x4c7   :  { %10960 = vst [vmem:[#allocation20_spill] sm:$0xff] %v9946_v31  ;;  %v4516_v45 = vmul.f32 %v9946_v31, %v9946_v31 }
 0x4c8   :  { %v4098_v53 = vpop.f32.mrf.mxu2  ;;  %v4147_v5 = vpop.f32.mrf.mxu3 }
 0x4c9   :  { %v4099_v56 = vadd.f32 %v4098_v53, %v4050_v4  ;;  %v9938_v57 = vpop.f32.mrf.mxu0  ;;  %v9948_v8 = vpop.f32.mrf.mxu1  ;;  %v9951_v4 = vmax.f32 %v9288_v51, 0.0  ;;  %v4164_v51 = vadd.f32 %v4163_v48, %v9936_v2  ;;  %v7150_v48 = vld [vmem:[%s10884_s7 + $0x38] sm:$0xff] }
 0x4ca   :  { %5319 = vmatpush.bf16.msrb.mxu0 %v7150_v48 }
 0x4cb   :  { %v9933_v55 = vadd.f32 %v4147_v5, %v4099_v56  ;;  %10961 = vst [vmem:[#allocation21_spill] sm:$0xff] %v9951_v4  ;;  %v4515_v63 = vmul.f32 %v9951_v4, %v9951_v4  ;;  %v4517_v5 = vmul.f32 %v9954_v42, %v9954_v42  ;;  %v4412_v17 = vadd.f32 %v9946_v31, %v9951_v4 }
 0x4cd   :  { %v4579_v15 = vadd.f32 %v4516_v45, %v4515_v63  ;;  %v9983_v45 = vmax.f32 %v9300_v20, 0.0  ;;  %v4213_v63 = vadd.f32 %v4212_v7, %v4164_v51  ;;  %v4520_v20 = vmul.f32 %v9968_v59, %v9968_v59 }
 0x4ce   :  { %v4167_v51 = vadd.f32 %v4166_v52, %v9936_v2  ;;  %v7158_v52 = vld [vmem:[%s10884_s7 + $0x78] sm:$0xff] }
 0x4cf   :  { %v4580_v6 = vadd.f32 %v4579_v15, %v4517_v5  ;;  %v4519_v7 = vmul.f32 %v9983_v45, %v9983_v45  ;;  %5368 = vmatpush.bf16.msrb.mxu1 %v7158_v52  ;;  %v10035_v52 = vmax.f32 %v9663_v37, 0.0  ;;  %v10967_v37 = vld [vmem:[#allocation2_spill] sm:$0xff] }
 0x4d0   :  { %v9940_v10 = vpop.f32.mrf.mxu2  ;;  %v9942_v13 = vpop.f32.mrf.mxu3 }
 0x4d1   :  { %v9958_v53 = vpop.f32.mrf.mxu0  ;;  %10966 = vst [vmem:[#allocation26_spill] sm:$0xff] %v10035_v52 }
 0x4d8   :  { %v4259_v33 = vpop.f32.mrf.mxu2  ;;  %v4308_v36 = vpop.f32.mrf.mxu3 }
 0x4d9   :  { %v4260_v50 = vadd.f32 %v4259_v33, %v4211_v34  ;;  %v4413_v34 = vadd.f32 %v4412_v17, %v9954_v42  ;;  %v7166_v33 = vld [vmem:[%s10884_s7 + $0xb8] sm:$0xff]  ;;  %v9998_v15 = vpop.f32.mrf.mxu0 }
 0x4da   :  { %5417 = vmatpush.bf16.msrb.mxu2 %v7166_v33  ;;  %v4417_v33 = vadd.f32 %v9968_v59, %v9983_v45 }
 0x4db   :  { %v4309_v56 = vadd.f32 %v4308_v36, %v4260_v50  ;;  %v7174_v36 = vld [vmem:[%s10884_s7 + $0xf8] sm:$0xff]  ;;  %v9986_v50 = vmax.f32 %v9856_v44, 0.0 }
 0x4dc   :  { %5466 = vmatpush.bf16.msrb.mxu3 %v7174_v36  ;;  %v10005_v36 = vmax.f32 %v9651_v60, 0.0 }
 0x4dd   :  { %v9970_v62 = vmax.f32 %v4309_v56, 0.0  ;;  %10963 = vst [vmem:[#allocation23_spill] sm:$0xff] %v9986_v50  ;;  %v9988_v56 = vpop.f32.mrf.mxu1  ;;  %v4521_v48 = vmul.f32 %v9986_v50, %v9986_v50 }
 0x4de   :  { %10964 = vst [vmem:[#allocation24_spill] sm:$0xff] %v10005_v36 }
 0x4df   :  { %v4414_v17 = vadd.f32 %v4413_v34, %v9970_v62  ;;  %v4518_v42 = vmul.f32 %v9970_v62, %v9970_v62 }
 0x4e0   :  { %v4261_v31 = vpop.f32.mrf.mxu2  ;;  %v4310_v4 = vpop.f32.mrf.mxu3 }
 0x4e1   :  { %v4262_v5 = vadd.f32 %v4261_v31, %v4213_v63  ;;  %4415 = vadd.xlane.f32.xlu0 %v4414_v17  ;;  %v4581_v44 = vadd.f32 %v4580_v6, %v4518_v42  ;;  %v4418_v42 = vadd.f32 %v4417_v33, %v9986_v50  ;;  %v4584_v6 = vadd.f32 %v4520_v20, %v4519_v7 }
 0x4e2   :  { %v10017_v63 = vmax.f32 %v9863_v24, 0.0  ;;  %v4216_v17 = vadd.f32 %v4215_v54, %v4167_v51  ;;  %v4524_v20 = vmul.f32 %v10005_v36, %v10005_v36  ;;  %v4169_v51 = vadd.f32 %v9938_v57, %v9936_v2  ;;  %v7149_v57 = vld [vmem:[%s10884_s7 + $0x30] sm:$0xff] }
 0x4e3   :  { %v4311_v34 = vadd.f32 %v4310_v4, %v4262_v5  ;;  %4582 = vadd.xlane.f32.xlu1 %v4581_v44  ;;  %v10014_v4 = vmax.f32 %v9328_v27, 0.0  ;;  %v4585_v44 = vadd.f32 %v4584_v6, %v4521_v48  ;;  %5320 = vmatpush.bf16.msrb.mxu0 %v7149_v57  ;;  %v10969_v57 = vld [vmem:[#allocation15_spill] sm:$0xff] }
 0x4e4   :  { %10965 = vst [vmem:[#allocation25_spill] sm:$0xff] %v10017_v63  ;;  %v4525_v54 = vmul.f32 %v10017_v63, %v10017_v63 }
 0x4e5   :  { %v10007_v31 = vmax.f32 %v4311_v34, 0.0  ;;  %v10024_v33 = vpop.f32.mrf.mxu1  ;;  %v4523_v24 = vmul.f32 %v10014_v4, %v10014_v4 }
 0x4e7   :  { %v4419_v5 = vadd.f32 %v4418_v42, %v10007_v31  ;;  %v4522_v60 = vmul.f32 %v10007_v31, %v10007_v31  ;;  %v4422_v42 = vadd.f32 %v10005_v36, %v10014_v4  ;;  %v4589_v6 = vadd.f32 %v4524_v20, %v4523_v24 }
 0x4e8   :  { %v4264_v7 = vpop.f32.mrf.mxu2  ;;  %v4313_v34 = vpop.f32.mrf.mxu3  ;;  %v10052_v20 = vmax.f32 %v10967_v37, 0.0  ;;  %v4528_v37 = vmul.f32 %v10035_v52, %v10035_v52 }
 0x4e9   :  { %v4265_v27 = vadd.f32 %v4264_v7, %v4216_v17  ;;  %4420 = vadd.xlane.f32.xlu0 %v4419_v5  ;;  %v4586_v50 = vadd.f32 %v4585_v44, %v4522_v60  ;;  %v10037_v17 = vpop.f32.mrf.mxu0  ;;  %v4423_v60 = vadd.f32 %v4422_v42, %v10017_v63  ;;  %v7165_v44 = vld [vmem:[%s10884_s7 + $0xb0] sm:$0xff]  ;;  %v4590_v7 = vadd.f32 %v4589_v6, %v4525_v54 }
 0x4ea   :  { %5418 = vmatpush.bf16.msrb.mxu2 %v7165_v44 }
 0x4eb   :  { %v4314_v48 = vadd.f32 %v4313_v34, %v4265_v27  ;;  %4587 = vadd.xlane.f32.xlu1 %v4586_v50  ;;  %v7173_v50 = vld [vmem:[%s10884_s7 + $0xf0] sm:$0xff]  ;;  %v10055_v34 = vmax.f32 %v9866_v30, 0.0  ;;  %v4218_v27 = vadd.f32 %v9948_v8, %v4169_v51  ;;  %v4527_v30 = vmul.f32 %v10052_v20, %v10052_v20 }
 0x4ec   :  { %5467 = vmatpush.bf16.msrb.mxu3 %v7173_v50  ;;  %v4172_v8 = vadd.f32 %v9958_v53, %v9936_v2  ;;  %v10074_v50 = vmax.f32 %v10969_v57, 0.0  ;;  %v7157_v53 = vld [vmem:[%s10884_s7 + $0x70] sm:$0xff] }
 0x4ed   :  { %v10039_v5 = vmax.f32 %v4314_v48, 0.0  ;;  %10968 = vst [vmem:[#allocation2_spill] sm:$0xff] %v10055_v34  ;;  %v10067_v51 = vpop.f32.mrf.mxu1  ;;  %v4529_v44 = vmul.f32 %v10055_v34, %v10055_v34  ;;  %5369 = vmatpush.bf16.msrb.mxu1 %v7157_v53  ;;  %v10974_v53 = vld [vmem:[#allocation16_spill] sm:$0xff] }
 0x4ee   :  { %10970 = vst [vmem:[#allocation15_spill] sm:$0xff] %v10074_v50 }
 0x4ef   :  { %v4424_v24 = vadd.f32 %v4423_v60, %v10039_v5  ;;  %v4526_v48 = vmul.f32 %v10039_v5, %v10039_v5  ;;  %v4427_v60 = vadd.f32 %v10035_v52, %v10052_v20  ;;  %v10105_v52 = vmax.f32 %v10974_v53, 0.0 }
 0x4f0   :  { %v4266_v42 = vpop.f32.mrf.mxu2  ;;  %v4315_v63 = vpop.f32.mrf.mxu3 }
 0x4f1   :  { %v4267_v36 = vadd.f32 %v4266_v42, %v4218_v27  ;;  %4425 = vadd.xlane.f32.xlu2 %v4424_v24  ;;  %v4591_v54 = vadd.f32 %v4590_v7, %v4526_v48  ;;  %v4428_v27 = vadd.f32 %v4427_v60, %v10055_v34  ;;  %v4594_v24 = vadd.f32 %v4528_v37, %v4527_v30 }
 0x4f2   :  { %v10086_v48 = vmax.f32 %v9876_v16, 0.0  ;;  %v4221_v42 = vadd.f32 %v9988_v56, %v4172_v8  ;;  %v4532_v30 = vmul.f32 %v10074_v50, %v10074_v50  ;;  %10975 = vst [vmem:[#allocation16_spill] sm:$0xff] %v10105_v52 }
 0x4f3   :  { %v4316_v6 = vadd.f32 %v4315_v63, %v4267_v36  ;;  %4592 = vadd.xlane.f32.xlu0 %v4591_v54  ;;  %v10972_v36 = vld [vmem:[#allocation7_spill] sm:$0xff]  ;;  %v10089_v54 = vpop.f32.mrf.mxu0  ;;  %v4595_v37 = vadd.f32 %v4594_v24, %v4529_v44 }
 0x4f4   :  { %v10083_v63 = vmax.f32 %v10972_v36, 0.0  ;;  %10973 = vst [vmem:[#allocation7_spill] sm:$0xff] %v10086_v48  ;;  %v4533_v8 = vmul.f32 %v10086_v48, %v10086_v48 }
 0x4f5   :  { %v10076_v7 = vmax.f32 %v4316_v6, 0.0 }
 0x4f6   :  { %v4531_v56 = vmul.f32 %v10083_v63, %v10083_v63  ;;  %v4432_v44 = vadd.f32 %v10074_v50, %v10083_v63 }
 0x4f7   :  { %10971 = vst [vmem:[#allocation27_spill] sm:$0xff] %v10076_v7  ;;  %v4429_v6 = vadd.f32 %v4428_v27, %v10076_v7  ;;  %v4530_v60 = vmul.f32 %v10076_v7, %v10076_v7  ;;  %v4174_v27 = vadd.f32 %v9998_v15, %v9936_v2  ;;  %v7148_v15 = vld [vmem:[%s10884_s7 + $0x28] sm:$0xff] }
 0x4f8   :  { %v4269_v57 = vpop.f32.mrf.mxu2  ;;  %v4318_v36 = vpop.f32.mrf.mxu3  ;;  %v4599_v24 = vadd.f32 %v4532_v30, %v4531_v56  ;;  %v10976_v30 = vld [vmem:[#allocation3_spill] sm:$0xff]  ;;  %5321 = vmatpush.bf16.msrb.mxu0 %v7148_v15  ;;  %v10978_v15 = vld [vmem:[#allocation17_spill] sm:$0xff] }
 0x4f9   :  { %v4270_v34 = vadd.f32 %v4269_v57, %v4221_v42  ;;  %4430 = vadd.xlane.f32.xlu2 %v4429_v6  ;;  %v4596_v16 = vadd.f32 %v4595_v37, %v4530_v60  ;;  %v10107_v42 = vpop.f32.mrf.mxu1  ;;  %v4433_v60 = vadd.f32 %v4432_v44, %v10086_v48  ;;  %v7164_v37 = vld [vmem:[%s10884_s7 + $0xa8] sm:$0xff]  ;;  %v10122_v57 = vmax.f32 %v10976_v30, 0.0 }
 0x4fa   :  { %5419 = vmatpush.bf16.msrb.mxu2 %v7164_v37  ;;  %v4536_v30 = vmul.f32 %v10105_v52, %v10105_v52 }
 0x4fb   :  { %v4319_v7 = vadd.f32 %v4318_v36, %v4270_v34  ;;  %4597 = vadd.xlane.f32.xlu1 %v4596_v16  ;;  %v7172_v34 = vld [vmem:[%s10884_s7 + $0xe8] sm:$0xff]  ;;  %v4600_v36 = vadd.f32 %v4599_v24, %v4533_v8  ;;  %v4223_v16 = vadd.f32 %v10024_v33, %v4174_v27  ;;  %v4181_v50 = vpop.f32.mrf.mxu0  ;;  %v4535_v33 = vmul.f32 %v10122_v57, %v10122_v57 }
 0x4fc   :  { %5468 = vmatpush.bf16.msrb.mxu3 %v7172_v34  ;;  %v4177_v27 = vadd.f32 %v10037_v17, %v9936_v2  ;;  %v10142_v34 = vmax.f32 %v10978_v15, 0.0  ;;  %v7156_v17 = vld [vmem:[%s10884_s7 + $0x68] sm:$0xff] }
 0x4fd   :  { %v10109_v6 = vmax.f32 %v4319_v7, 0.0  ;;  %v10125_v7 = vmax.f32 %v9879_v19, 0.0  ;;  %5370 = vmatpush.bf16.msrb.mxu1 %v7156_v17  ;;  %v10983_v17 = vld [vmem:[#allocation18_spill] sm:$0xff] }
 0x4fe   :  { %10979 = vst [vmem:[#allocation17_spill] sm:$0xff] %v10142_v34 }
 0x4ff   :  { %10977 = vst [vmem:[#allocation3_spill] sm:$0xff] %v10125_v7  ;;  %v4434_v56 = vadd.f32 %v4433_v60, %v10109_v6  ;;  %v4534_v44 = vmul.f32 %v10109_v6, %v10109_v6  ;;  %v4437_v60 = vadd.f32 %v10105_v52, %v10122_v57  ;;  %v4537_v37 = vmul.f32 %v10125_v7, %v10125_v7 }
 0x500   :  { %v4271_v53 = vpop.f32.mrf.mxu2  ;;  %v4320_v48 = vpop.f32.mrf.mxu3 }
 0x501   :  { %v4272_v8 = vadd.f32 %v4271_v53, %v4223_v16  ;;  %4435 = vadd.xlane.f32.xlu2 %v4434_v56  ;;  %v4601_v19 = vadd.f32 %v4600_v36, %v4534_v44  ;;  %v4438_v36 = vadd.f32 %v4437_v60, %v10125_v7  ;;  %v4604_v56 = vadd.f32 %v4536_v30, %v4535_v33 }
 0x502   :  { %v10154_v53 = vmax.f32 %v9889_v43, 0.0  ;;  %v4540_v30 = vmul.f32 %v10142_v34, %v10142_v34 }
 0x503   :  { %v4321_v24 = vadd.f32 %v4320_v48, %v4272_v8  ;;  %4602 = vadd.xlane.f32.xlu1 %v4601_v19  ;;  %v10981_v48 = vld [vmem:[#allocation4_spill] sm:$0xff]  ;;  %v4226_v8 = vadd.f32 %v10067_v51, %v4177_v27  ;;  %v4230_v19 = vpop.f32.mrf.mxu1  ;;  %v4605_v60 = vadd.f32 %v4604_v56, %v4537_v37  ;;  %v4179_v27 = vadd.f32 %v10089_v54, %v9936_v2  ;;  %v7147_v54 = vld [vmem:[%s10884_s7 + $0x20] sm:$0xff] }
 0x504   :  { %v10151_v44 = vmax.f32 %v10981_v48, 0.0  ;;  %10982 = vst [vmem:[#allocation4_spill] sm:$0xff] %v10154_v53  ;;  %v4541_v51 = vmul.f32 %v10154_v53, %v10154_v53  ;;  %5322 = vmatpush.bf16.msrb.mxu0 %v7147_v54 }
 0x505   :  { %v10144_v16 = vmax.f32 %v4321_v24, 0.0 }
 0x506   :  { %v4539_v43 = vmul.f32 %v10151_v44, %v10151_v44  ;;  %v4442_v56 = vadd.f32 %v10142_v34, %v10151_v44 }
 0x507   :  { %10980 = vst [vmem:[#allocation28_spill] sm:$0xff] %v10144_v16  ;;  %v4439_v15 = vadd.f32 %v4438_v36, %v10144_v16  ;;  %v4538_v24 = vmul.f32 %v10144_v16, %v10144_v16  ;;  %v4183_v36 = vpop.f32.mrf.mxu0  ;;  %v10171_v16 = vmax.f32 %v10983_v17, 0.0 }
 0x508   :  { %v4274_v33 = vpop.f32.mrf.mxu2  ;;  %v4323_v7 = vpop.f32.mrf.mxu3 }
 0x509   :  { %v4275_v48 = vadd.f32 %v4274_v33, %v4226_v8  ;;  %4440 = vadd.xlane.f32.xlu0 %v4439_v15  ;;  %v4606_v52 = vadd.f32 %v4605_v60, %v4538_v24  ;;  %v4609_v8 = vadd.f32 %v4540_v30, %v4539_v43  ;;  %v4443_v24 = vadd.f32 %v4442_v56, %v10154_v53  ;;  %v7163_v60 = vld [vmem:[%s10884_s7 + $0xa0] sm:$0xff] }
 0x50a   :  { %v10189_v30 = vmax.f32 %v9892_v12, 0.0  ;;  %v4228_v43 = vadd.f32 %v10107_v42, %v4179_v27  ;;  %5420 = vmatpush.bf16.msrb.mxu2 %v7163_v60  ;;  %v4544_v17 = vmul.f32 %v10171_v16, %v10171_v16  ;;  %v3988_v12 = vadd.f32 %v9872_v38, %v9821_v1 }
 0x50b   :  { %v4324_v37 = vadd.f32 %v4323_v7, %v4275_v48  ;;  %4607 = vadd.xlane.f32.xlu2 %v4606_v52  ;;  %v7171_v52 = vld [vmem:[%s10884_s7 + $0xe0] sm:$0xff]  ;;  %v4610_v48 = vadd.f32 %v4609_v8, %v4541_v51 }
 0x50c   :  { %v10984_v7 = vld [vmem:[#allocation5_spill] sm:$0xff]  ;;  %10985 = vst [vmem:[#allocation18_spill] sm:$0xff] %v10189_v30  ;;  %5469 = vmatpush.bf16.msrb.mxu3 %v7171_v52  ;;  %v4545_v8 = vmul.f32 %v10189_v30, %v10189_v30  ;;  %v10207_v52 = vmax.f32 %v9789_v32, 0.0 }
 0x50d   :  { %v10173_v15 = vmax.f32 %v4324_v37, 0.0  ;;  %v10186_v33 = vmax.f32 %v10984_v7, 0.0  ;;  %v4232_v7 = vpop.f32.mrf.mxu1 }
 0x50f   :  { %v4444_v37 = vadd.f32 %v4443_v24, %v10173_v15  ;;  %v4542_v56 = vmul.f32 %v10173_v15, %v10173_v15  ;;  %v4543_v27 = vmul.f32 %v10186_v33, %v10186_v33  ;;  %v4182_v24 = vadd.f32 %v4181_v50, %v9936_v2  ;;  %v7155_v50 = vld [vmem:[%s10884_s7 + $0x60] sm:$0xff] }
 0x510   :  { %v4276_v53 = vpop.f32.mrf.mxu2  ;;  %v4325_v34 = vpop.f32.mrf.mxu3  ;;  %v4447_v54 = vadd.f32 %v10171_v16, %v10186_v33  ;;  %5371 = vmatpush.bf16.msrb.mxu1 %v7155_v50  ;;  %v10237_v50 = vmax.f32 %v9793_v40, 0.0 }
 0x511   :  { %v4277_v51 = vadd.f32 %v4276_v53, %v4228_v43  ;;  %4445 = vadd.xlane.f32.xlu0 %v4444_v37  ;;  %v4611_v42 = vadd.f32 %v4610_v48, %v4542_v56  ;;  %v4614_v38 = vadd.f32 %v4544_v17, %v4543_v27  ;;  %v4037_v53 = vadd.f32 %v9874_v28, %v3988_v12  ;;  %v4186_v48 = vpop.f32.mrf.mxu0 }
 0x512   :  { %v4448_v37 = vadd.f32 %v4447_v54, %v10189_v30  ;;  %v4548_v27 = vmul.f32 %v10207_v52, %v10207_v52 }
 0x513   :  { %v4326_v60 = vadd.f32 %v4325_v34, %v4277_v51  ;;  %4612 = vadd.xlane.f32.xlu2 %v4611_v42  ;;  %v10986_v34 = vld [vmem:[#allocation6_spill] sm:$0xff]  ;;  %v10220_v51 = vmax.f32 %v9902_v22, 0.0  ;;  %v4615_v32 = vadd.f32 %v4614_v38, %v4545_v8  ;;  %v4086_v17 = vadd.f32 %v9904_v23, %v4037_v53 }
 0x514   :  { %v10217_v56 = vmax.f32 %v10986_v34, 0.0  ;;  %v4231_v42 = vadd.f32 %v4230_v19, %v4182_v24  ;;  %v4184_v8 = vadd.f32 %v4183_v36, %v9936_v2  ;;  %v7146_v36 = vld [vmem:[%s10884_s7 + $0x18] sm:$0xff] }
 0x515   :  { %v10210_v43 = vmax.f32 %v4326_v60, 0.0  ;;  %v4549_v23 = vmul.f32 %v10220_v51, %v10220_v51  ;;  %v4135_v19 = vadd.f32 %v9906_v25, %v4086_v17  ;;  %v4235_v24 = vpop.f32.mrf.mxu1  ;;  %v7162_v25 = vld [vmem:[%s10884_s7 + $0x98] sm:$0xff]  ;;  %5323 = vmatpush.bf16.msrb.mxu0 %v7146_v36  ;;  %v10271_v36 = vmax.f32 %v9813_v29, 0.0 }
 0x516   :  { %v4547_v22 = vmul.f32 %v10217_v56, %v10217_v56  ;;  %v4452_v53 = vadd.f32 %v10207_v52, %v10217_v56  ;;  %v10987_v17 = vld [vmem:[#allocation8_spill] sm:$0xff]  ;;  %5421 = vmatpush.bf16.msrb.mxu2 %v7162_v25 }
 0x517   :  { %v4449_v28 = vadd.f32 %v4448_v37, %v10210_v43  ;;  %v4546_v12 = vmul.f32 %v10210_v43, %v10210_v43 }
 0x518   :  { %v4279_v60 = vpop.f32.mrf.mxu2  ;;  %v4328_v54 = vpop.f32.mrf.mxu3  ;;  %v4619_v37 = vadd.f32 %v4548_v27, %v4547_v22  ;;  %v4233_v27 = vadd.f32 %v4232_v7, %v4184_v8  ;;  %v3993_v22 = vadd.f32 %v9885_v21, %v9821_v1 }
 0x519   :  { %v4280_v34 = vadd.f32 %v4279_v60, %v4231_v42  ;;  %4450 = vadd.xlane.f32.xlu1 %v4449_v28  ;;  %v4616_v30 = vadd.f32 %v4615_v32, %v4546_v12  ;;  %v4453_v42 = vadd.f32 %v4452_v53, %v10220_v51  ;;  %v10252_v28 = vmax.f32 %v10987_v17, 0.0  ;;  %v4188_v60 = vpop.f32.mrf.mxu0 }
 0x51a   :  { %v4620_v40 = vadd.f32 %v4619_v37, %v4549_v23  ;;  %v10254_v12 = vmax.f32 %v4135_v19, 0.0  ;;  %v4552_v23 = vmul.f32 %v10237_v50, %v10237_v50  ;;  %v4187_v37 = vadd.f32 %v4186_v48, %v9936_v2  ;;  %v7154_v48 = vld [vmem:[%s10884_s7 + $0x58] sm:$0xff] }
 0x51b   :  { %v4329_v38 = vadd.f32 %v4328_v54, %v4280_v34  ;;  %4617 = vadd.xlane.f32.xlu0 %v4616_v30  ;;  %v7170_v30 = vld [vmem:[%s10884_s7 + $0xd8] sm:$0xff]  ;;  %v4551_v8 = vmul.f32 %v10252_v28, %v10252_v28  ;;  %v4457_v25 = vadd.f32 %v10237_v50, %v10252_v28  ;;  %5372 = vmatpush.bf16.msrb.mxu1 %v7154_v48 }
 0x51c   :  { %5470 = vmatpush.bf16.msrb.mxu3 %v7170_v30  ;;  %v4553_v21 = vmul.f32 %v10254_v12, %v10254_v12  ;;  %v4042_v30 = vadd.f32 %v9887_v49, %v3993_v22 }
 0x51d   :  { %v10239_v32 = vmax.f32 %v4329_v38, 0.0  ;;  %v4237_v17 = vpop.f32.mrf.mxu1 }
 0x51e   :  { %v4091_v29 = vadd.f32 %v9919_v3, %v4042_v30 }
 0x51f   :  { %v4454_v54 = vadd.f32 %v4453_v42, %v10239_v32  ;;  %v4550_v34 = vmul.f32 %v10239_v32, %v10239_v32 }
 0x520   :  { %v4281_v38 = vpop.f32.mrf.mxu2  ;;  %v4330_v53 = vpop.f32.mrf.mxu3 }
 0x521   :  { %v4282_v19 = vadd.f32 %v4281_v38, %v4233_v27  ;;  %4455 = vadd.xlane.f32.xlu1 %v4454_v54  ;;  %v4621_v7 = vadd.f32 %v4620_v40, %v4550_v34  ;;  %v4458_v27 = vadd.f32 %v4457_v25, %v10254_v12  ;;  %v4624_v54 = vadd.f32 %v4552_v23, %v4551_v8  ;;  %v10988_v34 = vld [vmem:[#allocation9_spill] sm:$0xff]  ;;  %v4191_v25 = vpop.f32.mrf.mxu0 }
 0x522   :  { %v10281_v38 = vmax.f32 %v10988_v34, 0.0  ;;  %v4556_v23 = vmul.f32 %v10271_v36, %v10271_v36 }
 0x523   :  { %v4331_v42 = vadd.f32 %v4330_v53, %v4282_v19  ;;  %4622 = vadd.xlane.f32.xlu0 %v4621_v7  ;;  %v10284_v53 = vmax.f32 %v9915_v0, 0.0  ;;  %v4236_v19 = vadd.f32 %v4235_v24, %v4187_v37  ;;  %v4625_v7 = vadd.f32 %v4624_v54, %v4553_v21 }
 0x524   :  { %v4555_v3 = vmul.f32 %v10281_v38, %v10281_v38  ;;  %v4140_v24 = vadd.f32 %v9921_v11, %v4091_v29  ;;  %v4189_v21 = vadd.f32 %v4188_v60, %v9936_v2  ;;  %v10301_v54 = vmax.f32 %v9825_v26, 0.0  ;;  %v7161_v11 = vld [vmem:[%s10884_s7 + $0x90] sm:$0xff] }
 0x525   :  { %v10274_v40 = vmax.f32 %v4331_v42, 0.0  ;;  %v4557_v37 = vmul.f32 %v10284_v53, %v10284_v53  ;;  %v7145_v60 = vld [vmem:[%s10884_s7 + $0x10] sm:$0xff]  ;;  %5422 = vmatpush.bf16.msrb.mxu2 %v7161_v11 }
 0x526   :  { %v4629_v48 = vadd.f32 %v4556_v23, %v4555_v3  ;;  %v7169_v29 = vld [vmem:[%s10884_s7 + $0xd0] sm:$0xff]  ;;  %5324 = vmatpush.bf16.msrb.mxu0 %v7145_v60  ;;  %v4560_v3 = vmul.f32 %v10301_v54, %v10301_v54 }
 0x527   :  { %v4459_v49 = vadd.f32 %v4458_v27, %v10274_v40  ;;  %v4554_v22 = vmul.f32 %v10274_v40, %v10274_v40  ;;  %v4462_v27 = vadd.f32 %v10271_v36, %v10281_v38  ;;  %5471 = vmatpush.bf16.msrb.mxu3 %v7169_v29  ;;  %v10335_v29 = vmax.f32 %v9833_v61, 0.0 }
 0x528   :  { %v4284_v8 = vpop.f32.mrf.mxu2  ;;  %v4333_v42 = vpop.f32.mrf.mxu3  ;;  %v4630_v23 = vadd.f32 %v4629_v48, %v4557_v37  ;;  %v4192_v48 = vadd.f32 %v4191_v25, %v9936_v2  ;;  %v7153_v25 = vld [vmem:[%s10884_s7 + $0x50] sm:$0xff] }
 0x529   :  { %v4285_v34 = vadd.f32 %v4284_v8, %v4236_v19  ;;  %4460 = vadd.xlane.f32.xlu2 %v4459_v49  ;;  %v4626_v0 = vadd.f32 %v4625_v7, %v4554_v22  ;;  %v4463_v49 = vadd.f32 %v4462_v27, %v10284_v53  ;;  %v10989_v22 = vld [vmem:[#allocation10_spill] sm:$0xff]  ;;  %v10318_v7 = vmax.f32 %v4140_v24, 0.0  ;;  %10991 = vst [vmem:[#allocation6_spill] sm:$0xff] %v10335_v29 }
 0x52a   :  { %v10316_v26 = vmax.f32 %v10989_v22, 0.0  ;;  %v4238_v8 = vadd.f32 %v4237_v17, %v4189_v21  ;;  %v3998_v24 = vadd.f32 %v9898_v46, %v9821_v1  ;;  %5373 = vmatpush.bf16.msrb.mxu1 %v7153_v25 }
 0x52b   :  { %v4334_v30 = vadd.f32 %v4333_v42, %v4285_v34  ;;  %4627 = vadd.xlane.f32.xlu1 %v4626_v0  ;;  %10990 = vst [vmem:[#allocation5_spill] sm:$0xff] %v10318_v7  ;;  %v4240_v42 = vpop.f32.mrf.mxu1  ;;  %v4561_v21 = vmul.f32 %v10318_v7, %v10318_v7 }
 0x52c   :  { %v4559_v37 = vmul.f32 %v10316_v26, %v10316_v26  ;;  %v4467_v60 = vadd.f32 %v10301_v54, %v10316_v26 }
 0x52d   :  { %v10303_v19 = vmax.f32 %v4334_v30, 0.0 }
 0x52e   :  { %v4634_v46 = vadd.f32 %v4560_v3, %v4559_v37  ;;  %v4241_v3 = vadd.f32 %v4240_v42, %v4192_v48 }
 0x52f   :  { %v4464_v34 = vadd.f32 %v4463_v49, %v10303_v19  ;;  %v4558_v0 = vmul.f32 %v10303_v19, %v10303_v19  ;;  %v4193_v49 = vpop.f32.mrf.mxu0 }
 0x530   :  { %v4286_v30 = vpop.f32.mrf.mxu2  ;;  %v4335_v27 = vpop.f32.mrf.mxu3 }
 0x531   :  { %v4287_v22 = vadd.f32 %v4286_v30, %v4238_v8  ;;  %4465 = vadd.xlane.f32.xlu2 %v4464_v34  ;;  %v4631_v17 = vadd.f32 %v4630_v23, %v4558_v0  ;;  %v4047_v23 = vadd.f32 %v9900_v9, %v3998_v24  ;;  %v4468_v34 = vadd.f32 %v4467_v60, %v10318_v7  ;;  %v10993_v0 = vld [vmem:[#allocation11_spill] sm:$0xff] }
 0x532   :  { %v10345_v30 = vmax.f32 %v10993_v0, 0.0 }
 0x533   :  { %v4336_v11 = vadd.f32 %v4335_v27, %v4287_v22  ;;  %4632 = vadd.xlane.f32.xlu1 %v4631_v17  ;;  %v10348_v27 = vmax.f32 %v9925_v58, 0.0  ;;  %v4635_v22 = vadd.f32 %v4634_v46, %v4561_v21  ;;  %v4096_v61 = vadd.f32 %v9927_v14, %v4047_v23  ;;  %v4242_v42 = vpop.f32.mrf.mxu1 }
 0x534   :  { %10994 = vst [vmem:[#allocation9_spill] sm:$0xff] %v10345_v30  ;;  %v4564_v17 = vmul.f32 %v10335_v29, %v10335_v29  ;;  %v7212_v58 = vmov 512.0   ;;  %v4563_v14 = vmul.f32 %v10345_v30, %v10345_v30  ;;  %v4194_v46 = vadd.f32 %v4193_v49, %v9936_v2 }
 0x535   :  { %v10338_v8 = vmax.f32 %v4336_v11, 0.0  ;;  %10995 = vst [vmem:[#allocation10_spill] sm:$0xff] %v10348_v27  ;;  %7177 = vrcp.f32 %v7212_v58  ;;  %v4565_v21 = vmul.f32 %v10348_v27, %v10348_v27  ;;  %v4145_v48 = vadd.f32 %v9929_v35, %v4096_v61 }
 0x536   :  { %v4639_v25 = vadd.f32 %v4564_v17, %v4563_v14  ;;  %v4003_v17 = vadd.f32 %v9913_v39, %v9821_v1 }
 0x537   :  { %10992 = vst [vmem:[#allocation8_spill] sm:$0xff] %v10338_v8  ;;  %v4469_v9 = vadd.f32 %v4468_v34, %v10338_v8  ;;  %v4562_v24 = vmul.f32 %v10338_v8, %v10338_v8  ;;  %v4472_v34 = vadd.f32 %v10335_v29, %v10345_v30  ;;  %v10375_v49 = vmax.f32 %v4145_v48, 0.0 }
 0x538   :  { %v4289_v37 = vpop.f32.mrf.mxu2  ;;  %v4338_v11 = vpop.f32.mrf.mxu3  ;;  %v4640_v35 = vadd.f32 %v4639_v25, %v4565_v21 }
 0x539   :  { %v4290_v60 = vadd.f32 %v4289_v37, %v4241_v3  ;;  %4470 = vadd.xlane.f32.xlu0 %v4469_v9  ;;  %v4636_v0 = vadd.f32 %v4635_v22, %v4562_v24  ;;  %v10365_v22 = vmax.f32 %v9836_v41, 0.0  ;;  %v4196_v3 = vpop.f32.mrf.mxu0  ;;  %v4473_v24 = vadd.f32 %v4472_v34, %v10348_v27  ;;  %v10998_v37 = vld [vmem:[#allocation12_spill] sm:$0xff]  ;;  %11000 = vst [vmem:[#allocation30_spill] sm:$0xff] %v10375_v49 }
 0x53a   :  { %v10371_v58 = vmax.f32 %v10998_v37, 0.0  ;;  %v4569_v39 = vmul.f32 %v10375_v49, %v10375_v49  ;;  %v4052_v37 = vadd.f32 %v9917_v18, %v4003_v17 }
 0x53b   :  { %v4339_v23 = vadd.f32 %v4338_v11, %v4290_v60  ;;  %4637 = vadd.xlane.f32.xlu2 %v4636_v0  ;;  %10996 = vst [vmem:[#allocation11_spill] sm:$0xff] %v10365_v22  ;;  %v10373_v61 = vpop.eup %7177  ;;  %v4243_v11 = vadd.f32 %v4242_v42, %v4194_v46  ;;  %v4197_v46 = vadd.f32 %v4196_v3, %v9936_v2  ;;  %v11003_v3 = vld [vmem:[#allocation13_spill] sm:$0xff] }
 0x53c   :  { %10999 = vst [vmem:[#allocation12_spill] sm:$0xff] %v10371_v58  ;;  %v4567_v48 = vmul.f32 %v10371_v58, %v10371_v58  ;;  %v4493_v42 = vmul.f32 512.0, %v10373_v61  ;;  %v4477_v1 = vadd.f32 %v10365_v22, %v10371_v58  ;;  %vm4497_vm0 = vweird.f32 %v10373_v61 }
 0x53d   :  { %v10367_v9 = vmax.f32 %v4339_v23, 0.0  ;;  %v4568_v23 = vmul.f32 %v10365_v22, %v10365_v22 }
 0x53f   :  { %10997 = vst [vmem:[#allocation29_spill] sm:$0xff] %v10367_v9  ;;  %v4474_v60 = vadd.f32 %v4473_v24, %v10367_v9  ;;  %v4566_v41 = vmul.f32 %v10367_v9, %v10367_v9  ;;  %v10393_v24 = vmax.f32 %v9843_v47, 0.0 }
 0x540   :  { %v4291_v0 = vpop.f32.mrf.mxu2  ;;  %v4340_v14 = vpop.f32.mrf.mxu3 }
 0x541   :  { %v4292_v34 = vadd.f32 %v4291_v0, %v4243_v11  ;;  %4475 = vadd.xlane.f32.xlu0 %v4474_v60  ;;  %v4641_v21 = vadd.f32 %v4640_v35, %v4566_v41  ;;  %11001 = vst [vmem:[#allocation31_spill] sm:$0xff] %v10393_v24  ;;  %v4245_v35 = vpop.f32.mrf.mxu1  ;;  %v4478_v60 = vadd.f32 %v4477_v1, %v10375_v49  ;;  %v10400_v0 = vmax.f32 %v11003_v3, 0.0  ;;  %v4198_v47 = vpop.f32.mrf.mxu0 }
 0x542   :  { %v4644_v41 = vadd.f32 %v4568_v23, %v4567_v48  ;;  %v4246_v22 = vadd.f32 %v4245_v35, %v4197_v46  ;;  %v4572_v23 = vmul.f32 %v10393_v24, %v10393_v24 }
 0x543   :  { %v4341_v25 = vadd.f32 %v4340_v14, %v4292_v34  ;;  %4642 = vadd.xlane.f32.xlu2 %v4641_v21  ;;  %11004 = vst [vmem:[#allocation13_spill] sm:$0xff] %v10400_v0  ;;  %v10403_v14 = vmax.f32 %v9933_v55, 0.0  ;;  %v4101_v34 = vadd.f32 %v9940_v10, %v4052_v37  ;;  %v4494_v21 = vsub.f32 1.0, %v4493_v42 }
 0x544   :  { %v4645_v17 = vadd.f32 %v4644_v41, %v4569_v39  ;;  %v4571_v10 = vmul.f32 %v10400_v0, %v10400_v0  ;;  %v4199_v39 = vadd.f32 %v4198_v47, %v9936_v2 }
 0x545   :  { %v10396_v11 = vmax.f32 %v4341_v25, 0.0  ;;  %11005 = vst [vmem:[#allocation33_spill] sm:$0xff] %v10403_v14  ;;  %v4150_v42 = vadd.f32 %v9942_v13, %v4101_v34  ;;  %v4573_v46 = vmul.f32 %v10403_v14, %v10403_v14  ;;  %v4495_v37 = vmul.f32 %v10373_v61, %v4494_v21  ;;  %v11009_v34 = vld [vmem:[#allocation14_spill] sm:$0xff] }
 0x547   :  { %11002 = vst [vmem:[#allocation32_spill] sm:$0xff] %v10396_v11  ;;  %v4479_v58 = vadd.f32 %v4478_v60, %v10396_v11  ;;  %v4570_v18 = vmul.f32 %v10396_v11, %v10396_v11  ;;  %v4482_v60 = vadd.f32 %v10393_v24, %v10400_v0  ;;  %v4496_v47 = vadd.f32 %v10373_v61, %v4495_v37 }
 0x548   :  { %v4294_v48 = vpop.f32.mrf.mxu2  ;;  %v4343_v25 = vpop.f32.mrf.mxu3 }
 0x549   :  { %v4295_v1 = vadd.f32 %v4294_v48, %v4246_v22  ;;  %4480 = vadd.xlane.f32.xlu1 %v4479_v58  ;;  %v4646_v55 = vadd.f32 %v4645_v17, %v4570_v18  ;;  %v4649_v22 = vadd.f32 %v4572_v23, %v4571_v10  ;;  %v11006_v58 = vld [vmem:[#allocation19_spill] sm:$0xff]  ;;  %v4483_v13 = vadd.f32 %v4482_v60, %v10403_v14  ;;  %v4247_v21 = vpop.f32.mrf.mxu1 }
 0x54a   :  { %v10421_v41 = vmax.f32 %v11006_v58, 0.0  ;;  %v10427_v18 = vmax.f32 %v11009_v34, 0.0  ;;  %v10429_v17 = vmax.f32 %v4150_v42, 0.0  ;;  %v4248_v48 = vadd.f32 %v4247_v21, %v4199_v39 }
 0x54b   :  { %v4344_v35 = vadd.f32 %v4343_v25, %v4295_v1  ;;  %4647 = vadd.xlane.f32.xlu0 %v4646_v55  ;;  %v4650_v2 = vadd.f32 %v4649_v22, %v4573_v46  ;;  %v7160_v46 = vld [vmem:[%s10884_s7 + $0x88] sm:$0xff]  ;;  %v10442_v39 = vsel %vm4497_vm0, %v10373_v61, %v4496_v47 }
 0x54c   :  { %11007 = vst [vmem:[#allocation19_spill] sm:$0xff] %v10421_v41  ;;  %v4576_v55 = vmul.f32 %v10421_v41, %v10421_v41  ;;  %v4577_v22 = vmul.f32 %v10429_v17, %v10429_v17  ;;  %5423 = vmatpush.bf16.msrb.mxu2 %v7160_v46  ;;  %v7168_v47 = vld [vmem:[%s10884_s7 + $0xc8] sm:$0xff] }
 0x54d   :  { %v10423_v3 = vmax.f32 %v4344_v35, 0.0  ;;  %11010 = vst [vmem:[#allocation14_spill] sm:$0xff] %v10427_v18  ;;  %v4575_v35 = vmul.f32 %v10427_v18, %v10427_v18  ;;  %5472 = vmatpush.bf16.msrb.mxu3 %v7168_v47 }
 0x54e   :  { %11011 = vst [vmem:[#allocation35_spill] sm:$0xff] %v10429_v17 }
 0x54f   :  { %11008 = vst [vmem:[#allocation34_spill] sm:$0xff] %v10423_v3  ;;  %v4484_v25 = vadd.f32 %v4483_v13, %v10423_v3  ;;  %v4574_v23 = vmul.f32 %v10423_v3, %v10423_v3  ;;  %v4487_v13 = vadd.f32 %v10421_v41, %v10427_v18  ;;  %v4654_v61 = vadd.f32 %v4576_v55, %v4575_v35  ;;  %v7143_v35 = vld [vmem:[%s10884_s7] sm:$0xff]  ;;  %v11015_v18 = vld [vmem:[#allocation22_spill] sm:$0xff] }
 0x550   :  { %v4296_v1 = vpop.f32.mrf.mxu2  ;;  %v4345_v37 = vpop.f32.mrf.mxu3 }
 0x551   :  { %v4297_v10 = vadd.f32 %v4296_v1, %v4248_v48  ;;  %4485 = vadd.xlane.f32.xlu1 %v4484_v25  ;;  %v4651_v42 = vadd.f32 %v4650_v2, %v4574_v23  ;;  %v7144_v2 = vld [vmem:[%s10884_s7 + $0x8] sm:$0xff]  ;;  %v4488_v23 = vadd.f32 %v4487_v13, %v10429_v17  ;;  %v4655_v1 = vadd.f32 %v4654_v61, %v4577_v22  ;;  %v7151_v13 = vld [vmem:[%s10884_s7 + $0x40] sm:$0xff] }
 0x552   :  { %v7152_v48 = vld [vmem:[%s10884_s7 + $0x48] sm:$0xff]  ;;  %5325 = vmatpush.bf16.msrb.mxu0 %v7144_v2 }
 0x553   :  { %v4346_v60 = vadd.f32 %v4345_v37, %v4297_v10  ;;  %4652 = vadd.xlane.f32.xlu0 %v4651_v42  ;;  %5374 = vmatpush.bf16.msrb.mxu1 %v7152_v48  ;;  %v7159_v37 = vld [vmem:[%s10884_s7 + $0x80] sm:$0xff] }
 0x554   :  { %v4416_v58 = vpop.xlane.xlu0 %4415  ;;  %5424 = vmatpush.bf16.msrb.mxu2 %v7159_v37 }
 0x555   :  { %v10450_v34 = vmax.f32 %v4346_v60, 0.0  ;;  %v10453_v21 = vmul.f32 %v10442_v39, %v4416_v58  ;;  %v7167_v60 = vld [vmem:[%s10884_s7 + $0xc0] sm:$0xff] }
 0x556   :  { %v4583_v25 = vpop.xlane.xlu1 %4582  ;;  %5326 = vmatpush.bf16.msrb.mxu0 %v7143_v35  ;;  %5473 = vmatpush.bf16.msrb.mxu3 %v7167_v60 }
 0x557   :  { %11012 = vst [vmem:[#allocation36_spill] sm:$0xff] %v10450_v34  ;;  %v4659_v10 = vmul.f32 %v4583_v25, %v10442_v39  ;;  %v4675_v55 = vmul.f32 %v10453_v21, %v10453_v21  ;;  %v4489_v42 = vadd.f32 %v4488_v23, %v10450_v34  ;;  %v4578_v46 = vmul.f32 %v10450_v34, %v10450_v34 }
 0x558   :  { %5375 = vmatpush.bf16.msrb.mxu1 %v7151_v13  ;;  %v4725_v14 = vsub.f32 %v11015_v18, %v10453_v21  ;;  %v4726_v24 = vsub.f32 %v9970_v62, %v10453_v21 }
 0x559   :  { %v4691_v22 = vsub.f32 %v4659_v10, %v4675_v55  ;;  %4490 = vadd.xlane.f32.xlu2 %v4489_v42  ;;  %v4656_v58 = vadd.f32 %v4655_v1, %v4578_v46 }
 0x55b   :  { %v4707_v61 = vmax.f32 %v4691_v22, 0.0  ;;  %4657 = vadd.xlane.f32.xlu1 %v4656_v58 }
 0x55c   :  { %v4421_v2 = vpop.xlane.xlu0 %4420 }
 0x55d   :  { %v10484_v47 = vmul.f32 %v10442_v39, %v4421_v2  ;;  %v4787_v48 = vadd.f32 1e-05, %v4707_v61 }
 0x55e   :  { %v4588_v25 = vpop.xlane.xlu1 %4587 }
 0x55f   :  { %7179 = vrsqrt.f32 %v4787_v48  ;;  %v4660_v23 = vmul.f32 %v4588_v25, %v10442_v39  ;;  %v4676_v1 = vmul.f32 %v10484_v47, %v10484_v47  ;;  %vm4809_vm2 = vweird.f32 %v4787_v48 }
 0x560   :  { %v4728_v18 = vsub.f32 %v9968_v59, %v10484_v47 }
 0x561   :  { %v4692_v10 = vsub.f32 %v4660_v23, %v4676_v1 }
 0x563   :  { %v4708_v55 = vmax.f32 %v4692_v10, 0.0 }
 0x564   :  { %v4426_v42 = vpop.xlane.xlu2 %4425 }
 0x565   :  { %v10490_v46 = vmul.f32 %v10442_v39, %v4426_v42  ;;  %v7180_v37 = vpop.eup %7179  ;;  %v4788_v35 = vadd.f32 1e-05, %v4708_v55 }
 0x566   :  { %v4593_v60 = vpop.xlane.xlu0 %4592  ;;  %v4804_v22 = vmul.f32 %v7180_v37, %v4787_v48  ;;  %vm4810_vm1 = vweird.f32 %v7180_v37 }
 0x567   :  { %v4677_v58 = vmul.f32 %v10490_v46, %v10490_v46  ;;  %v4661_v13 = vmul.f32 %v4593_v60, %v10442_v39  ;;  %7181 = vrsqrt.f32 %v4788_v35  ;;  %vm4811_vm3 = vmor %vm4809_vm2, %vm4810_vm1  ;;  %vm4819_vm5 = vweird.f32 %v4788_v35 }
 0x568   :  { %v4805_v61 = vmul.f32 %v7180_v37, %v4804_v22 }
 0x569   :  { %v4693_v2 = vsub.f32 %v4661_v13, %v4677_v58 }
 0x56a   :  { %v4806_v25 = vmul.f32 0.5, %v4805_v61 }
 0x56b   :  { %v4709_v34 = vmax.f32 %v4693_v2, 0.0 }
 0x56c   :  { %v4431_v23 = vpop.xlane.xlu2 %4430  ;;  %v4807_v1 = vsub.f32 1.5, %v4806_v25  ;;  %v11014_v25 = vld [vmem:[#allocation20_spill] sm:$0xff] }
 0x56d   :  { %v10495_v10 = vadd.f32 1e-05, %v4709_v34  ;;  %v10498_v42 = vmul.f32 %v10442_v39, %v4431_v23  ;;  %v7182_v55 = vpop.eup %7181  ;;  %v11013_v34 = vld [vmem:[#allocation21_spill] sm:$0xff]  ;;  %v4724_v23 = vsub.f32 %v11014_v25, %v10453_v21 }
 0x56e   :  { %v4598_v17 = vpop.xlane.xlu1 %4597  ;;  %v4814_v41 = vmul.f32 %v7182_v55, %v4788_v35  ;;  %v4808_v58 = vmul.f32 %v7180_v37, %v4807_v1  ;;  %v4723_v2 = vsub.f32 %v11013_v34, %v10453_v21  ;;  %vm4820_vm4 = vweird.f32 %v7182_v55 }
 0x56f   :  { %7183 = vrsqrt.f32 %v10495_v10  ;;  %v4678_v60 = vmul.f32 %v10498_v42, %v10498_v42  ;;  %v4662_v22 = vmul.f32 %v4598_v17, %v10442_v39  ;;  %v4727_v17 = vsub.f32 %v9983_v45, %v10484_v47  ;;  %vm4821_vm6 = vmor %vm4819_vm5, %vm4820_vm4 }
 0x570   :  { %v4815_v13 = vmul.f32 %v7182_v55, %v4814_v41  ;;  %vm4829_vm8 = vweird.f32 %v10495_v10 }
 0x571   :  { %v4694_v61 = vsub.f32 %v4662_v22, %v4678_v60  ;;  %v4812_v22 = vsel %vm4811_vm3, %v7180_v37, %v4808_v58  ;;  %v4730_v58 = vsub.f32 %v10007_v31, %v10484_v47 }
 0x572   :  { %v4816_v3 = vmul.f32 0.5, %v4815_v13  ;;  %v11016_v13 = vld [vmem:[#allocation23_spill] sm:$0xff]  ;;  %v4964_v0 = vmul.f32 %v4812_v22, %v4724_v23  ;;  %v4965_v11 = vmul.f32 %v4812_v22, %v4725_v14  ;;  %v4966_v29 = vmul.f32 %v4812_v22, %v4726_v24 }
 0x573   :  { %v4710_v41 = vmax.f32 %v4694_v61, 0.0  ;;  %v4729_v62 = vsub.f32 %v11016_v13, %v10484_v47  ;;  %v4731_v24 = vsub.f32 %v10014_v4, %v10490_v46 }
 0x574   :  { %v4436_v1 = vpop.xlane.xlu2 %4435  ;;  %v4817_v34 = vsub.f32 1.5, %v4816_v3 }
 0x575   :  { %v10514_v60 = vpop.eup %7183  ;;  %v10517_v48 = vmul.f32 %v10442_v39, %v4436_v1  ;;  %v10525_v45 = vadd.f32 1e-05, %v4710_v41  ;;  %v4963_v1 = vmul.f32 %v4812_v22, %v4723_v2 }
 0x576   :  { %v4824_v21 = vmul.f32 %v10514_v60, %v10495_v10  ;;  %v4603_v61 = vpop.xlane.xlu1 %4602  ;;  %v4818_v25 = vmul.f32 %v7182_v55, %v4817_v34  ;;  %vm4830_vm7 = vweird.f32 %v10514_v60 }
 0x577   :  { %v4679_v3 = vmul.f32 %v10517_v48, %v10517_v48  ;;  %v4663_v37 = vmul.f32 %v4603_v61, %v10442_v39  ;;  %7185 = vrsqrt.f32 %v10525_v45  ;;  %vm4831_vm9 = vmor %vm4829_vm8, %vm4830_vm7  ;;  %vm4839_vm11 = vweird.f32 %v10525_v45 }
 0x578   :  { %v4825_v59 = vmul.f32 %v10514_v60, %v4824_v21  ;;  %v4822_v13 = vsel %vm4821_vm6, %v7182_v55, %v4818_v25 }
 0x579   :  { %v4695_v41 = vsub.f32 %v4663_v37, %v4679_v3  ;;  %v4967_v35 = vmul.f32 %v4822_v13, %v4727_v17  ;;  %v4968_v49 = vmul.f32 %v4822_v13, %v4728_v18  ;;  %v4969_v9 = vmul.f32 %v4822_v13, %v4729_v62 }
 0x57a   :  { %v4826_v34 = vmul.f32 0.5, %v4825_v59  ;;  %v4970_v61 = vmul.f32 %v4822_v13, %v4730_v58  ;;  %v4735_v62 = vsub.f32 %v10052_v20, %v10498_v42  ;;  %v4734_v3 = vsub.f32 %v10039_v5, %v10490_v46  ;;  %v11019_v13 = vld [vmem:[#allocation26_spill] sm:$0xff] }
 0x57b   :  { %v4711_v27 = vmax.f32 %v4695_v41, 0.0  ;;  %v5027_v8 = vpack.c.bf16 %v4967_v35, %v4963_v1  ;;  %v5028_v31 = vpack.c.bf16 %v4968_v49, %v4964_v0  ;;  %v5029_v47 = vpack.c.bf16 %v4969_v9, %v4965_v11  ;;  %v11017_v11 = vld [vmem:[#allocation24_spill] sm:$0xff]  ;;  %v11020_v5 = vld [vmem:[#allocation2_spill] sm:$0xff] }
 0x57c   :  { %v4441_v30 = vpop.xlane.xlu0 %4440  ;;  %v4827_v7 = vsub.f32 1.5, %v4826_v34  ;;  %v5030_v55 = vpack.c.bf16 %v4970_v61, %v4966_v29  ;;  %v4732_v0 = vsub.f32 %v11017_v11, %v10490_v46  ;;  %v4736_v41 = vsub.f32 %v11019_v13, %v10498_v42 }
 0x57d   :  { %v10534_v21 = vadd.f32 1e-05, %v4711_v27  ;;  %v10537_v2 = vmul.f32 %v10442_v39, %v4441_v30  ;;  %v7186_v23 = vpop.eup %7185  ;;  %5327 = vmatmul.bf16.vlgmr.msrb.gmra.mxu0 %v5027_v8  ;;  %5376 = vmatmul.bf16.vlgmr.msrb.gmra.mxu1 %v5028_v31 }
 0x57e   :  { %v4608_v14 = vpop.xlane.xlu2 %4607  ;;  %v4834_v17 = vmul.f32 %v7186_v23, %v10525_v45  ;;  %5425 = vmatmul.bf16.vlgmr.msrb.gmra.mxu2 %v5029_v47  ;;  %5474 = vmatmul.bf16.vlgmr.msrb.gmra.mxu3 %v5030_v55  ;;  %v4828_v9 = vmul.f32 %v10514_v60, %v4827_v7  ;;  %v11018_v7 = vld [vmem:[#allocation25_spill] sm:$0xff]  ;;  %vm4840_vm10 = vweird.f32 %v7186_v23  ;;  %v11021_v47 = vld [vmem:[#allocation27_spill] sm:$0xff] }
 0x57f   :  { %7187 = vrsqrt.f32 %v10534_v21  ;;  %v4664_v49 = vmul.f32 %v4608_v14, %v10442_v39  ;;  %v4680_v27 = vmul.f32 %v10537_v2, %v10537_v2  ;;  %v4733_v25 = vsub.f32 %v11018_v7, %v10490_v46  ;;  %vm4841_vm12 = vmor %vm4839_vm11, %vm4840_vm10 }
 0x580   :  { %v4835_v29 = vmul.f32 %v7186_v23, %v4834_v17  ;;  %v4832_v58 = vsel %vm4831_vm9, %v10514_v60, %v4828_v9  ;;  %v4737_v46 = vsub.f32 %v11020_v5, %v10498_v42  ;;  %v4738_v55 = vsub.f32 %v11021_v47, %v10498_v42 }
 0x581   :  { %v4696_v30 = vsub.f32 %v4664_v49, %v4680_v27  ;;  %v4971_v31 = vmul.f32 %v4832_v58, %v4731_v24  ;;  %v4972_v49 = vmul.f32 %v4832_v58, %v4732_v0  ;;  %v4973_v27 = vmul.f32 %v4832_v58, %v4733_v25 }
 0x582   :  { %v4836_v8 = vmul.f32 0.5, %v4835_v29  ;;  %v4974_v11 = vmul.f32 %v4832_v58, %v4734_v3  ;;  %vm4849_vm14 = vweird.f32 %v10534_v21  ;;  %v4743_v47 = vsub.f32 %v10122_v57, %v10537_v2 }
 0x583   :  { %v4712_v22 = vmax.f32 %v4696_v30, 0.0 }
 0x584   :  { %v4446_v18 = vpop.xlane.xlu0 %4445  ;;  %v4837_v37 = vsub.f32 1.5, %v4836_v8 }
 0x585   :  { %v10557_v10 = vpop.eup %7187  ;;  %v10560_v4 = vmul.f32 %v10442_v39, %v4446_v18  ;;  %v10565_v1 = vadd.f32 1e-05, %v4712_v22 }
 0x586   :  { %v4844_v59 = vmul.f32 %v10557_v10, %v10534_v21  ;;  %v4613_v20 = vpop.xlane.xlu2 %4612  ;;  %v4838_v34 = vmul.f32 %v7186_v23, %v4837_v37  ;;  %vm4850_vm13 = vweird.f32 %v10557_v10 }
 0x587   :  { %v4665_v35 = vmul.f32 %v4613_v20, %v10442_v39  ;;  %v4681_v60 = vmul.f32 %v10560_v4, %v10560_v4  ;;  %7189 = vrsqrt.f32 %v10565_v1  ;;  %vm4851_vm15 = vmor %vm4849_vm14, %vm4850_vm13  ;;  %vm4859_vm1 = vweird.f32 %v10565_v1 }
 0x588   :  { %v4845_v61 = vmul.f32 %v10557_v10, %v4844_v59  ;;  %v4842_v17 = vsel %vm4841_vm12, %v7186_v23, %v4838_v34  ;;  %v4739_v34 = vsub.f32 %v10083_v63, %v10517_v48 }
 0x589   :  { %v4697_v14 = vsub.f32 %v4665_v35, %v4681_v60  ;;  %v4975_v45 = vmul.f32 %v4842_v17, %v4735_v62  ;;  %v4976_v29 = vmul.f32 %v4842_v17, %v4736_v41  ;;  %v4977_v30 = vmul.f32 %v4842_v17, %v4737_v46  ;;  %v11022_v35 = vld [vmem:[#allocation15_spill] sm:$0xff] }
 0x58a   :  { %v4846_v9 = vmul.f32 0.5, %v4845_v61  ;;  %v4978_v22 = vmul.f32 %v4842_v17, %v4738_v55  ;;  %v4740_v60 = vsub.f32 %v11022_v35, %v10517_v48  ;;  %v11023_v55 = vld [vmem:[#allocation7_spill] sm:$0xff]  ;;  %v4742_v17 = vsub.f32 %v10109_v6, %v10517_v48 }
 0x58b   :  { %v4713_v8 = vmax.f32 %v4697_v14, 0.0  ;;  %v5031_v7 = vpack.c.bf16 %v4975_v45, %v4971_v31  ;;  %v5032_v37 = vpack.c.bf16 %v4976_v29, %v4972_v49  ;;  %v5033_v59 = vpack.c.bf16 %v4977_v30, %v4973_v27  ;;  %v11024_v29 = vld [vmem:[#allocation16_spill] sm:$0xff]  ;;  %v11025_v6 = vld [vmem:[#allocation3_spill] sm:$0xff] }
 0x58c   :  { %v4451_v18 = vpop.xlane.xlu1 %4450  ;;  %v4847_v20 = vsub.f32 1.5, %v4846_v9  ;;  %v5034_v23 = vpack.c.bf16 %v4978_v22, %v4974_v11  ;;  %v4741_v14 = vsub.f32 %v11023_v55, %v10517_v48  ;;  %v4744_v30 = vsub.f32 %v11024_v29, %v10537_v2 }
 0x58d   :  { %v10579_v24 = vadd.f32 1e-05, %v4713_v8  ;;  %v10582_v42 = vmul.f32 %v10442_v39, %v4451_v18  ;;  %v7190_v0 = vpop.eup %7189  ;;  %5332 = vmatmul.bf16.gmra.mxu0 %v5031_v7  ;;  %5381 = vmatmul.bf16.gmra.mxu1 %v5032_v37  ;;  %v4745_v48 = vsub.f32 %v11025_v6, %v10537_v2  ;;  %v11026_v7 = vld [vmem:[#allocation28_spill] sm:$0xff]  ;;  %v11027_v6 = vld [vmem:[#allocation17_spill] sm:$0xff] }
 0x58e   :  { %v4618_v62 = vpop.xlane.xlu0 %4617  ;;  %v4854_v25 = vmul.f32 %v7190_v0, %v10565_v1  ;;  %5430 = vmatmul.bf16.gmra.mxu2 %v5033_v59  ;;  %5479 = vmatmul.bf16.gmra.mxu3 %v5034_v23  ;;  %v4848_v13 = vmul.f32 %v10557_v10, %v4847_v20  ;;  %vm4860_vm0 = vweird.f32 %v7190_v0  ;;  %v4746_v37 = vsub.f32 %v11026_v7, %v10537_v2 }
 0x58f   :  { %7191 = vrsqrt.f32 %v10579_v24  ;;  %v4682_v3 = vmul.f32 %v10582_v42, %v10582_v42  ;;  %v4666_v58 = vmul.f32 %v4618_v62, %v10442_v39  ;;  %vm4861_vm2 = vmor %vm4859_vm1, %vm4860_vm0  ;;  %vm4869_vm4 = vweird.f32 %v10579_v24 }
 0x590   :  { %v4855_v41 = vmul.f32 %v7190_v0, %v4854_v25  ;;  %v4852_v27 = vsel %vm4851_vm15, %v10557_v10, %v4848_v13  ;;  %v4750_v7 = vsub.f32 %v10173_v15, %v10560_v4  ;;  %v11029_v15 = vld [vmem:[#allocation18_spill] sm:$0xff] }
 0x591   :  { %v4698_v5 = vsub.f32 %v4666_v58, %v4682_v3  ;;  %v4979_v18 = vmul.f32 %v4852_v27, %v4739_v34  ;;  %v4980_v23 = vmul.f32 %v4852_v27, %v4740_v60  ;;  %v4981_v62 = vmul.f32 %v4852_v27, %v4741_v14 }
 0x592   :  { %v4856_v46 = vmul.f32 0.5, %v4855_v41  ;;  %v4982_v41 = vmul.f32 %v4852_v27, %v4742_v17 }
 0x593   :  { %v4714_v61 = vmax.f32 %v4698_v5, 0.0 }
 0x594   :  { %v4456_v31 = vpop.xlane.xlu1 %4455  ;;  %v4857_v49 = vsub.f32 1.5, %v4856_v46 }
 0x595   :  { %v10602_v21 = vpop.eup %7191  ;;  %v10605_v63 = vmul.f32 %v10442_v39, %v4456_v31  ;;  %v10610_v45 = vadd.f32 1e-05, %v4714_v61 }
 0x596   :  { %v4864_v9 = vmul.f32 %v10602_v21, %v10579_v24  ;;  %v4623_v57 = vpop.xlane.xlu0 %4622  ;;  %v4858_v8 = vmul.f32 %v7190_v0, %v4857_v49  ;;  %vm4870_vm3 = vweird.f32 %v10602_v21 }
 0x597   :  { %v4683_v11 = vmul.f32 %v10605_v63, %v10605_v63  ;;  %v4667_v10 = vmul.f32 %v4623_v57, %v10442_v39  ;;  %7193 = vrsqrt.f32 %v10610_v45  ;;  %vm4871_vm5 = vmor %vm4869_vm4, %vm4870_vm3  ;;  %vm4879_vm7 = vweird.f32 %v10610_v45 }
 0x598   :  { %v4865_v22 = vmul.f32 %v10602_v21, %v4864_v9  ;;  %v4862_v20 = vsel %vm4861_vm2, %v7190_v0, %v4858_v8 }
 0x599   :  { %v4699_v59 = vsub.f32 %v4667_v10, %v4683_v11  ;;  %v4983_v1 = vmul.f32 %v4862_v20, %v4743_v47  ;;  %v4984_v3 = vmul.f32 %v4862_v20, %v4744_v30  ;;  %v4985_v58 = vmul.f32 %v4862_v20, %v4745_v48 }
 0x59a   :  { %v4866_v25 = vmul.f32 0.5, %v4865_v22  ;;  %v4986_v5 = vmul.f32 %v4862_v20, %v4746_v37  ;;  %v4747_v30 = vsub.f32 %v10151_v44, %v10560_v4  ;;  %v4748_v48 = vsub.f32 %v11027_v6, %v10560_v4  ;;  %v11028_v22 = vld [vmem:[#allocation4_spill] sm:$0xff] }
 0x59b   :  { %v4715_v13 = vmax.f32 %v4699_v59, 0.0  ;;  %v5035_v35 = vpack.c.bf16 %v4983_v1, %v4979_v18  ;;  %v5036_v61 = vpack.c.bf16 %v4984_v3, %v4980_v23  ;;  %v5037_v31 = vpack.c.bf16 %v4985_v58, %v4981_v62 }
 0x59c   :  { %v4461_v46 = vpop.xlane.xlu2 %4460  ;;  %v4867_v55 = vsub.f32 1.5, %v4866_v25  ;;  %v5038_v0 = vpack.c.bf16 %v4986_v5, %v4982_v41  ;;  %v4751_v10 = vsub.f32 %v10186_v33, %v10582_v42  ;;  %v4749_v18 = vsub.f32 %v11028_v22, %v10560_v4 }
 0x59d   :  { %v10624_v34 = vadd.f32 1e-05, %v4715_v13  ;;  %v10627_v2 = vmul.f32 %v10442_v39, %v4461_v46  ;;  %v7194_v60 = vpop.eup %7193  ;;  %5337 = vmatmul.bf16.gmra.mxu0 %v5035_v35  ;;  %5386 = vmatmul.bf16.gmra.mxu1 %v5036_v61  ;;  %v4752_v62 = vsub.f32 %v10171_v16, %v10582_v42  ;;  %v4753_v4 = vsub.f32 %v11029_v15, %v10582_v42 }
 0x59e   :  { %v4628_v47 = vpop.xlane.xlu1 %4627  ;;  %v4874_v14 = vmul.f32 %v7194_v60, %v10610_v45  ;;  %5435 = vmatmul.bf16.gmra.mxu2 %v5037_v31  ;;  %5484 = vmatmul.bf16.gmra.mxu3 %v5038_v0  ;;  %v4868_v27 = vmul.f32 %v10602_v21, %v4867_v55  ;;  %vm4880_vm6 = vweird.f32 %v7194_v60  ;;  %v4754_v16 = vsub.f32 %v10210_v43, %v10582_v42 }
 0x59f   :  { %7195 = vrsqrt.f32 %v10624_v34  ;;  %v4684_v17 = vmul.f32 %v10627_v2, %v10627_v2  ;;  %v4668_v49 = vmul.f32 %v4628_v47, %v10442_v39  ;;  %vm4881_vm8 = vmor %vm4879_vm7, %vm4880_vm6  ;;  %vm4889_vm10 = vweird.f32 %v10624_v34 }
 0x5a0   :  { %v4875_v9 = vmul.f32 %v7194_v60, %v4874_v14  ;;  %v4872_v59 = vsel %vm4871_vm5, %v10602_v21, %v4868_v27 }
 0x5a1   :  { %v4700_v57 = vsub.f32 %v4668_v49, %v4684_v17  ;;  %v4987_v58 = vmul.f32 %v4872_v59, %v4747_v30  ;;  %v4988_v5 = vmul.f32 %v4872_v59, %v4748_v48  ;;  %v4989_v46 = vmul.f32 %v4872_v59, %v4749_v18 }
 0x5a2   :  { %v4876_v29 = vmul.f32 0.5, %v4875_v9  ;;  %v4990_v0 = vmul.f32 %v4872_v59, %v4750_v7  ;;  %v4755_v18 = vsub.f32 %v10217_v56, %v10605_v63  ;;  %v4756_v7 = vsub.f32 %v10207_v52, %v10605_v63 }
 0x5a3   :  { %v4716_v8 = vmax.f32 %v4700_v57, 0.0 }
 0x5a4   :  { %v4466_v11 = vpop.xlane.xlu2 %4465  ;;  %v4877_v37 = vsub.f32 1.5, %v4876_v29 }
 0x5a5   :  { %v10647_v24 = vpop.eup %7195  ;;  %v10650_v44 = vmul.f32 %v10442_v39, %v4466_v11  ;;  %v10655_v23 = vadd.f32 1e-05, %v4716_v8 }
 0x5a6   :  { %v4884_v20 = vmul.f32 %v10647_v24, %v10624_v34  ;;  %v4633_v33 = vpop.xlane.xlu1 %4632  ;;  %v4878_v25 = vmul.f32 %v7194_v60, %v4877_v37  ;;  %vm4890_vm9 = vweird.f32 %v10647_v24 }
 0x5a7   :  { %v4685_v1 = vmul.f32 %v10650_v44, %v10650_v44  ;;  %v4669_v21 = vmul.f32 %v4633_v33, %v10442_v39  ;;  %7197 = vrsqrt.f32 %v10655_v23  ;;  %vm4891_vm11 = vmor %vm4889_vm10, %vm4890_vm9  ;;  %v4757_v33 = vsub.f32 %v10220_v51, %v10605_v63 }
 0x5a8   :  { %v4885_v3 = vmul.f32 %v10647_v24, %v4884_v20  ;;  %v4882_v41 = vsel %vm4881_vm8, %v7194_v60, %v4878_v25  ;;  %v4759_v20 = vsub.f32 %v10252_v28, %v10627_v2  ;;  %v4760_v51 = vsub.f32 %v10237_v50, %v10627_v2 }
 0x5a9   :  { %v4701_v13 = vsub.f32 %v4669_v21, %v4685_v1  ;;  %v4991_v45 = vmul.f32 %v4882_v41, %v4751_v10  ;;  %v4992_v61 = vmul.f32 %v4882_v41, %v4752_v62  ;;  %v4993_v31 = vmul.f32 %v4882_v41, %v4753_v4 }
 0x5aa   :  { %v4886_v35 = vmul.f32 0.5, %v4885_v3  ;;  %v4994_v47 = vmul.f32 %v4882_v41, %v4754_v16  ;;  %v4758_v62 = vsub.f32 %v10239_v32, %v10605_v63  ;;  %v4761_v32 = vsub.f32 %v10254_v12, %v10627_v2 }
 0x5ab   :  { %v4717_v55 = vmax.f32 %v4701_v13, 0.0  ;;  %v5039_v17 = vpack.c.bf16 %v4991_v45, %v4987_v58  ;;  %v5040_v49 = vpack.c.bf16 %v4992_v61, %v4988_v5  ;;  %v5041_v27 = vpack.c.bf16 %v4993_v31, %v4989_v46 }
 0x5ac   :  { %v4471_v14 = vpop.xlane.xlu0 %4470  ;;  %v4887_v9 = vsub.f32 1.5, %v4886_v35  ;;  %v5042_v42 = vpack.c.bf16 %v4994_v47, %v4990_v0  ;;  %vm4899_vm13 = vweird.f32 %v10655_v23  ;;  %v4762_v50 = vsub.f32 %v10274_v40, %v10627_v2 }
 0x5ad   :  { %v10669_v57 = vadd.f32 1e-05, %v4717_v55  ;;  %v10672_v43 = vmul.f32 %v10442_v39, %v4471_v14  ;;  %v7198_v60 = vpop.eup %7197  ;;  %5342 = vmatmul.bf16.gmra.mxu0 %v5039_v17  ;;  %5391 = vmatmul.bf16.gmra.mxu1 %v5040_v49 }
 0x5ae   :  { %v4638_v29 = vpop.xlane.xlu2 %4637  ;;  %v4894_v30 = vmul.f32 %v7198_v60, %v10655_v23  ;;  %5440 = vmatmul.bf16.gmra.mxu2 %v5041_v27  ;;  %5489 = vmatmul.bf16.gmra.mxu3 %v5042_v42  ;;  %v4888_v8 = vmul.f32 %v10647_v24, %v4887_v9  ;;  %vm4900_vm12 = vweird.f32 %v7198_v60 }
 0x5af   :  { %7199 = vrsqrt.f32 %v10669_v57  ;;  %v4670_v6 = vmul.f32 %v4638_v29, %v10442_v39  ;;  %v4686_v48 = vmul.f32 %v10672_v43, %v10672_v43  ;;  %vm4901_vm14 = vmor %vm4899_vm13, %vm4900_vm12  ;;  %vm4909_vm0 = vweird.f32 %v10669_v57 }
 0x5b0   :  { %v4895_v11 = vmul.f32 %v7198_v60, %v4894_v30  ;;  %v4892_v52 = vsel %vm4891_vm11, %v10647_v24, %v4888_v8  ;;  %v4763_v8 = vsub.f32 %v10281_v38, %v10650_v44 }
 0x5b1   :  { %v4702_v10 = vsub.f32 %v4670_v6, %v4686_v48  ;;  %v4995_v3 = vmul.f32 %v4892_v52, %v4755_v18  ;;  %v4996_v12 = vmul.f32 %v4892_v52, %v4756_v7  ;;  %v4997_v13 = vmul.f32 %v4892_v52, %v4757_v33 }
 0x5b2   :  { %v4896_v22 = vmul.f32 0.5, %v4895_v11  ;;  %v4998_v45 = vmul.f32 %v4892_v52, %v4758_v62  ;;  %v4764_v11 = vsub.f32 %v10271_v36, %v10650_v44  ;;  %v4767_v18 = vsub.f32 %v10316_v26, %v10672_v43 }
 0x5b3   :  { %v4718_v37 = vmax.f32 %v4702_v10, 0.0  ;;  %v4765_v7 = vsub.f32 %v10284_v53, %v10650_v44  ;;  %v4768_v53 = vsub.f32 %v10301_v54, %v10672_v43 }
 0x5b4   :  { %v4476_v59 = vpop.xlane.xlu0 %4475  ;;  %v4897_v15 = vsub.f32 1.5, %v4896_v22 }
 0x5b5   :  { %v10692_v34 = vpop.eup %7199  ;;  %v10695_v56 = vmul.f32 %v10442_v39, %v4476_v59  ;;  %v10700_v25 = vadd.f32 1e-05, %v4718_v37  ;;  %v4766_v37 = vsub.f32 %v10303_v19, %v10650_v44  ;;  %v11030_v19 = vld [vmem:[#allocation5_spill] sm:$0xff] }
 0x5b6   :  { %v4904_v4 = vmul.f32 %v10692_v34, %v10669_v57  ;;  %v4643_v28 = vpop.xlane.xlu2 %4642  ;;  %v4898_v63 = vmul.f32 %v7198_v60, %v4897_v15  ;;  %vm4910_vm15 = vweird.f32 %v10692_v34  ;;  %v4769_v44 = vsub.f32 %v11030_v19, %v10672_v43 }
 0x5b7   :  { %v4671_v1 = vmul.f32 %v4643_v28, %v10442_v39  ;;  %v4687_v24 = vmul.f32 %v10695_v56, %v10695_v56  ;;  %7201 = vrsqrt.f32 %v10700_v25  ;;  %vm4911_vm1 = vmor %vm4909_vm0, %vm4910_vm15  ;;  %vm4919_vm3 = vweird.f32 %v10700_v25  ;;  %v11031_v28 = vld [vmem:[#allocation8_spill] sm:$0xff] }
 0x5b8   :  { %v4905_v21 = vmul.f32 %v10692_v34, %v4904_v4  ;;  %v4902_v16 = vsel %vm4901_vm14, %v7198_v60, %v4898_v63  ;;  %v4770_v54 = vsub.f32 %v11031_v28, %v10672_v43 }
 0x5b9   :  { %v4703_v58 = vsub.f32 %v4671_v1, %v4687_v24  ;;  %v4999_v23 = vmul.f32 %v4902_v16, %v4759_v20  ;;  %v5000_v5 = vmul.f32 %v4902_v16, %v4760_v51  ;;  %v5001_v46 = vmul.f32 %v4902_v16, %v4761_v32 }
 0x5ba   :  { %v4906_v41 = vmul.f32 0.5, %v4905_v21  ;;  %v5002_v61 = vmul.f32 %v4902_v16, %v4762_v50 }
 0x5bb   :  { %v4719_v35 = vmax.f32 %v4703_v58, 0.0  ;;  %v5043_v55 = vpack.c.bf16 %v4999_v23, %v4995_v3  ;;  %v5044_v0 = vpack.c.bf16 %v5000_v5, %v4996_v12  ;;  %v5045_v47 = vpack.c.bf16 %v5001_v46, %v4997_v13 }
 0x5bc   :  { %v4481_v31 = vpop.xlane.xlu1 %4480  ;;  %v4907_v14 = vsub.f32 1.5, %v4906_v41  ;;  %v5046_v2 = vpack.c.bf16 %v5002_v61, %v4998_v45 }
 0x5bd   :  { %v10714_v17 = vadd.f32 1e-05, %v4719_v35  ;;  %v10717_v40 = vmul.f32 %v10442_v39, %v4481_v31  ;;  %v7202_v49 = vpop.eup %7201  ;;  %5347 = vmatmul.bf16.gmra.mxu0 %v5043_v55  ;;  %5396 = vmatmul.bf16.gmra.mxu1 %v5044_v0 }
 0x5be   :  { %v4648_v27 = vpop.xlane.xlu0 %4647  ;;  %v4914_v9 = vmul.f32 %v7202_v49, %v10700_v25  ;;  %5445 = vmatmul.bf16.gmra.mxu2 %v5045_v47  ;;  %5494 = vmatmul.bf16.gmra.mxu3 %v5046_v2  ;;  %v4908_v29 = vmul.f32 %v10692_v34, %v4907_v14  ;;  %vm4920_vm2 = vweird.f32 %v7202_v49 }
 0x5bf   :  { %7203 = vrsqrt.f32 %v10714_v17  ;;  %v4688_v42 = vmul.f32 %v10717_v40, %v10717_v40  ;;  %v4672_v60 = vmul.f32 %v4648_v27, %v10442_v39  ;;  %vm4921_vm4 = vmor %vm4919_vm3, %vm4920_vm2  ;;  %vm4929_vm6 = vweird.f32 %v10714_v17 }
 0x5c0   :  { %v4915_v30 = vmul.f32 %v7202_v49, %v4914_v9  ;;  %v4912_v36 = vsel %vm4911_vm1, %v10692_v34, %v4908_v29  ;;  %v11032_v9 = vld [vmem:[#allocation9_spill] sm:$0xff] }
 0x5c1   :  { %v4704_v6 = vsub.f32 %v4672_v60, %v4688_v42  ;;  %v5003_v4 = vmul.f32 %v4912_v36, %v4763_v8  ;;  %v5004_v63 = vmul.f32 %v4912_v36, %v4764_v11  ;;  %v5005_v1 = vmul.f32 %v4912_v36, %v4765_v7  ;;  %v11036_v7 = vld [vmem:[#allocation12_spill] sm:$0xff] }
 0x5c2   :  { %v4916_v48 = vmul.f32 0.5, %v4915_v30  ;;  %v5006_v58 = vmul.f32 %v4912_v36, %v4766_v37  ;;  %v4771_v42 = vsub.f32 %v11032_v9, %v10695_v56  ;;  %v11033_v30 = vld [vmem:[#allocation6_spill] sm:$0xff]  ;;  %v4775_v37 = vsub.f32 %v11036_v7, %v10717_v40 }
 0x5c3   :  { %v4720_v10 = vmax.f32 %v4704_v6, 0.0  ;;  %v11034_v6 = vld [vmem:[#allocation10_spill] sm:$0xff] }
 0x5c4   :  { %v4486_v22 = vpop.xlane.xlu1 %4485  ;;  %v4917_v59 = vsub.f32 1.5, %v4916_v48  ;;  %v4773_v48 = vsub.f32 %v11034_v6, %v10695_v56 }
 0x5c5   :  { %v10737_v57 = vpop.eup %7203  ;;  %v10740_v38 = vmul.f32 %v10442_v39, %v4486_v22  ;;  %v10745_v33 = vadd.f32 1e-05, %v4720_v10 }
 0x5c6   :  { %v4924_v20 = vmul.f32 %v10737_v57, %v10714_v17  ;;  %v4653_v26 = vpop.xlane.xlu0 %4652  ;;  %v4918_v62 = vmul.f32 %v7202_v49, %v4917_v59  ;;  %vm4930_vm5 = vweird.f32 %v10737_v57  ;;  %v11035_v17 = vld [vmem:[#allocation29_spill] sm:$0xff]  ;;  %v11037_v59 = vld [vmem:[#allocation11_spill] sm:$0xff] }
 0x5c7   :  { %v4673_v15 = vmul.f32 %v4653_v26, %v10442_v39  ;;  %v4689_v34 = vmul.f32 %v10740_v38, %v10740_v38  ;;  %7205 = vrsqrt.f32 %v10745_v33  ;;  %vm4931_vm7 = vmor %vm4929_vm6, %vm4930_vm5  ;;  %v4774_v22 = vsub.f32 %v11035_v17, %v10695_v56  ;;  %v11038_v26 = vld [vmem:[#allocation30_spill] sm:$0xff] }
 0x5c8   :  { %v4925_v52 = vmul.f32 %v10737_v57, %v4924_v20  ;;  %v4922_v32 = vsel %vm4921_vm4, %v7202_v49, %v4918_v62  ;;  %vm4939_vm9 = vweird.f32 %v10745_v33  ;;  %v4776_v36 = vsub.f32 %v11037_v59, %v10717_v40 }
 0x5c9   :  { %v4705_v51 = vsub.f32 %v4673_v15, %v4689_v34  ;;  %v5007_v25 = vmul.f32 %v4922_v32, %v4767_v18  ;;  %v5008_v21 = vmul.f32 %v4922_v32, %v4768_v53  ;;  %v5009_v3 = vmul.f32 %v4922_v32, %v4769_v44 }
 0x5ca   :  { %v4926_v24 = vmul.f32 0.5, %v4925_v52  ;;  %v5010_v16 = vmul.f32 %v4922_v32, %v4770_v54  ;;  %v4777_v53 = vsub.f32 %v11038_v26, %v10717_v40 }
 0x5cb   :  { %v4721_v50 = vmax.f32 %v4705_v51, 0.0  ;;  %v5047_v12 = vpack.c.bf16 %v5007_v25, %v5003_v4  ;;  %v5048_v13 = vpack.c.bf16 %v5008_v21, %v5004_v63  ;;  %v5049_v41 = vpack.c.bf16 %v5009_v3, %v5005_v1 }
 0x5cc   :  { %v4491_v5 = vpop.xlane.xlu2 %4490  ;;  %v5050_v46 = vpack.c.bf16 %v5010_v16, %v5006_v58  ;;  %v4927_v43 = vsub.f32 1.5, %v4926_v24 }
 0x5cd   :  { %v10759_v23 = vadd.f32 1e-05, %v4721_v50  ;;  %v7206_v35 = vpop.eup %7205  ;;  %v10762_v45 = vmul.f32 %v10442_v39, %v4491_v5  ;;  %5352 = vmatmul.bf16.gmra.mxu0 %v5047_v12  ;;  %5401 = vmatmul.bf16.gmra.mxu1 %v5048_v13  ;;  %v11040_v12 = vld [vmem:[#allocation13_spill] sm:$0xff] }
 0x5ce   :  { %v4934_v61 = vmul.f32 %v7206_v35, %v10745_v33  ;;  %5450 = vmatmul.bf16.gmra.mxu2 %v5049_v41  ;;  %5499 = vmatmul.bf16.gmra.mxu3 %v5050_v46  ;;  %v4658_v31 = vpop.xlane.xlu1 %4657  ;;  %v4928_v14 = vmul.f32 %v10737_v57, %v4927_v43  ;;  %vm4940_vm8 = vweird.f32 %v7206_v35  ;;  %v4779_v13 = vsub.f32 %v11040_v12, %v10740_v38  ;;  %v11041_v41 = vld [vmem:[#allocation31_spill] sm:$0xff]  ;;  %v11042_v46 = vld [vmem:[#allocation33_spill] sm:$0xff] }
 0x5cf   :  { %7207 = vrsqrt.f32 %v10759_v23  ;;  %v4690_v55 = vmul.f32 %v10762_v45, %v10762_v45  ;;  %v4674_v0 = vmul.f32 %v4658_v31, %v10442_v39  ;;  %v4772_v39 = vsub.f32 %v11033_v30, %v10695_v56  ;;  %vm4941_vm10 = vmor %vm4939_vm9, %vm4940_vm8 }
 0x5d0   :  { %v4935_v47 = vmul.f32 %v7206_v35, %v4934_v61  ;;  %v4932_v10 = vsel %vm4931_vm7, %v10737_v57, %v4928_v14  ;;  %v11039_v57 = vld [vmem:[#allocation32_spill] sm:$0xff]  ;;  %vm4949_vm12 = vweird.f32 %v10759_v23  ;;  %v4780_v5 = vsub.f32 %v11041_v41, %v10740_v38  ;;  %v11043_v61 = vld [vmem:[#allocation14_spill] sm:$0xff] }
 0x5d1   :  { %v4706_v2 = vsub.f32 %v4674_v0, %v4690_v55  ;;  %v4778_v19 = vsub.f32 %v11039_v57, %v10717_v40  ;;  %v5011_v56 = vmul.f32 %v4932_v10, %v4771_v42  ;;  %v5012_v62 = vmul.f32 %v4932_v10, %v4772_v39 }
 0x5d2   :  { %v4936_v49 = vmul.f32 0.5, %v4935_v47  ;;  %v5013_v15 = vmul.f32 %v4932_v10, %v4773_v48  ;;  %v5014_v28 = vmul.f32 %v4932_v10, %v4774_v22  ;;  %v4783_v31 = vsub.f32 %v11043_v61, %v10762_v45  ;;  %v11045_v47 = vld [vmem:[#allocation19_spill] sm:$0xff] }
 0x5d3   :  { %v4722_v27 = vmax.f32 %v4706_v2, 0.0  ;;  %v4784_v14 = vsub.f32 %v11045_v47, %v10762_v45  ;;  %v11046_v2 = vld [vmem:[#allocation35_spill] sm:$0xff] }
 0x5d4   :  { %v4937_v29 = vsub.f32 1.5, %v4936_v49  ;;  %v4785_v49 = vsub.f32 %v11046_v2, %v10762_v45 }
 0x5d5   :  { %v7208_v60 = vpop.eup %7207  ;;  %v4802_v11 = vadd.f32 1e-05, %v4722_v27  ;;  %v11047_v27 = vld [vmem:[#allocation36_spill] sm:$0xff] }
 0x5d6   :  { %v4944_v8 = vmul.f32 %v7208_v60, %v10759_v23  ;;  %v4938_v18 = vmul.f32 %v7206_v35, %v4937_v29  ;;  %vm4950_vm11 = vweird.f32 %v7208_v60  ;;  %v11044_v23 = vld [vmem:[#allocation34_spill] sm:$0xff]  ;;  %v4786_v9 = vsub.f32 %v11047_v27, %v10762_v45  ;;  %v10811_v45 = vld [vmem:[%s10885_s8] ss:$0 sm:$0xff] }
 0x5d7   :  { %7209 = vrsqrt.f32 %v4802_v11  ;;  %vm4951_vm13 = vmor %vm4949_vm12, %vm4950_vm11  ;;  %vm4959_vm15 = vweird.f32 %v4802_v11  ;;  %v4782_v55 = vsub.f32 %v11044_v23, %v10740_v38 }
 0x5d8   :  { %v4945_v20 = vmul.f32 %v7208_v60, %v4944_v8  ;;  %v4942_v44 = vsel %vm4941_vm10, %v7206_v35, %v4938_v18  ;;  %v4781_v35 = vsub.f32 %v11042_v46, %v10740_v38 }
 0x5d9   :  { %v5015_v34 = vmul.f32 %v4942_v44, %v4775_v37  ;;  %v5016_v52 = vmul.f32 %v4942_v44, %v4776_v36  ;;  %v5017_v4 = vmul.f32 %v4942_v44, %v4777_v53  ;;  %v5018_v54 = vmul.f32 %v4942_v44, %v4778_v19 }
 0x5da   :  { %v4946_v33 = vmul.f32 0.5, %v4945_v20 }
 0x5db   :  { %v5051_v51 = vpack.c.bf16 %v5015_v34, %v5011_v56  ;;  %v5052_v32 = vpack.c.bf16 %v5016_v52, %v5012_v62  ;;  %v5053_v63 = vpack.c.bf16 %v5017_v4, %v5013_v15  ;;  %v5054_v24 = vpack.c.bf16 %v5018_v54, %v5014_v28 }
 0x5dc   :  { %v4947_v1 = vsub.f32 1.5, %v4946_v33 }
 0x5dd   :  { %v7210_v25 = vpop.eup %7209  ;;  %5357 = vmatmul.bf16.gmra.mxu0 %v5051_v51  ;;  %5406 = vmatmul.bf16.gmra.mxu1 %v5052_v32 }
 0x5de   :  { %v4954_v21 = vmul.f32 %v7210_v25, %v4802_v11  ;;  %5455 = vmatmul.bf16.gmra.mxu2 %v5053_v63  ;;  %5504 = vmatmul.bf16.gmra.mxu3 %v5054_v24  ;;  %v4948_v40 = vmul.f32 %v7208_v60, %v4947_v1  ;;  %vm4960_vm14 = vweird.f32 %v7210_v25 }
 0x5df   :  { %vm4961_vm0 = vmor %vm4959_vm15, %vm4960_vm14 }
 0x5e0   :  { %v4955_v3 = vmul.f32 %v7210_v25, %v4954_v21  ;;  %v4952_v16 = vsel %vm4951_vm13, %v7208_v60, %v4948_v40 }
 0x5e1   :  { %v5019_v0 = vmul.f32 %v4952_v16, %v4779_v13  ;;  %v5020_v60 = vmul.f32 %v4952_v16, %v4780_v5  ;;  %v5021_v29 = vmul.f32 %v4952_v16, %v4781_v35  ;;  %v5022_v30 = vmul.f32 %v4952_v16, %v4782_v55 }
 0x5e2   :  { %v4956_v50 = vmul.f32 0.5, %v4955_v3 }
 0x5e4   :  { %v4957_v58 = vsub.f32 1.5, %v4956_v50 }
 0x5e6   :  { %v4958_v43 = vmul.f32 %v7210_v25, %v4957_v58 }
 0x5e8   :  { %v4962_v42 = vsel %vm4961_vm0, %v7210_v25, %v4958_v43 }
 0x5e9   :  { %v5023_v39 = vmul.f32 %v4962_v42, %v4783_v31  ;;  %v5024_v6 = vmul.f32 %v4962_v42, %v4784_v14  ;;  %v5025_v48 = vmul.f32 %v4962_v42, %v4785_v49  ;;  %v5026_v8 = vmul.f32 %v4962_v42, %v4786_v9 }
 0x5eb   :  { %v5055_v38 = vpack.c.bf16 %v5023_v39, %v5019_v0  ;;  %v5056_v11 = vpack.c.bf16 %v5024_v6, %v5020_v60  ;;  %v5057_v10 = vpack.c.bf16 %v5025_v48, %v5021_v29  ;;  %v5058_v17 = vpack.c.bf16 %v5026_v8, %v5022_v30 }
 0x5ed   :  { %5362 = vmatmul.bf16.gmra.mxu0 %v5055_v38  ;;  %5411 = vmatmul.bf16.gmra.mxu1 %v5056_v11 }
 0x5ee   :  { %5460 = vmatmul.bf16.gmra.mxu2 %v5057_v10  ;;  %5509 = vmatmul.bf16.gmra.mxu3 %v5058_v17 }
 0x5fa   :  { %v5328_v22 = vpop.f32.mrf.mxu0  ;;  %v5377_v18 = vpop.f32.mrf.mxu1 }
 0x5fb   :  { %v5329_v7 = vadd.f32 %v10811_v45, %v5328_v22 }
 0x5fd   :  { %v5378_v37 = vadd.f32 %v5377_v18, %v5329_v7 }
 0x601   :  { %v5426_v59 = vpop.f32.mrf.mxu2  ;;  %v5475_v36 = vpop.f32.mrf.mxu3 }
 0x602   :  { %v5427_v20 = vadd.f32 %v5426_v59, %v5378_v37  ;;  %v5330_v26 = vpop.f32.mrf.mxu0  ;;  %v5379_v53 = vpop.f32.mrf.mxu1 }
 0x603   :  { %v5331_v19 = vadd.f32 %v10811_v45, %v5330_v26 }
 0x604   :  { %v5476_v57 = vadd.f32 %v5475_v36, %v5427_v20 }
 0x605   :  { %v5380_v44 = vadd.f32 %v5379_v53, %v5331_v19 }
 0x606   :  { %5515 = vst [vmem:[%s10886_s9] sm:$0xff] %v5476_v57 }
 0x609   :  { %v5428_v56 = vpop.f32.mrf.mxu2  ;;  %v5477_v62 = vpop.f32.mrf.mxu3 }
 0x60a   :  { %v5429_v15 = vadd.f32 %v5428_v56, %v5380_v44  ;;  %v5333_v33 = vpop.f32.mrf.mxu0  ;;  %v5382_v34 = vpop.f32.mrf.mxu1 }
 0x60b   :  { %v5334_v4 = vadd.f32 %v10811_v45, %v5333_v33 }
 0x60c   :  { %v5478_v52 = vadd.f32 %v5477_v62, %v5429_v15 }
 0x60d   :  { %v5383_v28 = vadd.f32 %v5382_v34, %v5334_v4 }
 0x60e   :  { %5516 = vst [vmem:[%s10886_s9 + $0x8] sm:$0xff] %v5478_v52 }
 0x611   :  { %v5431_v54 = vpop.f32.mrf.mxu2  ;;  %v5480_v51 = vpop.f32.mrf.mxu3 }
 0x612   :  { %v5432_v32 = vadd.f32 %v5431_v54, %v5383_v28  ;;  %v5335_v63 = vpop.f32.mrf.mxu0  ;;  %v5384_v1 = vpop.f32.mrf.mxu1 }
 0x613   :  { %v5336_v25 = vadd.f32 %v10811_v45, %v5335_v63 }
 0x614   :  { %v5481_v24 = vadd.f32 %v5480_v51, %v5432_v32 }
 0x615   :  { %v5385_v21 = vadd.f32 %v5384_v1, %v5336_v25 }
 0x616   :  { %5517 = vst [vmem:[%s10886_s9 + $0x10] sm:$0xff] %v5481_v24 }
 0x619   :  { %v5433_v40 = vpop.f32.mrf.mxu2  ;;  %v5482_v3 = vpop.f32.mrf.mxu3 }
 0x61a   :  { %v5434_v50 = vadd.f32 %v5433_v40, %v5385_v21  ;;  %v5338_v58 = vpop.f32.mrf.mxu0  ;;  %v5387_v16 = vpop.f32.mrf.mxu1 }
 0x61b   :  { %v5339_v13 = vadd.f32 %v10811_v45, %v5338_v58 }
 0x61c   :  { %v5483_v12 = vadd.f32 %v5482_v3, %v5434_v50 }
 0x61d   :  { %v5388_v41 = vadd.f32 %v5387_v16, %v5339_v13 }
 0x61e   :  { %5518 = vst [vmem:[%s10886_s9 + $0x18] sm:$0xff] %v5483_v12 }
 0x621   :  { %v5436_v5 = vpop.f32.mrf.mxu2  ;;  %v5485_v46 = vpop.f32.mrf.mxu3 }
 0x622   :  { %v5437_v35 = vadd.f32 %v5436_v5, %v5388_v41  ;;  %v5340_v43 = vpop.f32.mrf.mxu0  ;;  %v5389_v61 = vpop.f32.mrf.mxu1 }
 0x623   :  { %v5341_v23 = vadd.f32 %v10811_v45, %v5340_v43 }
 0x624   :  { %v5486_v31 = vadd.f32 %v5485_v46, %v5437_v35 }
 0x625   :  { %v5390_v55 = vadd.f32 %v5389_v61, %v5341_v23 }
 0x626   :  { %5519 = vst [vmem:[%s10886_s9 + $0x20] sm:$0xff] %v5486_v31 }
 0x629   :  { %v5438_v0 = vpop.f32.mrf.mxu2  ;;  %v5487_v47 = vpop.f32.mrf.mxu3 }
 0x62a   :  { %v5439_v14 = vadd.f32 %v5438_v0, %v5390_v55  ;;  %v5343_v2 = vpop.f32.mrf.mxu0  ;;  %v5392_v49 = vpop.f32.mrf.mxu1 }
 0x62b   :  { %v5344_v9 = vadd.f32 %v10811_v45, %v5343_v2 }
 0x62c   :  { %v5488_v27 = vadd.f32 %v5487_v47, %v5439_v14 }
 0x62d   :  { %v5393_v42 = vadd.f32 %v5392_v49, %v5344_v9 }
 0x62e   :  { %5520 = vst [vmem:[%s10886_s9 + $0x28] sm:$0xff] %v5488_v27 }
 0x631   :  { %v5441_v60 = vpop.f32.mrf.mxu2  ;;  %v5490_v29 = vpop.f32.mrf.mxu3 }
 0x632   :  { %v5442_v30 = vadd.f32 %v5441_v60, %v5393_v42  ;;  %v5345_v39 = vpop.f32.mrf.mxu0  ;;  %v5394_v6 = vpop.f32.mrf.mxu1 }
 0x633   :  { %v5346_v8 = vadd.f32 %v10811_v45, %v5345_v39 }
 0x634   :  { %v5491_v48 = vadd.f32 %v5490_v29, %v5442_v30 }
 0x635   :  { %v5395_v38 = vadd.f32 %v5394_v6, %v5346_v8 }
 0x636   :  { %5521 = vst [vmem:[%s10886_s9 + $0x30] sm:$0xff] %v5491_v48 }
 0x639   :  { %v5443_v11 = vpop.f32.mrf.mxu2  ;;  %v5492_v10 = vpop.f32.mrf.mxu3 }
 0x63a   :  { %v5444_v17 = vadd.f32 %v5443_v11, %v5395_v38  ;;  %v5348_v22 = vpop.f32.mrf.mxu0  ;;  %v5397_v18 = vpop.f32.mrf.mxu1 }
 0x63b   :  { %v5349_v37 = vadd.f32 %v10811_v45, %v5348_v22 }
 0x63c   :  { %v5493_v7 = vadd.f32 %v5492_v10, %v5444_v17 }
 0x63d   :  { %v5398_v59 = vadd.f32 %v5397_v18, %v5349_v37 }
 0x63e   :  { %5522 = vst [vmem:[%s10886_s9 + $0x38] sm:$0xff] %v5493_v7 }
 0x641   :  { %v5446_v36 = vpop.f32.mrf.mxu2  ;;  %v5495_v20 = vpop.f32.mrf.mxu3 }
 0x642   :  { %v5447_v26 = vadd.f32 %v5446_v36, %v5398_v59  ;;  %v5350_v53 = vpop.f32.mrf.mxu0  ;;  %v5399_v57 = vpop.f32.mrf.mxu1 }
 0x643   :  { %v5351_v44 = vadd.f32 %v10811_v45, %v5350_v53 }
 0x644   :  { %v5496_v19 = vadd.f32 %v5495_v20, %v5447_v26 }
 0x645   :  { %v5400_v56 = vadd.f32 %v5399_v57, %v5351_v44 }
 0x646   :  { %5523 = vst [vmem:[%s10886_s9 + $0x40] sm:$0xff] %v5496_v19 }
 0x649   :  { %v5448_v62 = vpop.f32.mrf.mxu2  ;;  %v5497_v15 = vpop.f32.mrf.mxu3 }
 0x64a   :  { %v5449_v33 = vadd.f32 %v5448_v62, %v5400_v56  ;;  %v5353_v34 = vpop.f32.mrf.mxu0  ;;  %v5402_v52 = vpop.f32.mrf.mxu1 }
 0x64b   :  { %v5354_v28 = vadd.f32 %v10811_v45, %v5353_v34 }
 0x64c   :  { %v5498_v4 = vadd.f32 %v5497_v15, %v5449_v33 }
 0x64d   :  { %v5403_v54 = vadd.f32 %v5402_v52, %v5354_v28 }
 0x64e   :  { %5524 = vst [vmem:[%s10886_s9 + $0x48] sm:$0xff] %v5498_v4 }
 0x651   :  { %v5451_v51 = vpop.f32.mrf.mxu2  ;;  %v5500_v32 = vpop.f32.mrf.mxu3 }
 0x652   :  { %v5452_v63 = vadd.f32 %v5451_v51, %v5403_v54  ;;  %v5355_v1 = vpop.f32.mrf.mxu0  ;;  %v5404_v24 = vpop.f32.mrf.mxu1 }
 0x653   :  { %v5356_v21 = vadd.f32 %v10811_v45, %v5355_v1 }
 0x654   :  { %v5501_v25 = vadd.f32 %v5500_v32, %v5452_v63 }
 0x655   :  { %v5405_v40 = vadd.f32 %v5404_v24, %v5356_v21 }
 0x656   :  { %5525 = vst [vmem:[%s10886_s9 + $0x50] sm:$0xff] %v5501_v25 }
 0x659   :  { %v5453_v3 = vpop.f32.mrf.mxu2  ;;  %v5502_v50 = vpop.f32.mrf.mxu3 }
 0x65a   :  { %v5454_v58 = vadd.f32 %v5453_v3, %v5405_v40  ;;  %v5358_v16 = vpop.f32.mrf.mxu0  ;;  %v5407_v12 = vpop.f32.mrf.mxu1 }
 0x65b   :  { %v5359_v41 = vadd.f32 %v10811_v45, %v5358_v16 }
 0x65c   :  { %v5503_v13 = vadd.f32 %v5502_v50, %v5454_v58 }
 0x65d   :  { %v5408_v5 = vadd.f32 %v5407_v12, %v5359_v41 }
 0x65e   :  { %5526 = vst [vmem:[%s10886_s9 + $0x58] sm:$0xff] %v5503_v13 }
 0x661   :  { %v5456_v46 = vpop.f32.mrf.mxu2  ;;  %v5505_v35 = vpop.f32.mrf.mxu3 }
 0x662   :  { %v5457_v43 = vadd.f32 %v5456_v46, %v5408_v5  ;;  %v5360_v61 = vpop.f32.mrf.mxu0  ;;  %v5409_v31 = vpop.f32.mrf.mxu1 }
 0x663   :  { %v5361_v55 = vadd.f32 %v10811_v45, %v5360_v61 }
 0x664   :  { %v5506_v23 = vadd.f32 %v5505_v35, %v5457_v43 }
 0x665   :  { %v5410_v0 = vadd.f32 %v5409_v31, %v5361_v55 }
 0x666   :  { %5527 = vst [vmem:[%s10886_s9 + $0x60] sm:$0xff] %v5506_v23 }
 0x669   :  { %v5458_v47 = vpop.f32.mrf.mxu2  ;;  %v5507_v14 = vpop.f32.mrf.mxu3 }
 0x66a   :  { %v5459_v2 = vadd.f32 %v5458_v47, %v5410_v0  ;;  %v5363_v49 = vpop.f32.mrf.mxu0  ;;  %v5412_v42 = vpop.f32.mrf.mxu1 }
 0x66b   :  { %v5364_v9 = vadd.f32 %v10811_v45, %v5363_v49 }
 0x66c   :  { %v5508_v27 = vadd.f32 %v5507_v14, %v5459_v2 }
 0x66d   :  { %v5413_v60 = vadd.f32 %v5412_v42, %v5364_v9 }
 0x66e   :  { %5528 = vst [vmem:[%s10886_s9 + $0x68] sm:$0xff] %v5508_v27 }
 0x671   :  { %v5461_v29 = vpop.f32.mrf.mxu2  ;;  %v5510_v30 = vpop.f32.mrf.mxu3 }
 0x672   :  { %v5462_v39 = vadd.f32 %v5461_v29, %v5413_v60  ;;  %v5365_v6 = vpop.f32.mrf.mxu0  ;;  %v5414_v38 = vpop.f32.mrf.mxu1 }
 0x673   :  { %v5366_v8 = vadd.f32 %v10811_v45, %v5365_v6 }
 0x674   :  { %v5511_v48 = vadd.f32 %v5510_v30, %v5462_v39 }
 0x675   :  { %v5415_v11 = vadd.f32 %v5414_v38, %v5366_v8 }
 0x676   :  { %5529 = vst [vmem:[%s10886_s9 + $0x70] sm:$0xff] %v5511_v48 }
 0x679   :  { %v5463_v10 = vpop.f32.mrf.mxu2  ;;  %v5512_v22 = vpop.f32.mrf.mxu3 }
 0x67a   :  { %v5464_v17 = vadd.f32 %v5463_v10, %v5415_v11 }
 0x67c   :  { %v5513_v18 = vadd.f32 %v5512_v22, %v5464_v17 }
 0x67e   :  { %5530 = vst [vmem:[%s10886_s9 + $0x78] sm:$0xff] %v5513_v18 }

</bundles_post_ra>
